<compile_context>
chip_gen: v5e
topology: v5e:2x2
jax: 0.10.0
libtpu: 0.0.40
codegen_flags: <defaults>
</compile_context>

<pallas_src>
import functools
import math

import jax
import jax.numpy as jnp
from jax.experimental import pallas as pl
from jax.experimental.pallas import tpu as pltpu


# ----------------------------------------------------------------------------
# index maps
# ----------------------------------------------------------------------------
def _batch3(b):   # per-batch (1, T, F) block
    return (b, 0, 0)


def _c2(b):       # whole 2-D array, resident across grid steps
    return (0, 0)


def _c3(b):       # whole 3-D (stacked per-layer) array, resident across grid steps
    return (0, 0, 0)


# ----------------------------------------------------------------------------
# Fused forward kernel (one grid step == one batch element)
# ----------------------------------------------------------------------------
def _fused_kt_kernel(
    xm_ref, kf_ref, erelT_ref, alphas_ref,
    enc_w1_ref, enc_b1_ref, enc_w2_ref, enc_b2_ref,
    kf_w1_ref, kf_b1_ref, kf_w2_ref, kf_b2_ref,
    ln_g_ref, ln_b_ref,
    wqkv_ref, bqkv_ref, wo_ref, bo_ref,
    ffw1_ref, ffb1_ref, ffw2_ref, ffb2_ref,
    dec_w1_ref, dec_b1_ref, dec_w2_ref, dec_b2_ref,
    o_ref,
    *, seq_len: int, num_heads: int, num_layers: int, head_dim: int):
  T = seq_len
  H = num_heads
  hd = head_dim
  L = num_layers
  dm = H * hd
  scale = 1.0 / math.sqrt(hd)

  # PReLU alphas packed as (1, 4+L): [enc1, enc2, kf, dec, ff_layer0, ...]
  al = alphas_ref[...]

  def prelu(y, idx):
    a = al[0:1, idx:idx + 1]                       # (1,1) broadcast
    return jnp.where(y >= 0.0, y, a * y)

  g = ln_g_ref[...]                                # (1, dm)
  bt = ln_b_ref[...]                               # (1, dm)

  def layernorm(x):                                # shared nn.LayerNorm(d_model)
    mu = jnp.mean(x, axis=-1, keepdims=True)
    var = jnp.mean((x - mu) * (x - mu), axis=-1, keepdims=True)
    return (x - mu) * jax.lax.rsqrt(var + 1e-5) * g + bt

  # --- keyframe positional embedding (Din=2 layer on the VPU, not the MXU) ---
  kf = kf_ref[0]                                   # (T, 2)
  kw1 = kf_w1_ref[...]                             # (2, dm)
  k1 = kf[:, 0:1] * kw1[0:1, :] + kf[:, 1:2] * kw1[1:2, :] + kf_b1_ref[...]
  k1 = prelu(k1, 2)
  kf_emb = jnp.dot(k1, kf_w2_ref[...],
                   preferred_element_type=jnp.float32) + kf_b2_ref[...]

  # --- encoder on concat([x, mask]) ---
  xm = xm_ref[0]                                   # (T, enc_in)
  e1 = prelu(jnp.dot(xm, enc_w1_ref[...],
                     preferred_element_type=jnp.float32) + enc_b1_ref[...], 0)
  e2 = prelu(jnp.dot(e1, enc_w2_ref[...],
                     preferred_element_type=jnp.float32) + enc_b2_ref[...], 1)
  h_ctx = e2 + kf_emb                              # (T, dm), stays in registers

  # --- relative-position machinery (shared across layers/heads) ---
  erelT = erelT_ref[...]                           # (hd, 2T-1)
  jj = jax.lax.broadcasted_iota(jnp.int32, (T, T), 1)
  tt = jax.lax.broadcasted_iota(jnp.int32, (T, T), 0)
  need = jj - tt + (T - 1)                         # relative index j - t + T - 1

  def skew(r_all):                                 # (T, 2T-1) -> (T, T)
    s = jnp.where(need == 0, r_all[:, 0:1], 0.0)
    for r in range(1, 2 * T - 1):
      s = s + jnp.where(need == r, r_all[:, r:r + 1], 0.0)
    return s

  # --- transformer layers (static unroll; all weights VMEM-resident) ---
  for l in range(L):
    # pre-LN, fused QKV projection (one (T,dm) x (dm,3*dm) matmul)
    hn = layernorm(h_ctx)
    qkv = jnp.dot(hn, wqkv_ref[l],
                  preferred_element_type=jnp.float32) + bqkv_ref[l]   # (T, 3*dm)
    wo_l = wo_ref[l]                                                  # (dm, dm)

    out_acc = None
    for h in range(H):
      q_h = qkv[:, h * hd:(h + 1) * hd]                               # (T, hd)
      k_h = qkv[:, dm + h * hd:dm + (h + 1) * hd]
      v_h = qkv[:, 2 * dm + h * hd:2 * dm + (h + 1) * hd]

      s_c = jnp.dot(q_h, k_h.T, preferred_element_type=jnp.float32)   # (T, T)
      r_all = jnp.dot(q_h, erelT, preferred_element_type=jnp.float32) # (T, 2T-1)
      s = (s_c + skew(r_all)) * scale

      m = jnp.max(s, axis=-1, keepdims=True)
      p = jnp.exp(s - m)
      p = p * pl.reciprocal(jnp.sum(p, axis=-1, keepdims=True), approx=True)

      o_h = jnp.dot(p, v_h, preferred_element_type=jnp.float32)       # (T, hd)
      # concat-heads @ Wo  ==  sum_h o_h @ Wo[h*hd:(h+1)*hd, :]
      contrib = jnp.dot(o_h, wo_l[h * hd:(h + 1) * hd, :],
                        preferred_element_type=jnp.float32)
      out_acc = contrib if out_acc is None else out_acc + contrib

    h_ctx = h_ctx + out_acc + bo_ref[l]            # residual (outside MHA)

    # pre-LN feed-forward + residual
    hn2 = layernorm(h_ctx)
    f = jnp.dot(hn2, ffw1_ref[l],
                preferred_element_type=jnp.float32) + ffb1_ref[l]
    f = prelu(f, 4 + l)
    f2 = jnp.dot(f, ffw2_ref[l],
                 preferred_element_type=jnp.float32) + ffb2_ref[l]
    h_ctx = h_ctx + f2

  # --- decoder ---
  d1 = prelu(jnp.dot(h_ctx, dec_w1_ref[...],
                     preferred_element_type=jnp.float32) + dec_b1_ref[...], 3)
  y = jnp.dot(d1, dec_w2_ref[...],
              preferred_element_type=jnp.float32) + dec_b2_ref[...]
  o_ref[0] = y.astype(o_ref.dtype)


# ----------------------------------------------------------------------------
# Parameter init (deterministic, torch-Linear-like uniform init, PReLU=0.25)
# ----------------------------------------------------------------------------
def init_params(key, geometry_dim, motion_dim, num_layers, num_heads, d_model, d_ff):
  head_dim = d_model // num_heads
  counter = [0]

  def next_key():
    counter[0] += 1
    return jax.random.fold_in(key, counter[0])

  def lin(din, dout):
    bound = 1.0 / math.sqrt(din)
    w = jax.random.uniform(next_key(), (din, dout), jnp.float32, -bound, bound)
    b = jax.random.uniform(next_key(), (dout,), jnp.float32, -bound, bound)
    return w, b

  def prelu_p():
    return jnp.full((1, 1), 0.25, jnp.float32)

  p = {}
  enc_in = geometry_dim + 2 * motion_dim
  p['enc_w1'], p['enc_b1'] = lin(enc_in, d_model); p['enc_a1'] = prelu_p()
  p['enc_w2'], p['enc_b2'] = lin(d_model, d_model); p['enc_a2'] = prelu_p()

  p['kf_w1'], p['kf_b1'] = lin(2, d_model); p['kf_a1'] = prelu_p()
  p['kf_w2'], p['kf_b2'] = lin(d_model, d_model)

  p['rp_w1'], p['rp_b1'] = lin(1, d_model); p['rp_a1'] = prelu_p()
  p['rp_w2'], p['rp_b2'] = lin(d_model, head_dim)

  p['ln_g'] = jnp.ones((1, d_model), jnp.float32)
  p['ln_b'] = jnp.zeros((1, d_model), jnp.float32)

  wqkv, bqkv, wo, bo = [], [], [], []
  fw1, fb1, fa1, fw2, fb2 = [], [], [], [], []
  for _ in range(num_layers):
    wq, bq = lin(d_model, num_heads * head_dim)
    wk, bk = lin(d_model, num_heads * head_dim)
    wv, bv = lin(d_model, num_heads * head_dim)
    wqkv.append(jnp.concatenate([wq, wk, wv], axis=1))
    bqkv.append(jnp.concatenate([bq, bk, bv], axis=0).reshape(1, -1))
    w_o, b_o = lin(num_heads * head_dim, d_model)
    wo.append(w_o); bo.append(b_o.reshape(1, -1))
    w1, b1 = lin(d_model, d_ff)
    fw1.append(w1); fb1.append(b1.reshape(1, -1)); fa1.append(prelu_p())
    w2, b2 = lin(d_ff, d_model)
    fw2.append(w2); fb2.append(b2.reshape(1, -1))

  p['wqkv'] = jnp.stack(wqkv); p['bqkv'] = jnp.stack(bqkv)
  p['wo'] = jnp.stack(wo); p['bo'] = jnp.stack(bo)
  p['ff_w1'] = jnp.stack(fw1); p['ff_b1'] = jnp.stack(fb1)
  p['ff_w2'] = jnp.stack(fw2); p['ff_b2'] = jnp.stack(fb2)
  p['ff_a1'] = jnp.concatenate(fa1, axis=1)          # (1, L)

  p['dec_w1'], p['dec_b1'] = lin(d_model, d_model); p['dec_a1'] = prelu_p()
  p['dec_w2'], p['dec_b2'] = lin(d_model, motion_dim)
  return p


# ----------------------------------------------------------------------------
# Forward pass: thin JAX glue + one fused pallas_call
# ----------------------------------------------------------------------------
def kinematic_transformer_forward(params, x, mask, kf_pos, num_heads):
  B, T, _ = x.shape
  d_model = params['ln_g'].shape[-1]
  H = num_heads
  hd = d_model // H
  L = params['wqkv'].shape[0]
  enc_in = params['enc_w1'].shape[0]
  d_ff = params['ff_w1'].shape[2]
  motion_dim = params['dec_w2'].shape[1]

  # Din=1 relative-position MLP in plain JAX (K=1 matmul would waste the MXU);
  # shared across batches & layers, so it is computed once and kept VMEM-resident.
  rel = jnp.arange(-T + 1, T, dtype=jnp.float32)[:, None]          # (2T-1, 1)
  e = rel @ params['rp_w1'] + params['rp_b1']
  e = jnp.where(e >= 0.0, e, params['rp_a1'] * e)
  E_rel = e @ params['rp_w2'] + params['rp_b2']                    # (2T-1, hd)
  E_relT = E_rel.T                                                 # (hd, 2T-1)

  xm = jnp.concatenate([x, mask], axis=-1)                         # (B, T, enc_in)
  alphas = jnp.concatenate(
      [params['enc_a1'], params['enc_a2'], params['kf_a1'],
       params['dec_a1'], params['ff_a1']], axis=1)                 # (1, 4+L)

  inputs = [
      xm, kf_pos, E_relT, alphas,
      params['enc_w1'], params['enc_b1'].reshape(1, -1),
      params['enc_w2'], params['enc_b2'].reshape(1, -1),
      params['kf_w1'], params['kf_b1'].reshape(1, -1),
      params['kf_w2'], params['kf_b2'].reshape(1, -1),
      params['ln_g'], params['ln_b'],
      params['wqkv'], params['bqkv'], params['wo'], params['bo'],
      params['ff_w1'], params['ff_b1'], params['ff_w2'], params['ff_b2'],
      params['dec_w1'], params['dec_b1'].reshape(1, -1),
      params['dec_w2'], params['dec_b2'].reshape(1, -1),
  ]

  in_specs = [
      pl.BlockSpec((1, T, enc_in), _batch3),
      pl.BlockSpec((1, T, 2), _batch3),
      pl.BlockSpec((hd, 2 * T - 1), _c2),
      pl.BlockSpec((1, 4 + L), _c2),
      pl.BlockSpec((enc_in, d_model), _c2),
      pl.BlockSpec((1, d_model), _c2),
      pl.BlockSpec((d_model, d_model), _c2),
      pl.BlockSpec((1, d_model), _c2),
      pl.BlockSpec((2, d_model), _c2),
      pl.BlockSpec((1, d_model), _c2),
      pl.BlockSpec((d_model, d_model), _c2),
      pl.BlockSpec((1, d_model), _c2),
      pl.BlockSpec((1, d_model), _c2),
      pl.BlockSpec((1, d_model), _c2),
      pl.BlockSpec((L, d_model, 3 * d_model), _c3),
      pl.BlockSpec((L, 1, 3 * d_model), _c3),
      pl.BlockSpec((L, d_model, d_model), _c3),
      pl.BlockSpec((L, 1, d_model), _c3),
      pl.BlockSpec((L, d_model, d_ff), _c3),
      pl.BlockSpec((L, 1, d_ff), _c3),
      pl.BlockSpec((L, d_ff, d_model), _c3),
      pl.BlockSpec((L, 1, d_model), _c3),
      pl.BlockSpec((d_model, d_model), _c2),
      pl.BlockSpec((1, d_model), _c2),
      pl.BlockSpec((d_model, motion_dim), _c2),
      pl.BlockSpec((1, motion_dim), _c2),
  ]

  return pl.pallas_call(
      functools.partial(_fused_kt_kernel, seq_len=T, num_heads=H,
                        num_layers=L, head_dim=hd),
      grid=(B,),
      in_specs=in_specs,
      out_specs=pl.BlockSpec((1, T, motion_dim), _batch3),
      out_shape=jax.ShapeDtypeStruct((B, T, motion_dim), jnp.float32),
      compiler_params=pltpu.CompilerParams(dimension_semantics=("parallel",)),
  )(*inputs)


# ----------------------------------------------------------------------------
# Main
# ----------------------------------------------------------------------------
if __name__ == "__main__":
  geometry_dim, motion_dim = 12, 10
  num_layers, num_heads, d_model, d_ff = 2, 4, 128, 256
  B, T = 2, 8

  key = jax.random.PRNGKey(0)
  kx, km, kk, kp = jax.random.split(key, 4)
  x = jax.random.normal(kx, (B, T, geometry_dim + motion_dim), jnp.float32)
  mask = (jax.random.uniform(km, (B, T, motion_dim)) > 0.5).astype(jnp.float32)
  kf_pos = jax.random.normal(kk, (B, T, 2), jnp.float32)

  params = init_params(kp, geometry_dim, motion_dim,
                       num_layers, num_heads, d_model, d_ff)

  fwd = jax.jit(kinematic_transformer_forward, static_argnums=(4,))
  y = fwd(params, x, mask, kf_pos, num_heads)
  jax.block_until_ready(y)

  assert y.shape == (B, T, motion_dim), y.shape
  assert bool(jnp.all(jnp.isfinite(y)))
  print("KERNEL_OK")
</pallas_src>

<mosaic_0001>
module attributes {stable_mosaic.version = 11 : i64} {
  func.func @_fused_kt_kernel(%arg0: i32, %arg1: memref<1x8x32xf32, #tpu.memory_space<vmem>>, %arg2: memref<1x8x2xf32, #tpu.memory_space<vmem>>, %arg3: memref<32x15xf32, #tpu.memory_space<vmem>>, %arg4: memref<1x6xf32, #tpu.memory_space<vmem>>, %arg5: memref<32x128xf32, #tpu.memory_space<vmem>>, %arg6: memref<1x128xf32, #tpu.memory_space<vmem>>, %arg7: memref<128x128xf32, #tpu.memory_space<vmem>>, %arg8: memref<1x128xf32, #tpu.memory_space<vmem>>, %arg9: memref<2x128xf32, #tpu.memory_space<vmem>>, %arg10: memref<1x128xf32, #tpu.memory_space<vmem>>, %arg11: memref<128x128xf32, #tpu.memory_space<vmem>>, %arg12: memref<1x128xf32, #tpu.memory_space<vmem>>, %arg13: memref<1x128xf32, #tpu.memory_space<vmem>>, %arg14: memref<1x128xf32, #tpu.memory_space<vmem>>, %arg15: memref<2x128x384xf32, #tpu.memory_space<vmem>>, %arg16: memref<2x1x384xf32, #tpu.memory_space<vmem>>, %arg17: memref<2x128x128xf32, #tpu.memory_space<vmem>>, %arg18: memref<2x1x128xf32, #tpu.memory_space<vmem>>, %arg19: memref<2x128x256xf32, #tpu.memory_space<vmem>>, %arg20: memref<2x1x256xf32, #tpu.memory_space<vmem>>, %arg21: memref<2x256x128xf32, #tpu.memory_space<vmem>>, %arg22: memref<2x1x128xf32, #tpu.memory_space<vmem>>, %arg23: memref<128x128xf32, #tpu.memory_space<vmem>>, %arg24: memref<1x128xf32, #tpu.memory_space<vmem>>, %arg25: memref<128x10xf32, #tpu.memory_space<vmem>>, %arg26: memref<1x10xf32, #tpu.memory_space<vmem>>, %arg27: memref<1x8x10xf32, #tpu.memory_space<vmem>>) attributes {dimension_semantics = [#tpu.dimension_semantics<parallel>], iteration_bounds = array<i64: 2>, scalar_prefetch = 0 : i64, scratch_operands = 0 : i64, tpu.core_type = #tpu.core_type<tc>, window_params = [{transform_indices = @transform_0, window_bounds = array<i64: 1, 8, 32>}, {transform_indices = @transform_1, window_bounds = array<i64: 1, 8, 2>}, {pipeline_mode = #tpu.pipeline_mode<synchronous>, transform_indices = @transform_2, window_bounds = array<i64: 32, 15>}, {pipeline_mode = #tpu.pipeline_mode<synchronous>, transform_indices = @transform_3, window_bounds = array<i64: 1, 6>}, {pipeline_mode = #tpu.pipeline_mode<synchronous>, transform_indices = @transform_4, window_bounds = array<i64: 32, 128>}, {pipeline_mode = #tpu.pipeline_mode<synchronous>, transform_indices = @transform_5, window_bounds = array<i64: 1, 128>}, {pipeline_mode = #tpu.pipeline_mode<synchronous>, transform_indices = @transform_6, window_bounds = array<i64: 128, 128>}, {pipeline_mode = #tpu.pipeline_mode<synchronous>, transform_indices = @transform_7, window_bounds = array<i64: 1, 128>}, {pipeline_mode = #tpu.pipeline_mode<synchronous>, transform_indices = @transform_8, window_bounds = array<i64: 2, 128>}, {pipeline_mode = #tpu.pipeline_mode<synchronous>, transform_indices = @transform_9, window_bounds = array<i64: 1, 128>}, {pipeline_mode = #tpu.pipeline_mode<synchronous>, transform_indices = @transform_10, window_bounds = array<i64: 128, 128>}, {pipeline_mode = #tpu.pipeline_mode<synchronous>, transform_indices = @transform_11, window_bounds = array<i64: 1, 128>}, {pipeline_mode = #tpu.pipeline_mode<synchronous>, transform_indices = @transform_12, window_bounds = array<i64: 1, 128>}, {pipeline_mode = #tpu.pipeline_mode<synchronous>, transform_indices = @transform_13, window_bounds = array<i64: 1, 128>}, {pipeline_mode = #tpu.pipeline_mode<synchronous>, transform_indices = @transform_14, window_bounds = array<i64: 2, 128, 384>}, {pipeline_mode = #tpu.pipeline_mode<synchronous>, transform_indices = @transform_15, window_bounds = array<i64: 2, 1, 384>}, {pipeline_mode = #tpu.pipeline_mode<synchronous>, transform_indices = @transform_16, window_bounds = array<i64: 2, 128, 128>}, {pipeline_mode = #tpu.pipeline_mode<synchronous>, transform_indices = @transform_17, window_bounds = array<i64: 2, 1, 128>}, {pipeline_mode = #tpu.pipeline_mode<synchronous>, transform_indices = @transform_18, window_bounds = array<i64: 2, 128, 256>}, {pipeline_mode = #tpu.pipeline_mode<synchronous>, transform_indices = @transform_19, window_bounds = array<i64: 2, 1, 256>}, {pipeline_mode = #tpu.pipeline_mode<synchronous>, transform_indices = @transform_20, window_bounds = array<i64: 2, 256, 128>}, {pipeline_mode = #tpu.pipeline_mode<synchronous>, transform_indices = @transform_21, window_bounds = array<i64: 2, 1, 128>}, {pipeline_mode = #tpu.pipeline_mode<synchronous>, transform_indices = @transform_22, window_bounds = array<i64: 128, 128>}, {pipeline_mode = #tpu.pipeline_mode<synchronous>, transform_indices = @transform_23, window_bounds = array<i64: 1, 128>}, {pipeline_mode = #tpu.pipeline_mode<synchronous>, transform_indices = @transform_24, window_bounds = array<i64: 128, 10>}, {pipeline_mode = #tpu.pipeline_mode<synchronous>, transform_indices = @transform_25, window_bounds = array<i64: 1, 10>}, {transform_indices = @transform_26, window_bounds = array<i64: 1, 8, 10>}]} {
    %c0 = arith.constant 0 : index
    %c0_0 = arith.constant 0 : index
    %0 = vector.load %arg4[%c0, %c0_0] : memref<1x6xf32, #tpu.memory_space<vmem>>, vector<1x6xf32>
    %c0_1 = arith.constant 0 : index
    %c0_2 = arith.constant 0 : index
    %1 = vector.load %arg13[%c0_1, %c0_2] : memref<1x128xf32, #tpu.memory_space<vmem>>, vector<1x128xf32>
    %c0_3 = arith.constant 0 : index
    %c0_4 = arith.constant 0 : index
    %2 = vector.load %arg14[%c0_3, %c0_4] : memref<1x128xf32, #tpu.memory_space<vmem>>, vector<1x128xf32>
    %c0_5 = arith.constant 0 : index
    %c0_6 = arith.constant 0 : index
    %c0_7 = arith.constant 0 : index
    %3 = vector.load %arg2[%c0_5, %c0_6, %c0_7] : memref<1x8x2xf32, #tpu.memory_space<vmem>>, vector<1x8x2xf32>
    %4 = vector.shape_cast %3 : vector<1x8x2xf32> to vector<8x2xf32>
    %c0_8 = arith.constant 0 : index
    %c0_9 = arith.constant 0 : index
    %5 = vector.load %arg9[%c0_8, %c0_9] : memref<2x128xf32, #tpu.memory_space<vmem>>, vector<2x128xf32>
    %6 = vector.extract_strided_slice %4 {offsets = [0, 0], sizes = [8, 1], strides = [1, 1]} : vector<8x2xf32> to vector<8x1xf32>
    %7 = vector.extract_strided_slice %5 {offsets = [0, 0], sizes = [1, 128], strides = [1, 1]} : vector<2x128xf32> to vector<1x128xf32>
    %8 = vector.broadcast %6 : vector<8x1xf32> to vector<8x128xf32>
    %9 = vector.broadcast %7 : vector<1x128xf32> to vector<8x128xf32>
    %10 = arith.mulf %8, %9 : vector<8x128xf32>
    %11 = vector.extract_strided_slice %4 {offsets = [0, 1], sizes = [8, 1], strides = [1, 1]} : vector<8x2xf32> to vector<8x1xf32>
    %12 = vector.extract_strided_slice %5 {offsets = [1, 0], sizes = [1, 128], strides = [1, 1]} : vector<2x128xf32> to vector<1x128xf32>
    %13 = vector.broadcast %11 : vector<8x1xf32> to vector<8x128xf32>
    %14 = vector.broadcast %12 : vector<1x128xf32> to vector<8x128xf32>
    %15 = arith.mulf %13, %14 : vector<8x128xf32>
    %16 = arith.addf %10, %15 : vector<8x128xf32>
    %c0_10 = arith.constant 0 : index
    %c0_11 = arith.constant 0 : index
    %17 = vector.load %arg10[%c0_10, %c0_11] : memref<1x128xf32, #tpu.memory_space<vmem>>, vector<1x128xf32>
    %18 = vector.broadcast %17 : vector<1x128xf32> to vector<8x128xf32>
    %19 = arith.addf %16, %18 : vector<8x128xf32>
    %20 = vector.extract_strided_slice %0 {offsets = [0, 2], sizes = [1, 1], strides = [1, 1]} : vector<1x6xf32> to vector<1x1xf32>
    %cst = arith.constant 0.000000e+00 : f32
    %21 = vector.broadcast %cst : f32 to vector<8x128xf32>
    %22 = arith.cmpf oge, %19, %21 : vector<8x128xf32>
    %23 = vector.broadcast %20 : vector<1x1xf32> to vector<8x128xf32>
    %24 = arith.mulf %23, %19 : vector<8x128xf32>
    %25 = arith.select %22, %19, %24 : vector<8x128xi1>, vector<8x128xf32>
    %c0_12 = arith.constant 0 : index
    %c0_13 = arith.constant 0 : index
    %26 = vector.load %arg11[%c0_12, %c0_13] : memref<128x128xf32, #tpu.memory_space<vmem>>, vector<128x128xf32>
    %cst_14 = arith.constant dense<0.000000e+00> : vector<8x128xf32>
    %27 = tpu.matmul %25, %26, %cst_14 {dimension_numbers = #tpu.dot_dimension_numbers<[1], [0], [0], [1], [0, 0, 1, 1], [], []>} : vector<8x128xf32>, vector<128x128xf32>, vector<8x128xf32> -> vector<8x128xf32>
    %c0_15 = arith.constant 0 : index
    %c0_16 = arith.constant 0 : index
    %28 = vector.load %arg12[%c0_15, %c0_16] : memref<1x128xf32, #tpu.memory_space<vmem>>, vector<1x128xf32>
    %29 = vector.broadcast %28 : vector<1x128xf32> to vector<8x128xf32>
    %30 = arith.addf %27, %29 : vector<8x128xf32>
    %c0_17 = arith.constant 0 : index
    %c0_18 = arith.constant 0 : index
    %c0_19 = arith.constant 0 : index
    %31 = vector.load %arg1[%c0_17, %c0_18, %c0_19] : memref<1x8x32xf32, #tpu.memory_space<vmem>>, vector<1x8x32xf32>
    %32 = vector.shape_cast %31 : vector<1x8x32xf32> to vector<8x32xf32>
    %c0_20 = arith.constant 0 : index
    %c0_21 = arith.constant 0 : index
    %33 = vector.load %arg5[%c0_20, %c0_21] : memref<32x128xf32, #tpu.memory_space<vmem>>, vector<32x128xf32>
    %cst_22 = arith.constant dense<0.000000e+00> : vector<8x128xf32>
    %34 = tpu.matmul %32, %33, %cst_22 {dimension_numbers = #tpu.dot_dimension_numbers<[1], [0], [0], [1], [0, 0, 1, 1], [], []>} : vector<8x32xf32>, vector<32x128xf32>, vector<8x128xf32> -> vector<8x128xf32>
    %c0_23 = arith.constant 0 : index
    %c0_24 = arith.constant 0 : index
    %35 = vector.load %arg6[%c0_23, %c0_24] : memref<1x128xf32, #tpu.memory_space<vmem>>, vector<1x128xf32>
    %36 = vector.broadcast %35 : vector<1x128xf32> to vector<8x128xf32>
    %37 = arith.addf %34, %36 : vector<8x128xf32>
    %38 = vector.extract_strided_slice %0 {offsets = [0, 0], sizes = [1, 1], strides = [1, 1]} : vector<1x6xf32> to vector<1x1xf32>
    %cst_25 = arith.constant 0.000000e+00 : f32
    %39 = vector.broadcast %cst_25 : f32 to vector<8x128xf32>
    %40 = arith.cmpf oge, %37, %39 : vector<8x128xf32>
    %41 = vector.broadcast %38 : vector<1x1xf32> to vector<8x128xf32>
    %42 = arith.mulf %41, %37 : vector<8x128xf32>
    %43 = arith.select %40, %37, %42 : vector<8x128xi1>, vector<8x128xf32>
    %c0_26 = arith.constant 0 : index
    %c0_27 = arith.constant 0 : index
    %44 = vector.load %arg7[%c0_26, %c0_27] : memref<128x128xf32, #tpu.memory_space<vmem>>, vector<128x128xf32>
    %cst_28 = arith.constant dense<0.000000e+00> : vector<8x128xf32>
    %45 = tpu.matmul %43, %44, %cst_28 {dimension_numbers = #tpu.dot_dimension_numbers<[1], [0], [0], [1], [0, 0, 1, 1], [], []>} : vector<8x128xf32>, vector<128x128xf32>, vector<8x128xf32> -> vector<8x128xf32>
    %c0_29 = arith.constant 0 : index
    %c0_30 = arith.constant 0 : index
    %46 = vector.load %arg8[%c0_29, %c0_30] : memref<1x128xf32, #tpu.memory_space<vmem>>, vector<1x128xf32>
    %47 = vector.broadcast %46 : vector<1x128xf32> to vector<8x128xf32>
    %48 = arith.addf %45, %47 : vector<8x128xf32>
    %49 = vector.extract_strided_slice %0 {offsets = [0, 1], sizes = [1, 1], strides = [1, 1]} : vector<1x6xf32> to vector<1x1xf32>
    %cst_31 = arith.constant 0.000000e+00 : f32
    %50 = vector.broadcast %cst_31 : f32 to vector<8x128xf32>
    %51 = arith.cmpf oge, %48, %50 : vector<8x128xf32>
    %52 = vector.broadcast %49 : vector<1x1xf32> to vector<8x128xf32>
    %53 = arith.mulf %52, %48 : vector<8x128xf32>
    %54 = arith.select %51, %48, %53 : vector<8x128xi1>, vector<8x128xf32>
    %55 = arith.addf %54, %30 : vector<8x128xf32>
    %c0_32 = arith.constant 0 : index
    %c0_33 = arith.constant 0 : index
    %56 = vector.load %arg3[%c0_32, %c0_33] : memref<32x15xf32, #tpu.memory_space<vmem>>, vector<32x15xf32>
    %57 = tpu.iota {dimensions = array<i32: 1>} : vector<8x8xi32>
    %58 = tpu.iota {dimensions = array<i32: 0>} : vector<8x8xi32>
    %59 = arith.subi %57, %58 : vector<8x8xi32>
    %c7_i32 = arith.constant 7 : i32
    %60 = vector.broadcast %c7_i32 : i32 to vector<8x8xi32>
    %61 = arith.addi %59, %60 : vector<8x8xi32>
    %cst_34 = arith.constant dense<0.000000e+00> : vector<8xf32>
    %62 = vector.multi_reduction <add>, %55, %cst_34 [1] : vector<8x128xf32> to vector<8xf32>
    %63 = vector.shape_cast %62 : vector<8xf32> to vector<8x1xf32>
    %cst_35 = arith.constant 1.280000e+02 : f32
    %64 = vector.broadcast %cst_35 : f32 to vector<8x1xf32>
    %65 = arith.divf %63, %64 : vector<8x1xf32>
    %66 = vector.broadcast %65 : vector<8x1xf32> to vector<8x128xf32>
    %67 = arith.subf %55, %66 : vector<8x128xf32>
    %68 = vector.broadcast %65 : vector<8x1xf32> to vector<8x128xf32>
    %69 = arith.subf %55, %68 : vector<8x128xf32>
    %70 = arith.mulf %67, %69 : vector<8x128xf32>
    %cst_36 = arith.constant dense<0.000000e+00> : vector<8xf32>
    %71 = vector.multi_reduction <add>, %70, %cst_36 [1] : vector<8x128xf32> to vector<8xf32>
    %72 = vector.shape_cast %71 : vector<8xf32> to vector<8x1xf32>
    %cst_37 = arith.constant 1.280000e+02 : f32
    %73 = vector.broadcast %cst_37 : f32 to vector<8x1xf32>
    %74 = arith.divf %72, %73 : vector<8x1xf32>
    %75 = vector.broadcast %65 : vector<8x1xf32> to vector<8x128xf32>
    %76 = arith.subf %55, %75 : vector<8x128xf32>
    %cst_38 = arith.constant 9.99999974E-6 : f32
    %77 = vector.broadcast %cst_38 : f32 to vector<8x1xf32>
    %78 = arith.addf %74, %77 : vector<8x1xf32>
    %79 = math.rsqrt %78 : vector<8x1xf32>
    %80 = vector.broadcast %79 : vector<8x1xf32> to vector<8x128xf32>
    %81 = arith.mulf %76, %80 : vector<8x128xf32>
    %82 = vector.broadcast %1 : vector<1x128xf32> to vector<8x128xf32>
    %83 = arith.mulf %81, %82 : vector<8x128xf32>
    %84 = vector.broadcast %2 : vector<1x128xf32> to vector<8x128xf32>
    %85 = arith.addf %83, %84 : vector<8x128xf32>
    %c0_39 = arith.constant 0 : index
    %c0_40 = arith.constant 0 : index
    %c0_41 = arith.constant 0 : index
    %86 = vector.load %arg15[%c0_39, %c0_40, %c0_41] : memref<2x128x384xf32, #tpu.memory_space<vmem>>, vector<1x128x384xf32>
    %87 = vector.shape_cast %86 : vector<1x128x384xf32> to vector<128x384xf32>
    %cst_42 = arith.constant dense<0.000000e+00> : vector<8x384xf32>
    %88 = tpu.matmul %85, %87, %cst_42 {dimension_numbers = #tpu.dot_dimension_numbers<[1], [0], [0], [1], [0, 0, 1, 1], [], []>} : vector<8x128xf32>, vector<128x384xf32>, vector<8x384xf32> -> vector<8x384xf32>
    %c0_43 = arith.constant 0 : index
    %c0_44 = arith.constant 0 : index
    %c0_45 = arith.constant 0 : index
    %89 = vector.load %arg16[%c0_43, %c0_44, %c0_45] : memref<2x1x384xf32, #tpu.memory_space<vmem>>, vector<1x1x384xf32>
    %90 = vector.shape_cast %89 : vector<1x1x384xf32> to vector<1x384xf32>
    %91 = vector.broadcast %90 : vector<1x384xf32> to vector<8x384xf32>
    %92 = arith.addf %88, %91 : vector<8x384xf32>
    %c0_46 = arith.constant 0 : index
    %c0_47 = arith.constant 0 : index
    %c0_48 = arith.constant 0 : index
    %93 = vector.load %arg17[%c0_46, %c0_47, %c0_48] : memref<2x128x128xf32, #tpu.memory_space<vmem>>, vector<1x128x128xf32>
    %94 = vector.shape_cast %93 : vector<1x128x128xf32> to vector<128x128xf32>
    %95 = vector.extract_strided_slice %92 {offsets = [0, 0], sizes = [8, 32], strides = [1, 1]} : vector<8x384xf32> to vector<8x32xf32>
    %96 = vector.extract_strided_slice %92 {offsets = [0, 128], sizes = [8, 32], strides = [1, 1]} : vector<8x384xf32> to vector<8x32xf32>
    %97 = vector.extract_strided_slice %92 {offsets = [0, 256], sizes = [8, 32], strides = [1, 1]} : vector<8x384xf32> to vector<8x32xf32>
    %98 = tpu.transpose %96, [1, 0] : vector<8x32xf32> -> vector<32x8xf32>
    %cst_49 = arith.constant dense<0.000000e+00> : vector<8x8xf32>
    %99 = tpu.matmul %95, %98, %cst_49 {dimension_numbers = #tpu.dot_dimension_numbers<[1], [0], [0], [1], [0, 0, 1, 1], [], []>} : vector<8x32xf32>, vector<32x8xf32>, vector<8x8xf32> -> vector<8x8xf32>
    %cst_50 = arith.constant dense<0.000000e+00> : vector<8x15xf32>
    %100 = tpu.matmul %95, %56, %cst_50 {dimension_numbers = #tpu.dot_dimension_numbers<[1], [0], [0], [1], [0, 0, 1, 1], [], []>} : vector<8x32xf32>, vector<32x15xf32>, vector<8x15xf32> -> vector<8x15xf32>
    %c0_i32 = arith.constant 0 : i32
    %101 = vector.broadcast %c0_i32 : i32 to vector<8x8xi32>
    %102 = arith.cmpi eq, %61, %101 : vector<8x8xi32>
    %103 = vector.extract_strided_slice %100 {offsets = [0, 0], sizes = [8, 1], strides = [1, 1]} : vector<8x15xf32> to vector<8x1xf32>
    %cst_51 = arith.constant 0.000000e+00 : f32
    %104 = vector.shape_cast %103 : vector<8x1xf32> to vector<8x1xf32>
    %105 = vector.broadcast %104 : vector<8x1xf32> to vector<8x8xf32>
    %106 = vector.broadcast %cst_51 : f32 to vector<8x8xf32>
    %107 = arith.select %102, %105, %106 : vector<8x8xi1>, vector<8x8xf32>
    %c1_i32 = arith.constant 1 : i32
    %108 = vector.broadcast %c1_i32 : i32 to vector<8x8xi32>
    %109 = arith.cmpi eq, %61, %108 : vector<8x8xi32>
    %110 = vector.extract_strided_slice %100 {offsets = [0, 1], sizes = [8, 1], strides = [1, 1]} : vector<8x15xf32> to vector<8x1xf32>
    %cst_52 = arith.constant 0.000000e+00 : f32
    %111 = vector.shape_cast %110 : vector<8x1xf32> to vector<8x1xf32>
    %112 = vector.broadcast %111 : vector<8x1xf32> to vector<8x8xf32>
    %113 = vector.broadcast %cst_52 : f32 to vector<8x8xf32>
    %114 = arith.select %109, %112, %113 : vector<8x8xi1>, vector<8x8xf32>
    %115 = arith.addf %107, %114 : vector<8x8xf32>
    %c2_i32 = arith.constant 2 : i32
    %116 = vector.broadcast %c2_i32 : i32 to vector<8x8xi32>
    %117 = arith.cmpi eq, %61, %116 : vector<8x8xi32>
    %118 = vector.extract_strided_slice %100 {offsets = [0, 2], sizes = [8, 1], strides = [1, 1]} : vector<8x15xf32> to vector<8x1xf32>
    %cst_53 = arith.constant 0.000000e+00 : f32
    %119 = vector.shape_cast %118 : vector<8x1xf32> to vector<8x1xf32>
    %120 = vector.broadcast %119 : vector<8x1xf32> to vector<8x8xf32>
    %121 = vector.broadcast %cst_53 : f32 to vector<8x8xf32>
    %122 = arith.select %117, %120, %121 : vector<8x8xi1>, vector<8x8xf32>
    %123 = arith.addf %115, %122 : vector<8x8xf32>
    %c3_i32 = arith.constant 3 : i32
    %124 = vector.broadcast %c3_i32 : i32 to vector<8x8xi32>
    %125 = arith.cmpi eq, %61, %124 : vector<8x8xi32>
    %126 = vector.extract_strided_slice %100 {offsets = [0, 3], sizes = [8, 1], strides = [1, 1]} : vector<8x15xf32> to vector<8x1xf32>
    %cst_54 = arith.constant 0.000000e+00 : f32
    %127 = vector.shape_cast %126 : vector<8x1xf32> to vector<8x1xf32>
    %128 = vector.broadcast %127 : vector<8x1xf32> to vector<8x8xf32>
    %129 = vector.broadcast %cst_54 : f32 to vector<8x8xf32>
    %130 = arith.select %125, %128, %129 : vector<8x8xi1>, vector<8x8xf32>
    %131 = arith.addf %123, %130 : vector<8x8xf32>
    %c4_i32 = arith.constant 4 : i32
    %132 = vector.broadcast %c4_i32 : i32 to vector<8x8xi32>
    %133 = arith.cmpi eq, %61, %132 : vector<8x8xi32>
    %134 = vector.extract_strided_slice %100 {offsets = [0, 4], sizes = [8, 1], strides = [1, 1]} : vector<8x15xf32> to vector<8x1xf32>
    %cst_55 = arith.constant 0.000000e+00 : f32
    %135 = vector.shape_cast %134 : vector<8x1xf32> to vector<8x1xf32>
    %136 = vector.broadcast %135 : vector<8x1xf32> to vector<8x8xf32>
    %137 = vector.broadcast %cst_55 : f32 to vector<8x8xf32>
    %138 = arith.select %133, %136, %137 : vector<8x8xi1>, vector<8x8xf32>
    %139 = arith.addf %131, %138 : vector<8x8xf32>
    %c5_i32 = arith.constant 5 : i32
    %140 = vector.broadcast %c5_i32 : i32 to vector<8x8xi32>
    %141 = arith.cmpi eq, %61, %140 : vector<8x8xi32>
    %142 = vector.extract_strided_slice %100 {offsets = [0, 5], sizes = [8, 1], strides = [1, 1]} : vector<8x15xf32> to vector<8x1xf32>
    %cst_56 = arith.constant 0.000000e+00 : f32
    %143 = vector.shape_cast %142 : vector<8x1xf32> to vector<8x1xf32>
    %144 = vector.broadcast %143 : vector<8x1xf32> to vector<8x8xf32>
    %145 = vector.broadcast %cst_56 : f32 to vector<8x8xf32>
    %146 = arith.select %141, %144, %145 : vector<8x8xi1>, vector<8x8xf32>
    %147 = arith.addf %139, %146 : vector<8x8xf32>
    %c6_i32 = arith.constant 6 : i32
    %148 = vector.broadcast %c6_i32 : i32 to vector<8x8xi32>
    %149 = arith.cmpi eq, %61, %148 : vector<8x8xi32>
    %150 = vector.extract_strided_slice %100 {offsets = [0, 6], sizes = [8, 1], strides = [1, 1]} : vector<8x15xf32> to vector<8x1xf32>
    %cst_57 = arith.constant 0.000000e+00 : f32
    %151 = vector.shape_cast %150 : vector<8x1xf32> to vector<8x1xf32>
    %152 = vector.broadcast %151 : vector<8x1xf32> to vector<8x8xf32>
    %153 = vector.broadcast %cst_57 : f32 to vector<8x8xf32>
    %154 = arith.select %149, %152, %153 : vector<8x8xi1>, vector<8x8xf32>
    %155 = arith.addf %147, %154 : vector<8x8xf32>
    %c7_i32_58 = arith.constant 7 : i32
    %156 = vector.broadcast %c7_i32_58 : i32 to vector<8x8xi32>
    %157 = arith.cmpi eq, %61, %156 : vector<8x8xi32>
    %158 = vector.extract_strided_slice %100 {offsets = [0, 7], sizes = [8, 1], strides = [1, 1]} : vector<8x15xf32> to vector<8x1xf32>
    %cst_59 = arith.constant 0.000000e+00 : f32
    %159 = vector.shape_cast %158 : vector<8x1xf32> to vector<8x1xf32>
    %160 = vector.broadcast %159 : vector<8x1xf32> to vector<8x8xf32>
    %161 = vector.broadcast %cst_59 : f32 to vector<8x8xf32>
    %162 = arith.select %157, %160, %161 : vector<8x8xi1>, vector<8x8xf32>
    %163 = arith.addf %155, %162 : vector<8x8xf32>
    %c8_i32 = arith.constant 8 : i32
    %164 = vector.broadcast %c8_i32 : i32 to vector<8x8xi32>
    %165 = arith.cmpi eq, %61, %164 : vector<8x8xi32>
    %166 = vector.extract_strided_slice %100 {offsets = [0, 8], sizes = [8, 1], strides = [1, 1]} : vector<8x15xf32> to vector<8x1xf32>
    %cst_60 = arith.constant 0.000000e+00 : f32
    %167 = vector.shape_cast %166 : vector<8x1xf32> to vector<8x1xf32>
    %168 = vector.broadcast %167 : vector<8x1xf32> to vector<8x8xf32>
    %169 = vector.broadcast %cst_60 : f32 to vector<8x8xf32>
    %170 = arith.select %165, %168, %169 : vector<8x8xi1>, vector<8x8xf32>
    %171 = arith.addf %163, %170 : vector<8x8xf32>
    %c9_i32 = arith.constant 9 : i32
    %172 = vector.broadcast %c9_i32 : i32 to vector<8x8xi32>
    %173 = arith.cmpi eq, %61, %172 : vector<8x8xi32>
    %174 = vector.extract_strided_slice %100 {offsets = [0, 9], sizes = [8, 1], strides = [1, 1]} : vector<8x15xf32> to vector<8x1xf32>
    %cst_61 = arith.constant 0.000000e+00 : f32
    %175 = vector.shape_cast %174 : vector<8x1xf32> to vector<8x1xf32>
    %176 = vector.broadcast %175 : vector<8x1xf32> to vector<8x8xf32>
    %177 = vector.broadcast %cst_61 : f32 to vector<8x8xf32>
    %178 = arith.select %173, %176, %177 : vector<8x8xi1>, vector<8x8xf32>
    %179 = arith.addf %171, %178 : vector<8x8xf32>
    %c10_i32 = arith.constant 10 : i32
    %180 = vector.broadcast %c10_i32 : i32 to vector<8x8xi32>
    %181 = arith.cmpi eq, %61, %180 : vector<8x8xi32>
    %182 = vector.extract_strided_slice %100 {offsets = [0, 10], sizes = [8, 1], strides = [1, 1]} : vector<8x15xf32> to vector<8x1xf32>
    %cst_62 = arith.constant 0.000000e+00 : f32
    %183 = vector.shape_cast %182 : vector<8x1xf32> to vector<8x1xf32>
    %184 = vector.broadcast %183 : vector<8x1xf32> to vector<8x8xf32>
    %185 = vector.broadcast %cst_62 : f32 to vector<8x8xf32>
    %186 = arith.select %181, %184, %185 : vector<8x8xi1>, vector<8x8xf32>
    %187 = arith.addf %179, %186 : vector<8x8xf32>
    %c11_i32 = arith.constant 11 : i32
    %188 = vector.broadcast %c11_i32 : i32 to vector<8x8xi32>
    %189 = arith.cmpi eq, %61, %188 : vector<8x8xi32>
    %190 = vector.extract_strided_slice %100 {offsets = [0, 11], sizes = [8, 1], strides = [1, 1]} : vector<8x15xf32> to vector<8x1xf32>
    %cst_63 = arith.constant 0.000000e+00 : f32
    %191 = vector.shape_cast %190 : vector<8x1xf32> to vector<8x1xf32>
    %192 = vector.broadcast %191 : vector<8x1xf32> to vector<8x8xf32>
    %193 = vector.broadcast %cst_63 : f32 to vector<8x8xf32>
    %194 = arith.select %189, %192, %193 : vector<8x8xi1>, vector<8x8xf32>
    %195 = arith.addf %187, %194 : vector<8x8xf32>
    %c12_i32 = arith.constant 12 : i32
    %196 = vector.broadcast %c12_i32 : i32 to vector<8x8xi32>
    %197 = arith.cmpi eq, %61, %196 : vector<8x8xi32>
    %198 = vector.extract_strided_slice %100 {offsets = [0, 12], sizes = [8, 1], strides = [1, 1]} : vector<8x15xf32> to vector<8x1xf32>
    %cst_64 = arith.constant 0.000000e+00 : f32
    %199 = vector.shape_cast %198 : vector<8x1xf32> to vector<8x1xf32>
    %200 = vector.broadcast %199 : vector<8x1xf32> to vector<8x8xf32>
    %201 = vector.broadcast %cst_64 : f32 to vector<8x8xf32>
    %202 = arith.select %197, %200, %201 : vector<8x8xi1>, vector<8x8xf32>
    %203 = arith.addf %195, %202 : vector<8x8xf32>
    %c13_i32 = arith.constant 13 : i32
    %204 = vector.broadcast %c13_i32 : i32 to vector<8x8xi32>
    %205 = arith.cmpi eq, %61, %204 : vector<8x8xi32>
    %206 = vector.extract_strided_slice %100 {offsets = [0, 13], sizes = [8, 1], strides = [1, 1]} : vector<8x15xf32> to vector<8x1xf32>
    %cst_65 = arith.constant 0.000000e+00 : f32
    %207 = vector.shape_cast %206 : vector<8x1xf32> to vector<8x1xf32>
    %208 = vector.broadcast %207 : vector<8x1xf32> to vector<8x8xf32>
    %209 = vector.broadcast %cst_65 : f32 to vector<8x8xf32>
    %210 = arith.select %205, %208, %209 : vector<8x8xi1>, vector<8x8xf32>
    %211 = arith.addf %203, %210 : vector<8x8xf32>
    %c14_i32 = arith.constant 14 : i32
    %212 = vector.broadcast %c14_i32 : i32 to vector<8x8xi32>
    %213 = arith.cmpi eq, %61, %212 : vector<8x8xi32>
    %214 = vector.extract_strided_slice %100 {offsets = [0, 14], sizes = [8, 1], strides = [1, 1]} : vector<8x15xf32> to vector<8x1xf32>
    %cst_66 = arith.constant 0.000000e+00 : f32
    %215 = vector.shape_cast %214 : vector<8x1xf32> to vector<8x1xf32>
    %216 = vector.broadcast %215 : vector<8x1xf32> to vector<8x8xf32>
    %217 = vector.broadcast %cst_66 : f32 to vector<8x8xf32>
    %218 = arith.select %213, %216, %217 : vector<8x8xi1>, vector<8x8xf32>
    %219 = arith.addf %211, %218 : vector<8x8xf32>
    %220 = arith.addf %99, %219 : vector<8x8xf32>
    %cst_67 = arith.constant 0.176776692 : f32
    %221 = vector.broadcast %cst_67 : f32 to vector<8x8xf32>
    %222 = arith.mulf %220, %221 : vector<8x8xf32>
    %cst_68 = arith.constant dense<0xFF800000> : vector<8xf32>
    %223 = vector.multi_reduction <maximumf>, %222, %cst_68 [1] : vector<8x8xf32> to vector<8xf32>
    %224 = vector.shape_cast %223 : vector<8xf32> to vector<8x1xf32>
    %225 = vector.broadcast %224 : vector<8x1xf32> to vector<8x8xf32>
    %226 = arith.subf %222, %225 : vector<8x8xf32>
    %227 = math.exp %226 : vector<8x8xf32>
    %cst_69 = arith.constant dense<0.000000e+00> : vector<8xf32>
    %228 = vector.multi_reduction <add>, %227, %cst_69 [1] : vector<8x8xf32> to vector<8xf32>
    %229 = vector.shape_cast %228 : vector<8xf32> to vector<8x1xf32>
    %230 = tpu.reciprocal %229 {approx = true} : vector<8x1xf32> -> vector<8x1xf32>
    %231 = vector.broadcast %230 : vector<8x1xf32> to vector<8x8xf32>
    %232 = arith.mulf %227, %231 : vector<8x8xf32>
    %cst_70 = arith.constant dense<0.000000e+00> : vector<8x32xf32>
    %233 = tpu.matmul %232, %97, %cst_70 {dimension_numbers = #tpu.dot_dimension_numbers<[1], [0], [0], [1], [0, 0, 1, 1], [], []>} : vector<8x8xf32>, vector<8x32xf32>, vector<8x32xf32> -> vector<8x32xf32>
    %234 = vector.extract_strided_slice %94 {offsets = [0, 0], sizes = [32, 128], strides = [1, 1]} : vector<128x128xf32> to vector<32x128xf32>
    %cst_71 = arith.constant dense<0.000000e+00> : vector<8x128xf32>
    %235 = tpu.matmul %233, %234, %cst_71 {dimension_numbers = #tpu.dot_dimension_numbers<[1], [0], [0], [1], [0, 0, 1, 1], [], []>} : vector<8x32xf32>, vector<32x128xf32>, vector<8x128xf32> -> vector<8x128xf32>
    %236 = vector.extract_strided_slice %92 {offsets = [0, 32], sizes = [8, 32], strides = [1, 1]} : vector<8x384xf32> to vector<8x32xf32>
    %237 = vector.extract_strided_slice %92 {offsets = [0, 160], sizes = [8, 32], strides = [1, 1]} : vector<8x384xf32> to vector<8x32xf32>
    %238 = vector.extract_strided_slice %92 {offsets = [0, 288], sizes = [8, 32], strides = [1, 1]} : vector<8x384xf32> to vector<8x32xf32>
    %239 = tpu.transpose %237, [1, 0] : vector<8x32xf32> -> vector<32x8xf32>
    %cst_72 = arith.constant dense<0.000000e+00> : vector<8x8xf32>
    %240 = tpu.matmul %236, %239, %cst_72 {dimension_numbers = #tpu.dot_dimension_numbers<[1], [0], [0], [1], [0, 0, 1, 1], [], []>} : vector<8x32xf32>, vector<32x8xf32>, vector<8x8xf32> -> vector<8x8xf32>
    %cst_73 = arith.constant dense<0.000000e+00> : vector<8x15xf32>
    %241 = tpu.matmul %236, %56, %cst_73 {dimension_numbers = #tpu.dot_dimension_numbers<[1], [0], [0], [1], [0, 0, 1, 1], [], []>} : vector<8x32xf32>, vector<32x15xf32>, vector<8x15xf32> -> vector<8x15xf32>
    %c0_i32_74 = arith.constant 0 : i32
    %242 = vector.broadcast %c0_i32_74 : i32 to vector<8x8xi32>
    %243 = arith.cmpi eq, %61, %242 : vector<8x8xi32>
    %244 = vector.extract_strided_slice %241 {offsets = [0, 0], sizes = [8, 1], strides = [1, 1]} : vector<8x15xf32> to vector<8x1xf32>
    %cst_75 = arith.constant 0.000000e+00 : f32
    %245 = vector.shape_cast %244 : vector<8x1xf32> to vector<8x1xf32>
    %246 = vector.broadcast %245 : vector<8x1xf32> to vector<8x8xf32>
    %247 = vector.broadcast %cst_75 : f32 to vector<8x8xf32>
    %248 = arith.select %243, %246, %247 : vector<8x8xi1>, vector<8x8xf32>
    %c1_i32_76 = arith.constant 1 : i32
    %249 = vector.broadcast %c1_i32_76 : i32 to vector<8x8xi32>
    %250 = arith.cmpi eq, %61, %249 : vector<8x8xi32>
    %251 = vector.extract_strided_slice %241 {offsets = [0, 1], sizes = [8, 1], strides = [1, 1]} : vector<8x15xf32> to vector<8x1xf32>
    %cst_77 = arith.constant 0.000000e+00 : f32
    %252 = vector.shape_cast %251 : vector<8x1xf32> to vector<8x1xf32>
    %253 = vector.broadcast %252 : vector<8x1xf32> to vector<8x8xf32>
    %254 = vector.broadcast %cst_77 : f32 to vector<8x8xf32>
    %255 = arith.select %250, %253, %254 : vector<8x8xi1>, vector<8x8xf32>
    %256 = arith.addf %248, %255 : vector<8x8xf32>
    %c2_i32_78 = arith.constant 2 : i32
    %257 = vector.broadcast %c2_i32_78 : i32 to vector<8x8xi32>
    %258 = arith.cmpi eq, %61, %257 : vector<8x8xi32>
    %259 = vector.extract_strided_slice %241 {offsets = [0, 2], sizes = [8, 1], strides = [1, 1]} : vector<8x15xf32> to vector<8x1xf32>
    %cst_79 = arith.constant 0.000000e+00 : f32
    %260 = vector.shape_cast %259 : vector<8x1xf32> to vector<8x1xf32>
    %261 = vector.broadcast %260 : vector<8x1xf32> to vector<8x8xf32>
    %262 = vector.broadcast %cst_79 : f32 to vector<8x8xf32>
    %263 = arith.select %258, %261, %262 : vector<8x8xi1>, vector<8x8xf32>
    %264 = arith.addf %256, %263 : vector<8x8xf32>
    %c3_i32_80 = arith.constant 3 : i32
    %265 = vector.broadcast %c3_i32_80 : i32 to vector<8x8xi32>
    %266 = arith.cmpi eq, %61, %265 : vector<8x8xi32>
    %267 = vector.extract_strided_slice %241 {offsets = [0, 3], sizes = [8, 1], strides = [1, 1]} : vector<8x15xf32> to vector<8x1xf32>
    %cst_81 = arith.constant 0.000000e+00 : f32
    %268 = vector.shape_cast %267 : vector<8x1xf32> to vector<8x1xf32>
    %269 = vector.broadcast %268 : vector<8x1xf32> to vector<8x8xf32>
    %270 = vector.broadcast %cst_81 : f32 to vector<8x8xf32>
    %271 = arith.select %266, %269, %270 : vector<8x8xi1>, vector<8x8xf32>
    %272 = arith.addf %264, %271 : vector<8x8xf32>
    %c4_i32_82 = arith.constant 4 : i32
    %273 = vector.broadcast %c4_i32_82 : i32 to vector<8x8xi32>
    %274 = arith.cmpi eq, %61, %273 : vector<8x8xi32>
    %275 = vector.extract_strided_slice %241 {offsets = [0, 4], sizes = [8, 1], strides = [1, 1]} : vector<8x15xf32> to vector<8x1xf32>
    %cst_83 = arith.constant 0.000000e+00 : f32
    %276 = vector.shape_cast %275 : vector<8x1xf32> to vector<8x1xf32>
    %277 = vector.broadcast %276 : vector<8x1xf32> to vector<8x8xf32>
    %278 = vector.broadcast %cst_83 : f32 to vector<8x8xf32>
    %279 = arith.select %274, %277, %278 : vector<8x8xi1>, vector<8x8xf32>
    %280 = arith.addf %272, %279 : vector<8x8xf32>
    %c5_i32_84 = arith.constant 5 : i32
    %281 = vector.broadcast %c5_i32_84 : i32 to vector<8x8xi32>
    %282 = arith.cmpi eq, %61, %281 : vector<8x8xi32>
    %283 = vector.extract_strided_slice %241 {offsets = [0, 5], sizes = [8, 1], strides = [1, 1]} : vector<8x15xf32> to vector<8x1xf32>
    %cst_85 = arith.constant 0.000000e+00 : f32
    %284 = vector.shape_cast %283 : vector<8x1xf32> to vector<8x1xf32>
    %285 = vector.broadcast %284 : vector<8x1xf32> to vector<8x8xf32>
    %286 = vector.broadcast %cst_85 : f32 to vector<8x8xf32>
    %287 = arith.select %282, %285, %286 : vector<8x8xi1>, vector<8x8xf32>
    %288 = arith.addf %280, %287 : vector<8x8xf32>
    %c6_i32_86 = arith.constant 6 : i32
    %289 = vector.broadcast %c6_i32_86 : i32 to vector<8x8xi32>
    %290 = arith.cmpi eq, %61, %289 : vector<8x8xi32>
    %291 = vector.extract_strided_slice %241 {offsets = [0, 6], sizes = [8, 1], strides = [1, 1]} : vector<8x15xf32> to vector<8x1xf32>
    %cst_87 = arith.constant 0.000000e+00 : f32
    %292 = vector.shape_cast %291 : vector<8x1xf32> to vector<8x1xf32>
    %293 = vector.broadcast %292 : vector<8x1xf32> to vector<8x8xf32>
    %294 = vector.broadcast %cst_87 : f32 to vector<8x8xf32>
    %295 = arith.select %290, %293, %294 : vector<8x8xi1>, vector<8x8xf32>
    %296 = arith.addf %288, %295 : vector<8x8xf32>
    %c7_i32_88 = arith.constant 7 : i32
    %297 = vector.broadcast %c7_i32_88 : i32 to vector<8x8xi32>
    %298 = arith.cmpi eq, %61, %297 : vector<8x8xi32>
    %299 = vector.extract_strided_slice %241 {offsets = [0, 7], sizes = [8, 1], strides = [1, 1]} : vector<8x15xf32> to vector<8x1xf32>
    %cst_89 = arith.constant 0.000000e+00 : f32
    %300 = vector.shape_cast %299 : vector<8x1xf32> to vector<8x1xf32>
    %301 = vector.broadcast %300 : vector<8x1xf32> to vector<8x8xf32>
    %302 = vector.broadcast %cst_89 : f32 to vector<8x8xf32>
    %303 = arith.select %298, %301, %302 : vector<8x8xi1>, vector<8x8xf32>
    %304 = arith.addf %296, %303 : vector<8x8xf32>
    %c8_i32_90 = arith.constant 8 : i32
    %305 = vector.broadcast %c8_i32_90 : i32 to vector<8x8xi32>
    %306 = arith.cmpi eq, %61, %305 : vector<8x8xi32>
    %307 = vector.extract_strided_slice %241 {offsets = [0, 8], sizes = [8, 1], strides = [1, 1]} : vector<8x15xf32> to vector<8x1xf32>
    %cst_91 = arith.constant 0.000000e+00 : f32
    %308 = vector.shape_cast %307 : vector<8x1xf32> to vector<8x1xf32>
    %309 = vector.broadcast %308 : vector<8x1xf32> to vector<8x8xf32>
    %310 = vector.broadcast %cst_91 : f32 to vector<8x8xf32>
    %311 = arith.select %306, %309, %310 : vector<8x8xi1>, vector<8x8xf32>
    %312 = arith.addf %304, %311 : vector<8x8xf32>
    %c9_i32_92 = arith.constant 9 : i32
    %313 = vector.broadcast %c9_i32_92 : i32 to vector<8x8xi32>
    %314 = arith.cmpi eq, %61, %313 : vector<8x8xi32>
    %315 = vector.extract_strided_slice %241 {offsets = [0, 9], sizes = [8, 1], strides = [1, 1]} : vector<8x15xf32> to vector<8x1xf32>
    %cst_93 = arith.constant 0.000000e+00 : f32
    %316 = vector.shape_cast %315 : vector<8x1xf32> to vector<8x1xf32>
    %317 = vector.broadcast %316 : vector<8x1xf32> to vector<8x8xf32>
    %318 = vector.broadcast %cst_93 : f32 to vector<8x8xf32>
    %319 = arith.select %314, %317, %318 : vector<8x8xi1>, vector<8x8xf32>
    %320 = arith.addf %312, %319 : vector<8x8xf32>
    %c10_i32_94 = arith.constant 10 : i32
    %321 = vector.broadcast %c10_i32_94 : i32 to vector<8x8xi32>
    %322 = arith.cmpi eq, %61, %321 : vector<8x8xi32>
    %323 = vector.extract_strided_slice %241 {offsets = [0, 10], sizes = [8, 1], strides = [1, 1]} : vector<8x15xf32> to vector<8x1xf32>
    %cst_95 = arith.constant 0.000000e+00 : f32
    %324 = vector.shape_cast %323 : vector<8x1xf32> to vector<8x1xf32>
    %325 = vector.broadcast %324 : vector<8x1xf32> to vector<8x8xf32>
    %326 = vector.broadcast %cst_95 : f32 to vector<8x8xf32>
    %327 = arith.select %322, %325, %326 : vector<8x8xi1>, vector<8x8xf32>
    %328 = arith.addf %320, %327 : vector<8x8xf32>
    %c11_i32_96 = arith.constant 11 : i32
    %329 = vector.broadcast %c11_i32_96 : i32 to vector<8x8xi32>
    %330 = arith.cmpi eq, %61, %329 : vector<8x8xi32>
    %331 = vector.extract_strided_slice %241 {offsets = [0, 11], sizes = [8, 1], strides = [1, 1]} : vector<8x15xf32> to vector<8x1xf32>
    %cst_97 = arith.constant 0.000000e+00 : f32
    %332 = vector.shape_cast %331 : vector<8x1xf32> to vector<8x1xf32>
    %333 = vector.broadcast %332 : vector<8x1xf32> to vector<8x8xf32>
    %334 = vector.broadcast %cst_97 : f32 to vector<8x8xf32>
    %335 = arith.select %330, %333, %334 : vector<8x8xi1>, vector<8x8xf32>
    %336 = arith.addf %328, %335 : vector<8x8xf32>
    %c12_i32_98 = arith.constant 12 : i32
    %337 = vector.broadcast %c12_i32_98 : i32 to vector<8x8xi32>
    %338 = arith.cmpi eq, %61, %337 : vector<8x8xi32>
    %339 = vector.extract_strided_slice %241 {offsets = [0, 12], sizes = [8, 1], strides = [1, 1]} : vector<8x15xf32> to vector<8x1xf32>
    %cst_99 = arith.constant 0.000000e+00 : f32
    %340 = vector.shape_cast %339 : vector<8x1xf32> to vector<8x1xf32>
    %341 = vector.broadcast %340 : vector<8x1xf32> to vector<8x8xf32>
    %342 = vector.broadcast %cst_99 : f32 to vector<8x8xf32>
    %343 = arith.select %338, %341, %342 : vector<8x8xi1>, vector<8x8xf32>
    %344 = arith.addf %336, %343 : vector<8x8xf32>
    %c13_i32_100 = arith.constant 13 : i32
    %345 = vector.broadcast %c13_i32_100 : i32 to vector<8x8xi32>
    %346 = arith.cmpi eq, %61, %345 : vector<8x8xi32>
    %347 = vector.extract_strided_slice %241 {offsets = [0, 13], sizes = [8, 1], strides = [1, 1]} : vector<8x15xf32> to vector<8x1xf32>
    %cst_101 = arith.constant 0.000000e+00 : f32
    %348 = vector.shape_cast %347 : vector<8x1xf32> to vector<8x1xf32>
    %349 = vector.broadcast %348 : vector<8x1xf32> to vector<8x8xf32>
    %350 = vector.broadcast %cst_101 : f32 to vector<8x8xf32>
    %351 = arith.select %346, %349, %350 : vector<8x8xi1>, vector<8x8xf32>
    %352 = arith.addf %344, %351 : vector<8x8xf32>
    %c14_i32_102 = arith.constant 14 : i32
    %353 = vector.broadcast %c14_i32_102 : i32 to vector<8x8xi32>
    %354 = arith.cmpi eq, %61, %353 : vector<8x8xi32>
    %355 = vector.extract_strided_slice %241 {offsets = [0, 14], sizes = [8, 1], strides = [1, 1]} : vector<8x15xf32> to vector<8x1xf32>
    %cst_103 = arith.constant 0.000000e+00 : f32
    %356 = vector.shape_cast %355 : vector<8x1xf32> to vector<8x1xf32>
    %357 = vector.broadcast %356 : vector<8x1xf32> to vector<8x8xf32>
    %358 = vector.broadcast %cst_103 : f32 to vector<8x8xf32>
    %359 = arith.select %354, %357, %358 : vector<8x8xi1>, vector<8x8xf32>
    %360 = arith.addf %352, %359 : vector<8x8xf32>
    %361 = arith.addf %240, %360 : vector<8x8xf32>
    %cst_104 = arith.constant 0.176776692 : f32
    %362 = vector.broadcast %cst_104 : f32 to vector<8x8xf32>
    %363 = arith.mulf %361, %362 : vector<8x8xf32>
    %cst_105 = arith.constant dense<0xFF800000> : vector<8xf32>
    %364 = vector.multi_reduction <maximumf>, %363, %cst_105 [1] : vector<8x8xf32> to vector<8xf32>
    %365 = vector.shape_cast %364 : vector<8xf32> to vector<8x1xf32>
    %366 = vector.broadcast %365 : vector<8x1xf32> to vector<8x8xf32>
    %367 = arith.subf %363, %366 : vector<8x8xf32>
    %368 = math.exp %367 : vector<8x8xf32>
    %cst_106 = arith.constant dense<0.000000e+00> : vector<8xf32>
    %369 = vector.multi_reduction <add>, %368, %cst_106 [1] : vector<8x8xf32> to vector<8xf32>
    %370 = vector.shape_cast %369 : vector<8xf32> to vector<8x1xf32>
    %371 = tpu.reciprocal %370 {approx = true} : vector<8x1xf32> -> vector<8x1xf32>
    %372 = vector.broadcast %371 : vector<8x1xf32> to vector<8x8xf32>
    %373 = arith.mulf %368, %372 : vector<8x8xf32>
    %cst_107 = arith.constant dense<0.000000e+00> : vector<8x32xf32>
    %374 = tpu.matmul %373, %238, %cst_107 {dimension_numbers = #tpu.dot_dimension_numbers<[1], [0], [0], [1], [0, 0, 1, 1], [], []>} : vector<8x8xf32>, vector<8x32xf32>, vector<8x32xf32> -> vector<8x32xf32>
    %375 = vector.extract_strided_slice %94 {offsets = [32, 0], sizes = [32, 128], strides = [1, 1]} : vector<128x128xf32> to vector<32x128xf32>
    %cst_108 = arith.constant dense<0.000000e+00> : vector<8x128xf32>
    %376 = tpu.matmul %374, %375, %cst_108 {dimension_numbers = #tpu.dot_dimension_numbers<[1], [0], [0], [1], [0, 0, 1, 1], [], []>} : vector<8x32xf32>, vector<32x128xf32>, vector<8x128xf32> -> vector<8x128xf32>
    %377 = arith.addf %235, %376 : vector<8x128xf32>
    %378 = vector.extract_strided_slice %92 {offsets = [0, 64], sizes = [8, 32], strides = [1, 1]} : vector<8x384xf32> to vector<8x32xf32>
    %379 = vector.extract_strided_slice %92 {offsets = [0, 192], sizes = [8, 32], strides = [1, 1]} : vector<8x384xf32> to vector<8x32xf32>
    %380 = vector.extract_strided_slice %92 {offsets = [0, 320], sizes = [8, 32], strides = [1, 1]} : vector<8x384xf32> to vector<8x32xf32>
    %381 = tpu.transpose %379, [1, 0] : vector<8x32xf32> -> vector<32x8xf32>
    %cst_109 = arith.constant dense<0.000000e+00> : vector<8x8xf32>
    %382 = tpu.matmul %378, %381, %cst_109 {dimension_numbers = #tpu.dot_dimension_numbers<[1], [0], [0], [1], [0, 0, 1, 1], [], []>} : vector<8x32xf32>, vector<32x8xf32>, vector<8x8xf32> -> vector<8x8xf32>
    %cst_110 = arith.constant dense<0.000000e+00> : vector<8x15xf32>
    %383 = tpu.matmul %378, %56, %cst_110 {dimension_numbers = #tpu.dot_dimension_numbers<[1], [0], [0], [1], [0, 0, 1, 1], [], []>} : vector<8x32xf32>, vector<32x15xf32>, vector<8x15xf32> -> vector<8x15xf32>
    %c0_i32_111 = arith.constant 0 : i32
    %384 = vector.broadcast %c0_i32_111 : i32 to vector<8x8xi32>
    %385 = arith.cmpi eq, %61, %384 : vector<8x8xi32>
    %386 = vector.extract_strided_slice %383 {offsets = [0, 0], sizes = [8, 1], strides = [1, 1]} : vector<8x15xf32> to vector<8x1xf32>
    %cst_112 = arith.constant 0.000000e+00 : f32
    %387 = vector.shape_cast %386 : vector<8x1xf32> to vector<8x1xf32>
    %388 = vector.broadcast %387 : vector<8x1xf32> to vector<8x8xf32>
    %389 = vector.broadcast %cst_112 : f32 to vector<8x8xf32>
    %390 = arith.select %385, %388, %389 : vector<8x8xi1>, vector<8x8xf32>
    %c1_i32_113 = arith.constant 1 : i32
    %391 = vector.broadcast %c1_i32_113 : i32 to vector<8x8xi32>
    %392 = arith.cmpi eq, %61, %391 : vector<8x8xi32>
    %393 = vector.extract_strided_slice %383 {offsets = [0, 1], sizes = [8, 1], strides = [1, 1]} : vector<8x15xf32> to vector<8x1xf32>
    %cst_114 = arith.constant 0.000000e+00 : f32
    %394 = vector.shape_cast %393 : vector<8x1xf32> to vector<8x1xf32>
    %395 = vector.broadcast %394 : vector<8x1xf32> to vector<8x8xf32>
    %396 = vector.broadcast %cst_114 : f32 to vector<8x8xf32>
    %397 = arith.select %392, %395, %396 : vector<8x8xi1>, vector<8x8xf32>
    %398 = arith.addf %390, %397 : vector<8x8xf32>
    %c2_i32_115 = arith.constant 2 : i32
    %399 = vector.broadcast %c2_i32_115 : i32 to vector<8x8xi32>
    %400 = arith.cmpi eq, %61, %399 : vector<8x8xi32>
    %401 = vector.extract_strided_slice %383 {offsets = [0, 2], sizes = [8, 1], strides = [1, 1]} : vector<8x15xf32> to vector<8x1xf32>
    %cst_116 = arith.constant 0.000000e+00 : f32
    %402 = vector.shape_cast %401 : vector<8x1xf32> to vector<8x1xf32>
    %403 = vector.broadcast %402 : vector<8x1xf32> to vector<8x8xf32>
    %404 = vector.broadcast %cst_116 : f32 to vector<8x8xf32>
    %405 = arith.select %400, %403, %404 : vector<8x8xi1>, vector<8x8xf32>
    %406 = arith.addf %398, %405 : vector<8x8xf32>
    %c3_i32_117 = arith.constant 3 : i32
    %407 = vector.broadcast %c3_i32_117 : i32 to vector<8x8xi32>
    %408 = arith.cmpi eq, %61, %407 : vector<8x8xi32>
    %409 = vector.extract_strided_slice %383 {offsets = [0, 3], sizes = [8, 1], strides = [1, 1]} : vector<8x15xf32> to vector<8x1xf32>
    %cst_118 = arith.constant 0.000000e+00 : f32
    %410 = vector.shape_cast %409 : vector<8x1xf32> to vector<8x1xf32>
    %411 = vector.broadcast %410 : vector<8x1xf32> to vector<8x8xf32>
    %412 = vector.broadcast %cst_118 : f32 to vector<8x8xf32>
    %413 = arith.select %408, %411, %412 : vector<8x8xi1>, vector<8x8xf32>
    %414 = arith.addf %406, %413 : vector<8x8xf32>
    %c4_i32_119 = arith.constant 4 : i32
    %415 = vector.broadcast %c4_i32_119 : i32 to vector<8x8xi32>
    %416 = arith.cmpi eq, %61, %415 : vector<8x8xi32>
    %417 = vector.extract_strided_slice %383 {offsets = [0, 4], sizes = [8, 1], strides = [1, 1]} : vector<8x15xf32> to vector<8x1xf32>
    %cst_120 = arith.constant 0.000000e+00 : f32
    %418 = vector.shape_cast %417 : vector<8x1xf32> to vector<8x1xf32>
    %419 = vector.broadcast %418 : vector<8x1xf32> to vector<8x8xf32>
    %420 = vector.broadcast %cst_120 : f32 to vector<8x8xf32>
    %421 = arith.select %416, %419, %420 : vector<8x8xi1>, vector<8x8xf32>
    %422 = arith.addf %414, %421 : vector<8x8xf32>
    %c5_i32_121 = arith.constant 5 : i32
    %423 = vector.broadcast %c5_i32_121 : i32 to vector<8x8xi32>
    %424 = arith.cmpi eq, %61, %423 : vector<8x8xi32>
    %425 = vector.extract_strided_slice %383 {offsets = [0, 5], sizes = [8, 1], strides = [1, 1]} : vector<8x15xf32> to vector<8x1xf32>
    %cst_122 = arith.constant 0.000000e+00 : f32
    %426 = vector.shape_cast %425 : vector<8x1xf32> to vector<8x1xf32>
    %427 = vector.broadcast %426 : vector<8x1xf32> to vector<8x8xf32>
    %428 = vector.broadcast %cst_122 : f32 to vector<8x8xf32>
    %429 = arith.select %424, %427, %428 : vector<8x8xi1>, vector<8x8xf32>
    %430 = arith.addf %422, %429 : vector<8x8xf32>
    %c6_i32_123 = arith.constant 6 : i32
    %431 = vector.broadcast %c6_i32_123 : i32 to vector<8x8xi32>
    %432 = arith.cmpi eq, %61, %431 : vector<8x8xi32>
    %433 = vector.extract_strided_slice %383 {offsets = [0, 6], sizes = [8, 1], strides = [1, 1]} : vector<8x15xf32> to vector<8x1xf32>
    %cst_124 = arith.constant 0.000000e+00 : f32
    %434 = vector.shape_cast %433 : vector<8x1xf32> to vector<8x1xf32>
    %435 = vector.broadcast %434 : vector<8x1xf32> to vector<8x8xf32>
    %436 = vector.broadcast %cst_124 : f32 to vector<8x8xf32>
    %437 = arith.select %432, %435, %436 : vector<8x8xi1>, vector<8x8xf32>
    %438 = arith.addf %430, %437 : vector<8x8xf32>
    %c7_i32_125 = arith.constant 7 : i32
    %439 = vector.broadcast %c7_i32_125 : i32 to vector<8x8xi32>
    %440 = arith.cmpi eq, %61, %439 : vector<8x8xi32>
    %441 = vector.extract_strided_slice %383 {offsets = [0, 7], sizes = [8, 1], strides = [1, 1]} : vector<8x15xf32> to vector<8x1xf32>
    %cst_126 = arith.constant 0.000000e+00 : f32
    %442 = vector.shape_cast %441 : vector<8x1xf32> to vector<8x1xf32>
    %443 = vector.broadcast %442 : vector<8x1xf32> to vector<8x8xf32>
    %444 = vector.broadcast %cst_126 : f32 to vector<8x8xf32>
    %445 = arith.select %440, %443, %444 : vector<8x8xi1>, vector<8x8xf32>
    %446 = arith.addf %438, %445 : vector<8x8xf32>
    %c8_i32_127 = arith.constant 8 : i32
    %447 = vector.broadcast %c8_i32_127 : i32 to vector<8x8xi32>
    %448 = arith.cmpi eq, %61, %447 : vector<8x8xi32>
    %449 = vector.extract_strided_slice %383 {offsets = [0, 8], sizes = [8, 1], strides = [1, 1]} : vector<8x15xf32> to vector<8x1xf32>
    %cst_128 = arith.constant 0.000000e+00 : f32
    %450 = vector.shape_cast %449 : vector<8x1xf32> to vector<8x1xf32>
    %451 = vector.broadcast %450 : vector<8x1xf32> to vector<8x8xf32>
    %452 = vector.broadcast %cst_128 : f32 to vector<8x8xf32>
    %453 = arith.select %448, %451, %452 : vector<8x8xi1>, vector<8x8xf32>
    %454 = arith.addf %446, %453 : vector<8x8xf32>
    %c9_i32_129 = arith.constant 9 : i32
    %455 = vector.broadcast %c9_i32_129 : i32 to vector<8x8xi32>
    %456 = arith.cmpi eq, %61, %455 : vector<8x8xi32>
    %457 = vector.extract_strided_slice %383 {offsets = [0, 9], sizes = [8, 1], strides = [1, 1]} : vector<8x15xf32> to vector<8x1xf32>
    %cst_130 = arith.constant 0.000000e+00 : f32
    %458 = vector.shape_cast %457 : vector<8x1xf32> to vector<8x1xf32>
    %459 = vector.broadcast %458 : vector<8x1xf32> to vector<8x8xf32>
    %460 = vector.broadcast %cst_130 : f32 to vector<8x8xf32>
    %461 = arith.select %456, %459, %460 : vector<8x8xi1>, vector<8x8xf32>
    %462 = arith.addf %454, %461 : vector<8x8xf32>
    %c10_i32_131 = arith.constant 10 : i32
    %463 = vector.broadcast %c10_i32_131 : i32 to vector<8x8xi32>
    %464 = arith.cmpi eq, %61, %463 : vector<8x8xi32>
    %465 = vector.extract_strided_slice %383 {offsets = [0, 10], sizes = [8, 1], strides = [1, 1]} : vector<8x15xf32> to vector<8x1xf32>
    %cst_132 = arith.constant 0.000000e+00 : f32
    %466 = vector.shape_cast %465 : vector<8x1xf32> to vector<8x1xf32>
    %467 = vector.broadcast %466 : vector<8x1xf32> to vector<8x8xf32>
    %468 = vector.broadcast %cst_132 : f32 to vector<8x8xf32>
    %469 = arith.select %464, %467, %468 : vector<8x8xi1>, vector<8x8xf32>
    %470 = arith.addf %462, %469 : vector<8x8xf32>
    %c11_i32_133 = arith.constant 11 : i32
    %471 = vector.broadcast %c11_i32_133 : i32 to vector<8x8xi32>
    %472 = arith.cmpi eq, %61, %471 : vector<8x8xi32>
    %473 = vector.extract_strided_slice %383 {offsets = [0, 11], sizes = [8, 1], strides = [1, 1]} : vector<8x15xf32> to vector<8x1xf32>
    %cst_134 = arith.constant 0.000000e+00 : f32
    %474 = vector.shape_cast %473 : vector<8x1xf32> to vector<8x1xf32>
    %475 = vector.broadcast %474 : vector<8x1xf32> to vector<8x8xf32>
    %476 = vector.broadcast %cst_134 : f32 to vector<8x8xf32>
    %477 = arith.select %472, %475, %476 : vector<8x8xi1>, vector<8x8xf32>
    %478 = arith.addf %470, %477 : vector<8x8xf32>
    %c12_i32_135 = arith.constant 12 : i32
    %479 = vector.broadcast %c12_i32_135 : i32 to vector<8x8xi32>
    %480 = arith.cmpi eq, %61, %479 : vector<8x8xi32>
    %481 = vector.extract_strided_slice %383 {offsets = [0, 12], sizes = [8, 1], strides = [1, 1]} : vector<8x15xf32> to vector<8x1xf32>
    %cst_136 = arith.constant 0.000000e+00 : f32
    %482 = vector.shape_cast %481 : vector<8x1xf32> to vector<8x1xf32>
    %483 = vector.broadcast %482 : vector<8x1xf32> to vector<8x8xf32>
    %484 = vector.broadcast %cst_136 : f32 to vector<8x8xf32>
    %485 = arith.select %480, %483, %484 : vector<8x8xi1>, vector<8x8xf32>
    %486 = arith.addf %478, %485 : vector<8x8xf32>
    %c13_i32_137 = arith.constant 13 : i32
    %487 = vector.broadcast %c13_i32_137 : i32 to vector<8x8xi32>
    %488 = arith.cmpi eq, %61, %487 : vector<8x8xi32>
    %489 = vector.extract_strided_slice %383 {offsets = [0, 13], sizes = [8, 1], strides = [1, 1]} : vector<8x15xf32> to vector<8x1xf32>
    %cst_138 = arith.constant 0.000000e+00 : f32
    %490 = vector.shape_cast %489 : vector<8x1xf32> to vector<8x1xf32>
    %491 = vector.broadcast %490 : vector<8x1xf32> to vector<8x8xf32>
    %492 = vector.broadcast %cst_138 : f32 to vector<8x8xf32>
    %493 = arith.select %488, %491, %492 : vector<8x8xi1>, vector<8x8xf32>
    %494 = arith.addf %486, %493 : vector<8x8xf32>
    %c14_i32_139 = arith.constant 14 : i32
    %495 = vector.broadcast %c14_i32_139 : i32 to vector<8x8xi32>
    %496 = arith.cmpi eq, %61, %495 : vector<8x8xi32>
    %497 = vector.extract_strided_slice %383 {offsets = [0, 14], sizes = [8, 1], strides = [1, 1]} : vector<8x15xf32> to vector<8x1xf32>
    %cst_140 = arith.constant 0.000000e+00 : f32
    %498 = vector.shape_cast %497 : vector<8x1xf32> to vector<8x1xf32>
    %499 = vector.broadcast %498 : vector<8x1xf32> to vector<8x8xf32>
    %500 = vector.broadcast %cst_140 : f32 to vector<8x8xf32>
    %501 = arith.select %496, %499, %500 : vector<8x8xi1>, vector<8x8xf32>
    %502 = arith.addf %494, %501 : vector<8x8xf32>
    %503 = arith.addf %382, %502 : vector<8x8xf32>
    %cst_141 = arith.constant 0.176776692 : f32
    %504 = vector.broadcast %cst_141 : f32 to vector<8x8xf32>
    %505 = arith.mulf %503, %504 : vector<8x8xf32>
    %cst_142 = arith.constant dense<0xFF800000> : vector<8xf32>
    %506 = vector.multi_reduction <maximumf>, %505, %cst_142 [1] : vector<8x8xf32> to vector<8xf32>
    %507 = vector.shape_cast %506 : vector<8xf32> to vector<8x1xf32>
    %508 = vector.broadcast %507 : vector<8x1xf32> to vector<8x8xf32>
    %509 = arith.subf %505, %508 : vector<8x8xf32>
    %510 = math.exp %509 : vector<8x8xf32>
    %cst_143 = arith.constant dense<0.000000e+00> : vector<8xf32>
    %511 = vector.multi_reduction <add>, %510, %cst_143 [1] : vector<8x8xf32> to vector<8xf32>
    %512 = vector.shape_cast %511 : vector<8xf32> to vector<8x1xf32>
    %513 = tpu.reciprocal %512 {approx = true} : vector<8x1xf32> -> vector<8x1xf32>
    %514 = vector.broadcast %513 : vector<8x1xf32> to vector<8x8xf32>
    %515 = arith.mulf %510, %514 : vector<8x8xf32>
    %cst_144 = arith.constant dense<0.000000e+00> : vector<8x32xf32>
    %516 = tpu.matmul %515, %380, %cst_144 {dimension_numbers = #tpu.dot_dimension_numbers<[1], [0], [0], [1], [0, 0, 1, 1], [], []>} : vector<8x8xf32>, vector<8x32xf32>, vector<8x32xf32> -> vector<8x32xf32>
    %517 = vector.extract_strided_slice %94 {offsets = [64, 0], sizes = [32, 128], strides = [1, 1]} : vector<128x128xf32> to vector<32x128xf32>
    %cst_145 = arith.constant dense<0.000000e+00> : vector<8x128xf32>
    %518 = tpu.matmul %516, %517, %cst_145 {dimension_numbers = #tpu.dot_dimension_numbers<[1], [0], [0], [1], [0, 0, 1, 1], [], []>} : vector<8x32xf32>, vector<32x128xf32>, vector<8x128xf32> -> vector<8x128xf32>
    %519 = arith.addf %377, %518 : vector<8x128xf32>
    %520 = vector.extract_strided_slice %92 {offsets = [0, 96], sizes = [8, 32], strides = [1, 1]} : vector<8x384xf32> to vector<8x32xf32>
    %521 = vector.extract_strided_slice %92 {offsets = [0, 224], sizes = [8, 32], strides = [1, 1]} : vector<8x384xf32> to vector<8x32xf32>
    %522 = vector.extract_strided_slice %92 {offsets = [0, 352], sizes = [8, 32], strides = [1, 1]} : vector<8x384xf32> to vector<8x32xf32>
    %523 = tpu.transpose %521, [1, 0] : vector<8x32xf32> -> vector<32x8xf32>
    %cst_146 = arith.constant dense<0.000000e+00> : vector<8x8xf32>
    %524 = tpu.matmul %520, %523, %cst_146 {dimension_numbers = #tpu.dot_dimension_numbers<[1], [0], [0], [1], [0, 0, 1, 1], [], []>} : vector<8x32xf32>, vector<32x8xf32>, vector<8x8xf32> -> vector<8x8xf32>
    %cst_147 = arith.constant dense<0.000000e+00> : vector<8x15xf32>
    %525 = tpu.matmul %520, %56, %cst_147 {dimension_numbers = #tpu.dot_dimension_numbers<[1], [0], [0], [1], [0, 0, 1, 1], [], []>} : vector<8x32xf32>, vector<32x15xf32>, vector<8x15xf32> -> vector<8x15xf32>
    %c0_i32_148 = arith.constant 0 : i32
    %526 = vector.broadcast %c0_i32_148 : i32 to vector<8x8xi32>
    %527 = arith.cmpi eq, %61, %526 : vector<8x8xi32>
    %528 = vector.extract_strided_slice %525 {offsets = [0, 0], sizes = [8, 1], strides = [1, 1]} : vector<8x15xf32> to vector<8x1xf32>
    %cst_149 = arith.constant 0.000000e+00 : f32
    %529 = vector.shape_cast %528 : vector<8x1xf32> to vector<8x1xf32>
    %530 = vector.broadcast %529 : vector<8x1xf32> to vector<8x8xf32>
    %531 = vector.broadcast %cst_149 : f32 to vector<8x8xf32>
    %532 = arith.select %527, %530, %531 : vector<8x8xi1>, vector<8x8xf32>
    %c1_i32_150 = arith.constant 1 : i32
    %533 = vector.broadcast %c1_i32_150 : i32 to vector<8x8xi32>
    %534 = arith.cmpi eq, %61, %533 : vector<8x8xi32>
    %535 = vector.extract_strided_slice %525 {offsets = [0, 1], sizes = [8, 1], strides = [1, 1]} : vector<8x15xf32> to vector<8x1xf32>
    %cst_151 = arith.constant 0.000000e+00 : f32
    %536 = vector.shape_cast %535 : vector<8x1xf32> to vector<8x1xf32>
    %537 = vector.broadcast %536 : vector<8x1xf32> to vector<8x8xf32>
    %538 = vector.broadcast %cst_151 : f32 to vector<8x8xf32>
    %539 = arith.select %534, %537, %538 : vector<8x8xi1>, vector<8x8xf32>
    %540 = arith.addf %532, %539 : vector<8x8xf32>
    %c2_i32_152 = arith.constant 2 : i32
    %541 = vector.broadcast %c2_i32_152 : i32 to vector<8x8xi32>
    %542 = arith.cmpi eq, %61, %541 : vector<8x8xi32>
    %543 = vector.extract_strided_slice %525 {offsets = [0, 2], sizes = [8, 1], strides = [1, 1]} : vector<8x15xf32> to vector<8x1xf32>
    %cst_153 = arith.constant 0.000000e+00 : f32
    %544 = vector.shape_cast %543 : vector<8x1xf32> to vector<8x1xf32>
    %545 = vector.broadcast %544 : vector<8x1xf32> to vector<8x8xf32>
    %546 = vector.broadcast %cst_153 : f32 to vector<8x8xf32>
    %547 = arith.select %542, %545, %546 : vector<8x8xi1>, vector<8x8xf32>
    %548 = arith.addf %540, %547 : vector<8x8xf32>
    %c3_i32_154 = arith.constant 3 : i32
    %549 = vector.broadcast %c3_i32_154 : i32 to vector<8x8xi32>
    %550 = arith.cmpi eq, %61, %549 : vector<8x8xi32>
    %551 = vector.extract_strided_slice %525 {offsets = [0, 3], sizes = [8, 1], strides = [1, 1]} : vector<8x15xf32> to vector<8x1xf32>
    %cst_155 = arith.constant 0.000000e+00 : f32
    %552 = vector.shape_cast %551 : vector<8x1xf32> to vector<8x1xf32>
    %553 = vector.broadcast %552 : vector<8x1xf32> to vector<8x8xf32>
    %554 = vector.broadcast %cst_155 : f32 to vector<8x8xf32>
    %555 = arith.select %550, %553, %554 : vector<8x8xi1>, vector<8x8xf32>
    %556 = arith.addf %548, %555 : vector<8x8xf32>
    %c4_i32_156 = arith.constant 4 : i32
    %557 = vector.broadcast %c4_i32_156 : i32 to vector<8x8xi32>
    %558 = arith.cmpi eq, %61, %557 : vector<8x8xi32>
    %559 = vector.extract_strided_slice %525 {offsets = [0, 4], sizes = [8, 1], strides = [1, 1]} : vector<8x15xf32> to vector<8x1xf32>
    %cst_157 = arith.constant 0.000000e+00 : f32
    %560 = vector.shape_cast %559 : vector<8x1xf32> to vector<8x1xf32>
    %561 = vector.broadcast %560 : vector<8x1xf32> to vector<8x8xf32>
    %562 = vector.broadcast %cst_157 : f32 to vector<8x8xf32>
    %563 = arith.select %558, %561, %562 : vector<8x8xi1>, vector<8x8xf32>
    %564 = arith.addf %556, %563 : vector<8x8xf32>
    %c5_i32_158 = arith.constant 5 : i32
    %565 = vector.broadcast %c5_i32_158 : i32 to vector<8x8xi32>
    %566 = arith.cmpi eq, %61, %565 : vector<8x8xi32>
    %567 = vector.extract_strided_slice %525 {offsets = [0, 5], sizes = [8, 1], strides = [1, 1]} : vector<8x15xf32> to vector<8x1xf32>
    %cst_159 = arith.constant 0.000000e+00 : f32
    %568 = vector.shape_cast %567 : vector<8x1xf32> to vector<8x1xf32>
    %569 = vector.broadcast %568 : vector<8x1xf32> to vector<8x8xf32>
    %570 = vector.broadcast %cst_159 : f32 to vector<8x8xf32>
    %571 = arith.select %566, %569, %570 : vector<8x8xi1>, vector<8x8xf32>
    %572 = arith.addf %564, %571 : vector<8x8xf32>
    %c6_i32_160 = arith.constant 6 : i32
    %573 = vector.broadcast %c6_i32_160 : i32 to vector<8x8xi32>
    %574 = arith.cmpi eq, %61, %573 : vector<8x8xi32>
    %575 = vector.extract_strided_slice %525 {offsets = [0, 6], sizes = [8, 1], strides = [1, 1]} : vector<8x15xf32> to vector<8x1xf32>
    %cst_161 = arith.constant 0.000000e+00 : f32
    %576 = vector.shape_cast %575 : vector<8x1xf32> to vector<8x1xf32>
    %577 = vector.broadcast %576 : vector<8x1xf32> to vector<8x8xf32>
    %578 = vector.broadcast %cst_161 : f32 to vector<8x8xf32>
    %579 = arith.select %574, %577, %578 : vector<8x8xi1>, vector<8x8xf32>
    %580 = arith.addf %572, %579 : vector<8x8xf32>
    %c7_i32_162 = arith.constant 7 : i32
    %581 = vector.broadcast %c7_i32_162 : i32 to vector<8x8xi32>
    %582 = arith.cmpi eq, %61, %581 : vector<8x8xi32>
    %583 = vector.extract_strided_slice %525 {offsets = [0, 7], sizes = [8, 1], strides = [1, 1]} : vector<8x15xf32> to vector<8x1xf32>
    %cst_163 = arith.constant 0.000000e+00 : f32
    %584 = vector.shape_cast %583 : vector<8x1xf32> to vector<8x1xf32>
    %585 = vector.broadcast %584 : vector<8x1xf32> to vector<8x8xf32>
    %586 = vector.broadcast %cst_163 : f32 to vector<8x8xf32>
    %587 = arith.select %582, %585, %586 : vector<8x8xi1>, vector<8x8xf32>
    %588 = arith.addf %580, %587 : vector<8x8xf32>
    %c8_i32_164 = arith.constant 8 : i32
    %589 = vector.broadcast %c8_i32_164 : i32 to vector<8x8xi32>
    %590 = arith.cmpi eq, %61, %589 : vector<8x8xi32>
    %591 = vector.extract_strided_slice %525 {offsets = [0, 8], sizes = [8, 1], strides = [1, 1]} : vector<8x15xf32> to vector<8x1xf32>
    %cst_165 = arith.constant 0.000000e+00 : f32
    %592 = vector.shape_cast %591 : vector<8x1xf32> to vector<8x1xf32>
    %593 = vector.broadcast %592 : vector<8x1xf32> to vector<8x8xf32>
    %594 = vector.broadcast %cst_165 : f32 to vector<8x8xf32>
    %595 = arith.select %590, %593, %594 : vector<8x8xi1>, vector<8x8xf32>
    %596 = arith.addf %588, %595 : vector<8x8xf32>
    %c9_i32_166 = arith.constant 9 : i32
    %597 = vector.broadcast %c9_i32_166 : i32 to vector<8x8xi32>
    %598 = arith.cmpi eq, %61, %597 : vector<8x8xi32>
    %599 = vector.extract_strided_slice %525 {offsets = [0, 9], sizes = [8, 1], strides = [1, 1]} : vector<8x15xf32> to vector<8x1xf32>
    %cst_167 = arith.constant 0.000000e+00 : f32
    %600 = vector.shape_cast %599 : vector<8x1xf32> to vector<8x1xf32>
    %601 = vector.broadcast %600 : vector<8x1xf32> to vector<8x8xf32>
    %602 = vector.broadcast %cst_167 : f32 to vector<8x8xf32>
    %603 = arith.select %598, %601, %602 : vector<8x8xi1>, vector<8x8xf32>
    %604 = arith.addf %596, %603 : vector<8x8xf32>
    %c10_i32_168 = arith.constant 10 : i32
    %605 = vector.broadcast %c10_i32_168 : i32 to vector<8x8xi32>
    %606 = arith.cmpi eq, %61, %605 : vector<8x8xi32>
    %607 = vector.extract_strided_slice %525 {offsets = [0, 10], sizes = [8, 1], strides = [1, 1]} : vector<8x15xf32> to vector<8x1xf32>
    %cst_169 = arith.constant 0.000000e+00 : f32
    %608 = vector.shape_cast %607 : vector<8x1xf32> to vector<8x1xf32>
    %609 = vector.broadcast %608 : vector<8x1xf32> to vector<8x8xf32>
    %610 = vector.broadcast %cst_169 : f32 to vector<8x8xf32>
    %611 = arith.select %606, %609, %610 : vector<8x8xi1>, vector<8x8xf32>
    %612 = arith.addf %604, %611 : vector<8x8xf32>
    %c11_i32_170 = arith.constant 11 : i32
    %613 = vector.broadcast %c11_i32_170 : i32 to vector<8x8xi32>
    %614 = arith.cmpi eq, %61, %613 : vector<8x8xi32>
    %615 = vector.extract_strided_slice %525 {offsets = [0, 11], sizes = [8, 1], strides = [1, 1]} : vector<8x15xf32> to vector<8x1xf32>
    %cst_171 = arith.constant 0.000000e+00 : f32
    %616 = vector.shape_cast %615 : vector<8x1xf32> to vector<8x1xf32>
    %617 = vector.broadcast %616 : vector<8x1xf32> to vector<8x8xf32>
    %618 = vector.broadcast %cst_171 : f32 to vector<8x8xf32>
    %619 = arith.select %614, %617, %618 : vector<8x8xi1>, vector<8x8xf32>
    %620 = arith.addf %612, %619 : vector<8x8xf32>
    %c12_i32_172 = arith.constant 12 : i32
    %621 = vector.broadcast %c12_i32_172 : i32 to vector<8x8xi32>
    %622 = arith.cmpi eq, %61, %621 : vector<8x8xi32>
    %623 = vector.extract_strided_slice %525 {offsets = [0, 12], sizes = [8, 1], strides = [1, 1]} : vector<8x15xf32> to vector<8x1xf32>
    %cst_173 = arith.constant 0.000000e+00 : f32
    %624 = vector.shape_cast %623 : vector<8x1xf32> to vector<8x1xf32>
    %625 = vector.broadcast %624 : vector<8x1xf32> to vector<8x8xf32>
    %626 = vector.broadcast %cst_173 : f32 to vector<8x8xf32>
    %627 = arith.select %622, %625, %626 : vector<8x8xi1>, vector<8x8xf32>
    %628 = arith.addf %620, %627 : vector<8x8xf32>
    %c13_i32_174 = arith.constant 13 : i32
    %629 = vector.broadcast %c13_i32_174 : i32 to vector<8x8xi32>
    %630 = arith.cmpi eq, %61, %629 : vector<8x8xi32>
    %631 = vector.extract_strided_slice %525 {offsets = [0, 13], sizes = [8, 1], strides = [1, 1]} : vector<8x15xf32> to vector<8x1xf32>
    %cst_175 = arith.constant 0.000000e+00 : f32
    %632 = vector.shape_cast %631 : vector<8x1xf32> to vector<8x1xf32>
    %633 = vector.broadcast %632 : vector<8x1xf32> to vector<8x8xf32>
    %634 = vector.broadcast %cst_175 : f32 to vector<8x8xf32>
    %635 = arith.select %630, %633, %634 : vector<8x8xi1>, vector<8x8xf32>
    %636 = arith.addf %628, %635 : vector<8x8xf32>
    %c14_i32_176 = arith.constant 14 : i32
    %637 = vector.broadcast %c14_i32_176 : i32 to vector<8x8xi32>
    %638 = arith.cmpi eq, %61, %637 : vector<8x8xi32>
    %639 = vector.extract_strided_slice %525 {offsets = [0, 14], sizes = [8, 1], strides = [1, 1]} : vector<8x15xf32> to vector<8x1xf32>
    %cst_177 = arith.constant 0.000000e+00 : f32
    %640 = vector.shape_cast %639 : vector<8x1xf32> to vector<8x1xf32>
    %641 = vector.broadcast %640 : vector<8x1xf32> to vector<8x8xf32>
    %642 = vector.broadcast %cst_177 : f32 to vector<8x8xf32>
    %643 = arith.select %638, %641, %642 : vector<8x8xi1>, vector<8x8xf32>
    %644 = arith.addf %636, %643 : vector<8x8xf32>
    %645 = arith.addf %524, %644 : vector<8x8xf32>
    %cst_178 = arith.constant 0.176776692 : f32
    %646 = vector.broadcast %cst_178 : f32 to vector<8x8xf32>
    %647 = arith.mulf %645, %646 : vector<8x8xf32>
    %cst_179 = arith.constant dense<0xFF800000> : vector<8xf32>
    %648 = vector.multi_reduction <maximumf>, %647, %cst_179 [1] : vector<8x8xf32> to vector<8xf32>
    %649 = vector.shape_cast %648 : vector<8xf32> to vector<8x1xf32>
    %650 = vector.broadcast %649 : vector<8x1xf32> to vector<8x8xf32>
    %651 = arith.subf %647, %650 : vector<8x8xf32>
    %652 = math.exp %651 : vector<8x8xf32>
    %cst_180 = arith.constant dense<0.000000e+00> : vector<8xf32>
    %653 = vector.multi_reduction <add>, %652, %cst_180 [1] : vector<8x8xf32> to vector<8xf32>
    %654 = vector.shape_cast %653 : vector<8xf32> to vector<8x1xf32>
    %655 = tpu.reciprocal %654 {approx = true} : vector<8x1xf32> -> vector<8x1xf32>
    %656 = vector.broadcast %655 : vector<8x1xf32> to vector<8x8xf32>
    %657 = arith.mulf %652, %656 : vector<8x8xf32>
    %cst_181 = arith.constant dense<0.000000e+00> : vector<8x32xf32>
    %658 = tpu.matmul %657, %522, %cst_181 {dimension_numbers = #tpu.dot_dimension_numbers<[1], [0], [0], [1], [0, 0, 1, 1], [], []>} : vector<8x8xf32>, vector<8x32xf32>, vector<8x32xf32> -> vector<8x32xf32>
    %659 = vector.extract_strided_slice %94 {offsets = [96, 0], sizes = [32, 128], strides = [1, 1]} : vector<128x128xf32> to vector<32x128xf32>
    %cst_182 = arith.constant dense<0.000000e+00> : vector<8x128xf32>
    %660 = tpu.matmul %658, %659, %cst_182 {dimension_numbers = #tpu.dot_dimension_numbers<[1], [0], [0], [1], [0, 0, 1, 1], [], []>} : vector<8x32xf32>, vector<32x128xf32>, vector<8x128xf32> -> vector<8x128xf32>
    %661 = arith.addf %519, %660 : vector<8x128xf32>
    %662 = arith.addf %55, %661 : vector<8x128xf32>
    %c0_183 = arith.constant 0 : index
    %c0_184 = arith.constant 0 : index
    %c0_185 = arith.constant 0 : index
    %663 = vector.load %arg18[%c0_183, %c0_184, %c0_185] : memref<2x1x128xf32, #tpu.memory_space<vmem>>, vector<1x1x128xf32>
    %664 = vector.shape_cast %663 : vector<1x1x128xf32> to vector<1x128xf32>
    %665 = vector.broadcast %664 : vector<1x128xf32> to vector<8x128xf32>
    %666 = arith.addf %662, %665 : vector<8x128xf32>
    %cst_186 = arith.constant dense<0.000000e+00> : vector<8xf32>
    %667 = vector.multi_reduction <add>, %666, %cst_186 [1] : vector<8x128xf32> to vector<8xf32>
    %668 = vector.shape_cast %667 : vector<8xf32> to vector<8x1xf32>
    %cst_187 = arith.constant 1.280000e+02 : f32
    %669 = vector.broadcast %cst_187 : f32 to vector<8x1xf32>
    %670 = arith.divf %668, %669 : vector<8x1xf32>
    %671 = vector.broadcast %670 : vector<8x1xf32> to vector<8x128xf32>
    %672 = arith.subf %666, %671 : vector<8x128xf32>
    %673 = vector.broadcast %670 : vector<8x1xf32> to vector<8x128xf32>
    %674 = arith.subf %666, %673 : vector<8x128xf32>
    %675 = arith.mulf %672, %674 : vector<8x128xf32>
    %cst_188 = arith.constant dense<0.000000e+00> : vector<8xf32>
    %676 = vector.multi_reduction <add>, %675, %cst_188 [1] : vector<8x128xf32> to vector<8xf32>
    %677 = vector.shape_cast %676 : vector<8xf32> to vector<8x1xf32>
    %cst_189 = arith.constant 1.280000e+02 : f32
    %678 = vector.broadcast %cst_189 : f32 to vector<8x1xf32>
    %679 = arith.divf %677, %678 : vector<8x1xf32>
    %680 = vector.broadcast %670 : vector<8x1xf32> to vector<8x128xf32>
    %681 = arith.subf %666, %680 : vector<8x128xf32>
    %cst_190 = arith.constant 9.99999974E-6 : f32
    %682 = vector.broadcast %cst_190 : f32 to vector<8x1xf32>
    %683 = arith.addf %679, %682 : vector<8x1xf32>
    %684 = math.rsqrt %683 : vector<8x1xf32>
    %685 = vector.broadcast %684 : vector<8x1xf32> to vector<8x128xf32>
    %686 = arith.mulf %681, %685 : vector<8x128xf32>
    %687 = vector.broadcast %1 : vector<1x128xf32> to vector<8x128xf32>
    %688 = arith.mulf %686, %687 : vector<8x128xf32>
    %689 = vector.broadcast %2 : vector<1x128xf32> to vector<8x128xf32>
    %690 = arith.addf %688, %689 : vector<8x128xf32>
    %c0_191 = arith.constant 0 : index
    %c0_192 = arith.constant 0 : index
    %c0_193 = arith.constant 0 : index
    %691 = vector.load %arg19[%c0_191, %c0_192, %c0_193] : memref<2x128x256xf32, #tpu.memory_space<vmem>>, vector<1x128x256xf32>
    %692 = vector.shape_cast %691 : vector<1x128x256xf32> to vector<128x256xf32>
    %cst_194 = arith.constant dense<0.000000e+00> : vector<8x256xf32>
    %693 = tpu.matmul %690, %692, %cst_194 {dimension_numbers = #tpu.dot_dimension_numbers<[1], [0], [0], [1], [0, 0, 1, 1], [], []>} : vector<8x128xf32>, vector<128x256xf32>, vector<8x256xf32> -> vector<8x256xf32>
    %c0_195 = arith.constant 0 : index
    %c0_196 = arith.constant 0 : index
    %c0_197 = arith.constant 0 : index
    %694 = vector.load %arg20[%c0_195, %c0_196, %c0_197] : memref<2x1x256xf32, #tpu.memory_space<vmem>>, vector<1x1x256xf32>
    %695 = vector.shape_cast %694 : vector<1x1x256xf32> to vector<1x256xf32>
    %696 = vector.broadcast %695 : vector<1x256xf32> to vector<8x256xf32>
    %697 = arith.addf %693, %696 : vector<8x256xf32>
    %698 = vector.extract_strided_slice %0 {offsets = [0, 4], sizes = [1, 1], strides = [1, 1]} : vector<1x6xf32> to vector<1x1xf32>
    %cst_198 = arith.constant 0.000000e+00 : f32
    %699 = vector.broadcast %cst_198 : f32 to vector<8x256xf32>
    %700 = arith.cmpf oge, %697, %699 : vector<8x256xf32>
    %701 = vector.broadcast %698 : vector<1x1xf32> to vector<8x256xf32>
    %702 = arith.mulf %701, %697 : vector<8x256xf32>
    %703 = arith.select %700, %697, %702 : vector<8x256xi1>, vector<8x256xf32>
    %c0_199 = arith.constant 0 : index
    %c0_200 = arith.constant 0 : index
    %c0_201 = arith.constant 0 : index
    %704 = vector.load %arg21[%c0_199, %c0_200, %c0_201] : memref<2x256x128xf32, #tpu.memory_space<vmem>>, vector<1x256x128xf32>
    %705 = vector.shape_cast %704 : vector<1x256x128xf32> to vector<256x128xf32>
    %cst_202 = arith.constant dense<0.000000e+00> : vector<8x128xf32>
    %706 = tpu.matmul %703, %705, %cst_202 {dimension_numbers = #tpu.dot_dimension_numbers<[1], [0], [0], [1], [0, 0, 1, 1], [], []>} : vector<8x256xf32>, vector<256x128xf32>, vector<8x128xf32> -> vector<8x128xf32>
    %c0_203 = arith.constant 0 : index
    %c0_204 = arith.constant 0 : index
    %c0_205 = arith.constant 0 : index
    %707 = vector.load %arg22[%c0_203, %c0_204, %c0_205] : memref<2x1x128xf32, #tpu.memory_space<vmem>>, vector<1x1x128xf32>
    %708 = vector.shape_cast %707 : vector<1x1x128xf32> to vector<1x128xf32>
    %709 = vector.broadcast %708 : vector<1x128xf32> to vector<8x128xf32>
    %710 = arith.addf %706, %709 : vector<8x128xf32>
    %711 = arith.addf %666, %710 : vector<8x128xf32>
    %cst_206 = arith.constant dense<0.000000e+00> : vector<8xf32>
    %712 = vector.multi_reduction <add>, %711, %cst_206 [1] : vector<8x128xf32> to vector<8xf32>
    %713 = vector.shape_cast %712 : vector<8xf32> to vector<8x1xf32>
    %cst_207 = arith.constant 1.280000e+02 : f32
    %714 = vector.broadcast %cst_207 : f32 to vector<8x1xf32>
    %715 = arith.divf %713, %714 : vector<8x1xf32>
    %716 = vector.broadcast %715 : vector<8x1xf32> to vector<8x128xf32>
    %717 = arith.subf %711, %716 : vector<8x128xf32>
    %718 = vector.broadcast %715 : vector<8x1xf32> to vector<8x128xf32>
    %719 = arith.subf %711, %718 : vector<8x128xf32>
    %720 = arith.mulf %717, %719 : vector<8x128xf32>
    %cst_208 = arith.constant dense<0.000000e+00> : vector<8xf32>
    %721 = vector.multi_reduction <add>, %720, %cst_208 [1] : vector<8x128xf32> to vector<8xf32>
    %722 = vector.shape_cast %721 : vector<8xf32> to vector<8x1xf32>
    %cst_209 = arith.constant 1.280000e+02 : f32
    %723 = vector.broadcast %cst_209 : f32 to vector<8x1xf32>
    %724 = arith.divf %722, %723 : vector<8x1xf32>
    %725 = vector.broadcast %715 : vector<8x1xf32> to vector<8x128xf32>
    %726 = arith.subf %711, %725 : vector<8x128xf32>
    %cst_210 = arith.constant 9.99999974E-6 : f32
    %727 = vector.broadcast %cst_210 : f32 to vector<8x1xf32>
    %728 = arith.addf %724, %727 : vector<8x1xf32>
    %729 = math.rsqrt %728 : vector<8x1xf32>
    %730 = vector.broadcast %729 : vector<8x1xf32> to vector<8x128xf32>
    %731 = arith.mulf %726, %730 : vector<8x128xf32>
    %732 = vector.broadcast %1 : vector<1x128xf32> to vector<8x128xf32>
    %733 = arith.mulf %731, %732 : vector<8x128xf32>
    %734 = vector.broadcast %2 : vector<1x128xf32> to vector<8x128xf32>
    %735 = arith.addf %733, %734 : vector<8x128xf32>
    %c1 = arith.constant 1 : index
    %c0_211 = arith.constant 0 : index
    %c0_212 = arith.constant 0 : index
    %736 = vector.load %arg15[%c1, %c0_211, %c0_212] : memref<2x128x384xf32, #tpu.memory_space<vmem>>, vector<1x128x384xf32>
    %737 = vector.shape_cast %736 : vector<1x128x384xf32> to vector<128x384xf32>
    %cst_213 = arith.constant dense<0.000000e+00> : vector<8x384xf32>
    %738 = tpu.matmul %735, %737, %cst_213 {dimension_numbers = #tpu.dot_dimension_numbers<[1], [0], [0], [1], [0, 0, 1, 1], [], []>} : vector<8x128xf32>, vector<128x384xf32>, vector<8x384xf32> -> vector<8x384xf32>
    %c1_214 = arith.constant 1 : index
    %c0_215 = arith.constant 0 : index
    %c0_216 = arith.constant 0 : index
    %739 = vector.load %arg16[%c1_214, %c0_215, %c0_216] : memref<2x1x384xf32, #tpu.memory_space<vmem>>, vector<1x1x384xf32>
    %740 = vector.shape_cast %739 : vector<1x1x384xf32> to vector<1x384xf32>
    %741 = vector.broadcast %740 : vector<1x384xf32> to vector<8x384xf32>
    %742 = arith.addf %738, %741 : vector<8x384xf32>
    %c1_217 = arith.constant 1 : index
    %c0_218 = arith.constant 0 : index
    %c0_219 = arith.constant 0 : index
    %743 = vector.load %arg17[%c1_217, %c0_218, %c0_219] : memref<2x128x128xf32, #tpu.memory_space<vmem>>, vector<1x128x128xf32>
    %744 = vector.shape_cast %743 : vector<1x128x128xf32> to vector<128x128xf32>
    %745 = vector.extract_strided_slice %742 {offsets = [0, 0], sizes = [8, 32], strides = [1, 1]} : vector<8x384xf32> to vector<8x32xf32>
    %746 = vector.extract_strided_slice %742 {offsets = [0, 128], sizes = [8, 32], strides = [1, 1]} : vector<8x384xf32> to vector<8x32xf32>
    %747 = vector.extract_strided_slice %742 {offsets = [0, 256], sizes = [8, 32], strides = [1, 1]} : vector<8x384xf32> to vector<8x32xf32>
    %748 = tpu.transpose %746, [1, 0] : vector<8x32xf32> -> vector<32x8xf32>
    %cst_220 = arith.constant dense<0.000000e+00> : vector<8x8xf32>
    %749 = tpu.matmul %745, %748, %cst_220 {dimension_numbers = #tpu.dot_dimension_numbers<[1], [0], [0], [1], [0, 0, 1, 1], [], []>} : vector<8x32xf32>, vector<32x8xf32>, vector<8x8xf32> -> vector<8x8xf32>
    %cst_221 = arith.constant dense<0.000000e+00> : vector<8x15xf32>
    %750 = tpu.matmul %745, %56, %cst_221 {dimension_numbers = #tpu.dot_dimension_numbers<[1], [0], [0], [1], [0, 0, 1, 1], [], []>} : vector<8x32xf32>, vector<32x15xf32>, vector<8x15xf32> -> vector<8x15xf32>
    %c0_i32_222 = arith.constant 0 : i32
    %751 = vector.broadcast %c0_i32_222 : i32 to vector<8x8xi32>
    %752 = arith.cmpi eq, %61, %751 : vector<8x8xi32>
    %753 = vector.extract_strided_slice %750 {offsets = [0, 0], sizes = [8, 1], strides = [1, 1]} : vector<8x15xf32> to vector<8x1xf32>
    %cst_223 = arith.constant 0.000000e+00 : f32
    %754 = vector.shape_cast %753 : vector<8x1xf32> to vector<8x1xf32>
    %755 = vector.broadcast %754 : vector<8x1xf32> to vector<8x8xf32>
    %756 = vector.broadcast %cst_223 : f32 to vector<8x8xf32>
    %757 = arith.select %752, %755, %756 : vector<8x8xi1>, vector<8x8xf32>
    %c1_i32_224 = arith.constant 1 : i32
    %758 = vector.broadcast %c1_i32_224 : i32 to vector<8x8xi32>
    %759 = arith.cmpi eq, %61, %758 : vector<8x8xi32>
    %760 = vector.extract_strided_slice %750 {offsets = [0, 1], sizes = [8, 1], strides = [1, 1]} : vector<8x15xf32> to vector<8x1xf32>
    %cst_225 = arith.constant 0.000000e+00 : f32
    %761 = vector.shape_cast %760 : vector<8x1xf32> to vector<8x1xf32>
    %762 = vector.broadcast %761 : vector<8x1xf32> to vector<8x8xf32>
    %763 = vector.broadcast %cst_225 : f32 to vector<8x8xf32>
    %764 = arith.select %759, %762, %763 : vector<8x8xi1>, vector<8x8xf32>
    %765 = arith.addf %757, %764 : vector<8x8xf32>
    %c2_i32_226 = arith.constant 2 : i32
    %766 = vector.broadcast %c2_i32_226 : i32 to vector<8x8xi32>
    %767 = arith.cmpi eq, %61, %766 : vector<8x8xi32>
    %768 = vector.extract_strided_slice %750 {offsets = [0, 2], sizes = [8, 1], strides = [1, 1]} : vector<8x15xf32> to vector<8x1xf32>
    %cst_227 = arith.constant 0.000000e+00 : f32
    %769 = vector.shape_cast %768 : vector<8x1xf32> to vector<8x1xf32>
    %770 = vector.broadcast %769 : vector<8x1xf32> to vector<8x8xf32>
    %771 = vector.broadcast %cst_227 : f32 to vector<8x8xf32>
    %772 = arith.select %767, %770, %771 : vector<8x8xi1>, vector<8x8xf32>
    %773 = arith.addf %765, %772 : vector<8x8xf32>
    %c3_i32_228 = arith.constant 3 : i32
    %774 = vector.broadcast %c3_i32_228 : i32 to vector<8x8xi32>
    %775 = arith.cmpi eq, %61, %774 : vector<8x8xi32>
    %776 = vector.extract_strided_slice %750 {offsets = [0, 3], sizes = [8, 1], strides = [1, 1]} : vector<8x15xf32> to vector<8x1xf32>
    %cst_229 = arith.constant 0.000000e+00 : f32
    %777 = vector.shape_cast %776 : vector<8x1xf32> to vector<8x1xf32>
    %778 = vector.broadcast %777 : vector<8x1xf32> to vector<8x8xf32>
    %779 = vector.broadcast %cst_229 : f32 to vector<8x8xf32>
    %780 = arith.select %775, %778, %779 : vector<8x8xi1>, vector<8x8xf32>
    %781 = arith.addf %773, %780 : vector<8x8xf32>
    %c4_i32_230 = arith.constant 4 : i32
    %782 = vector.broadcast %c4_i32_230 : i32 to vector<8x8xi32>
    %783 = arith.cmpi eq, %61, %782 : vector<8x8xi32>
    %784 = vector.extract_strided_slice %750 {offsets = [0, 4], sizes = [8, 1], strides = [1, 1]} : vector<8x15xf32> to vector<8x1xf32>
    %cst_231 = arith.constant 0.000000e+00 : f32
    %785 = vector.shape_cast %784 : vector<8x1xf32> to vector<8x1xf32>
    %786 = vector.broadcast %785 : vector<8x1xf32> to vector<8x8xf32>
    %787 = vector.broadcast %cst_231 : f32 to vector<8x8xf32>
    %788 = arith.select %783, %786, %787 : vector<8x8xi1>, vector<8x8xf32>
    %789 = arith.addf %781, %788 : vector<8x8xf32>
    %c5_i32_232 = arith.constant 5 : i32
    %790 = vector.broadcast %c5_i32_232 : i32 to vector<8x8xi32>
    %791 = arith.cmpi eq, %61, %790 : vector<8x8xi32>
    %792 = vector.extract_strided_slice %750 {offsets = [0, 5], sizes = [8, 1], strides = [1, 1]} : vector<8x15xf32> to vector<8x1xf32>
    %cst_233 = arith.constant 0.000000e+00 : f32
    %793 = vector.shape_cast %792 : vector<8x1xf32> to vector<8x1xf32>
    %794 = vector.broadcast %793 : vector<8x1xf32> to vector<8x8xf32>
    %795 = vector.broadcast %cst_233 : f32 to vector<8x8xf32>
    %796 = arith.select %791, %794, %795 : vector<8x8xi1>, vector<8x8xf32>
    %797 = arith.addf %789, %796 : vector<8x8xf32>
    %c6_i32_234 = arith.constant 6 : i32
    %798 = vector.broadcast %c6_i32_234 : i32 to vector<8x8xi32>
    %799 = arith.cmpi eq, %61, %798 : vector<8x8xi32>
    %800 = vector.extract_strided_slice %750 {offsets = [0, 6], sizes = [8, 1], strides = [1, 1]} : vector<8x15xf32> to vector<8x1xf32>
    %cst_235 = arith.constant 0.000000e+00 : f32
    %801 = vector.shape_cast %800 : vector<8x1xf32> to vector<8x1xf32>
    %802 = vector.broadcast %801 : vector<8x1xf32> to vector<8x8xf32>
    %803 = vector.broadcast %cst_235 : f32 to vector<8x8xf32>
    %804 = arith.select %799, %802, %803 : vector<8x8xi1>, vector<8x8xf32>
    %805 = arith.addf %797, %804 : vector<8x8xf32>
    %c7_i32_236 = arith.constant 7 : i32
    %806 = vector.broadcast %c7_i32_236 : i32 to vector<8x8xi32>
    %807 = arith.cmpi eq, %61, %806 : vector<8x8xi32>
    %808 = vector.extract_strided_slice %750 {offsets = [0, 7], sizes = [8, 1], strides = [1, 1]} : vector<8x15xf32> to vector<8x1xf32>
    %cst_237 = arith.constant 0.000000e+00 : f32
    %809 = vector.shape_cast %808 : vector<8x1xf32> to vector<8x1xf32>
    %810 = vector.broadcast %809 : vector<8x1xf32> to vector<8x8xf32>
    %811 = vector.broadcast %cst_237 : f32 to vector<8x8xf32>
    %812 = arith.select %807, %810, %811 : vector<8x8xi1>, vector<8x8xf32>
    %813 = arith.addf %805, %812 : vector<8x8xf32>
    %c8_i32_238 = arith.constant 8 : i32
    %814 = vector.broadcast %c8_i32_238 : i32 to vector<8x8xi32>
    %815 = arith.cmpi eq, %61, %814 : vector<8x8xi32>
    %816 = vector.extract_strided_slice %750 {offsets = [0, 8], sizes = [8, 1], strides = [1, 1]} : vector<8x15xf32> to vector<8x1xf32>
    %cst_239 = arith.constant 0.000000e+00 : f32
    %817 = vector.shape_cast %816 : vector<8x1xf32> to vector<8x1xf32>
    %818 = vector.broadcast %817 : vector<8x1xf32> to vector<8x8xf32>
    %819 = vector.broadcast %cst_239 : f32 to vector<8x8xf32>
    %820 = arith.select %815, %818, %819 : vector<8x8xi1>, vector<8x8xf32>
    %821 = arith.addf %813, %820 : vector<8x8xf32>
    %c9_i32_240 = arith.constant 9 : i32
    %822 = vector.broadcast %c9_i32_240 : i32 to vector<8x8xi32>
    %823 = arith.cmpi eq, %61, %822 : vector<8x8xi32>
    %824 = vector.extract_strided_slice %750 {offsets = [0, 9], sizes = [8, 1], strides = [1, 1]} : vector<8x15xf32> to vector<8x1xf32>
    %cst_241 = arith.constant 0.000000e+00 : f32
    %825 = vector.shape_cast %824 : vector<8x1xf32> to vector<8x1xf32>
    %826 = vector.broadcast %825 : vector<8x1xf32> to vector<8x8xf32>
    %827 = vector.broadcast %cst_241 : f32 to vector<8x8xf32>
    %828 = arith.select %823, %826, %827 : vector<8x8xi1>, vector<8x8xf32>
    %829 = arith.addf %821, %828 : vector<8x8xf32>
    %c10_i32_242 = arith.constant 10 : i32
    %830 = vector.broadcast %c10_i32_242 : i32 to vector<8x8xi32>
    %831 = arith.cmpi eq, %61, %830 : vector<8x8xi32>
    %832 = vector.extract_strided_slice %750 {offsets = [0, 10], sizes = [8, 1], strides = [1, 1]} : vector<8x15xf32> to vector<8x1xf32>
    %cst_243 = arith.constant 0.000000e+00 : f32
    %833 = vector.shape_cast %832 : vector<8x1xf32> to vector<8x1xf32>
    %834 = vector.broadcast %833 : vector<8x1xf32> to vector<8x8xf32>
    %835 = vector.broadcast %cst_243 : f32 to vector<8x8xf32>
    %836 = arith.select %831, %834, %835 : vector<8x8xi1>, vector<8x8xf32>
    %837 = arith.addf %829, %836 : vector<8x8xf32>
    %c11_i32_244 = arith.constant 11 : i32
    %838 = vector.broadcast %c11_i32_244 : i32 to vector<8x8xi32>
    %839 = arith.cmpi eq, %61, %838 : vector<8x8xi32>
    %840 = vector.extract_strided_slice %750 {offsets = [0, 11], sizes = [8, 1], strides = [1, 1]} : vector<8x15xf32> to vector<8x1xf32>
    %cst_245 = arith.constant 0.000000e+00 : f32
    %841 = vector.shape_cast %840 : vector<8x1xf32> to vector<8x1xf32>
    %842 = vector.broadcast %841 : vector<8x1xf32> to vector<8x8xf32>
    %843 = vector.broadcast %cst_245 : f32 to vector<8x8xf32>
    %844 = arith.select %839, %842, %843 : vector<8x8xi1>, vector<8x8xf32>
    %845 = arith.addf %837, %844 : vector<8x8xf32>
    %c12_i32_246 = arith.constant 12 : i32
    %846 = vector.broadcast %c12_i32_246 : i32 to vector<8x8xi32>
    %847 = arith.cmpi eq, %61, %846 : vector<8x8xi32>
    %848 = vector.extract_strided_slice %750 {offsets = [0, 12], sizes = [8, 1], strides = [1, 1]} : vector<8x15xf32> to vector<8x1xf32>
    %cst_247 = arith.constant 0.000000e+00 : f32
    %849 = vector.shape_cast %848 : vector<8x1xf32> to vector<8x1xf32>
    %850 = vector.broadcast %849 : vector<8x1xf32> to vector<8x8xf32>
    %851 = vector.broadcast %cst_247 : f32 to vector<8x8xf32>
    %852 = arith.select %847, %850, %851 : vector<8x8xi1>, vector<8x8xf32>
    %853 = arith.addf %845, %852 : vector<8x8xf32>
    %c13_i32_248 = arith.constant 13 : i32
    %854 = vector.broadcast %c13_i32_248 : i32 to vector<8x8xi32>
    %855 = arith.cmpi eq, %61, %854 : vector<8x8xi32>
    %856 = vector.extract_strided_slice %750 {offsets = [0, 13], sizes = [8, 1], strides = [1, 1]} : vector<8x15xf32> to vector<8x1xf32>
    %cst_249 = arith.constant 0.000000e+00 : f32
    %857 = vector.shape_cast %856 : vector<8x1xf32> to vector<8x1xf32>
    %858 = vector.broadcast %857 : vector<8x1xf32> to vector<8x8xf32>
    %859 = vector.broadcast %cst_249 : f32 to vector<8x8xf32>
    %860 = arith.select %855, %858, %859 : vector<8x8xi1>, vector<8x8xf32>
    %861 = arith.addf %853, %860 : vector<8x8xf32>
    %c14_i32_250 = arith.constant 14 : i32
    %862 = vector.broadcast %c14_i32_250 : i32 to vector<8x8xi32>
    %863 = arith.cmpi eq, %61, %862 : vector<8x8xi32>
    %864 = vector.extract_strided_slice %750 {offsets = [0, 14], sizes = [8, 1], strides = [1, 1]} : vector<8x15xf32> to vector<8x1xf32>
    %cst_251 = arith.constant 0.000000e+00 : f32
    %865 = vector.shape_cast %864 : vector<8x1xf32> to vector<8x1xf32>
    %866 = vector.broadcast %865 : vector<8x1xf32> to vector<8x8xf32>
    %867 = vector.broadcast %cst_251 : f32 to vector<8x8xf32>
    %868 = arith.select %863, %866, %867 : vector<8x8xi1>, vector<8x8xf32>
    %869 = arith.addf %861, %868 : vector<8x8xf32>
    %870 = arith.addf %749, %869 : vector<8x8xf32>
    %cst_252 = arith.constant 0.176776692 : f32
    %871 = vector.broadcast %cst_252 : f32 to vector<8x8xf32>
    %872 = arith.mulf %870, %871 : vector<8x8xf32>
    %cst_253 = arith.constant dense<0xFF800000> : vector<8xf32>
    %873 = vector.multi_reduction <maximumf>, %872, %cst_253 [1] : vector<8x8xf32> to vector<8xf32>
    %874 = vector.shape_cast %873 : vector<8xf32> to vector<8x1xf32>
    %875 = vector.broadcast %874 : vector<8x1xf32> to vector<8x8xf32>
    %876 = arith.subf %872, %875 : vector<8x8xf32>
    %877 = math.exp %876 : vector<8x8xf32>
    %cst_254 = arith.constant dense<0.000000e+00> : vector<8xf32>
    %878 = vector.multi_reduction <add>, %877, %cst_254 [1] : vector<8x8xf32> to vector<8xf32>
    %879 = vector.shape_cast %878 : vector<8xf32> to vector<8x1xf32>
    %880 = tpu.reciprocal %879 {approx = true} : vector<8x1xf32> -> vector<8x1xf32>
    %881 = vector.broadcast %880 : vector<8x1xf32> to vector<8x8xf32>
    %882 = arith.mulf %877, %881 : vector<8x8xf32>
    %cst_255 = arith.constant dense<0.000000e+00> : vector<8x32xf32>
    %883 = tpu.matmul %882, %747, %cst_255 {dimension_numbers = #tpu.dot_dimension_numbers<[1], [0], [0], [1], [0, 0, 1, 1], [], []>} : vector<8x8xf32>, vector<8x32xf32>, vector<8x32xf32> -> vector<8x32xf32>
    %884 = vector.extract_strided_slice %744 {offsets = [0, 0], sizes = [32, 128], strides = [1, 1]} : vector<128x128xf32> to vector<32x128xf32>
    %cst_256 = arith.constant dense<0.000000e+00> : vector<8x128xf32>
    %885 = tpu.matmul %883, %884, %cst_256 {dimension_numbers = #tpu.dot_dimension_numbers<[1], [0], [0], [1], [0, 0, 1, 1], [], []>} : vector<8x32xf32>, vector<32x128xf32>, vector<8x128xf32> -> vector<8x128xf32>
    %886 = vector.extract_strided_slice %742 {offsets = [0, 32], sizes = [8, 32], strides = [1, 1]} : vector<8x384xf32> to vector<8x32xf32>
    %887 = vector.extract_strided_slice %742 {offsets = [0, 160], sizes = [8, 32], strides = [1, 1]} : vector<8x384xf32> to vector<8x32xf32>
    %888 = vector.extract_strided_slice %742 {offsets = [0, 288], sizes = [8, 32], strides = [1, 1]} : vector<8x384xf32> to vector<8x32xf32>
    %889 = tpu.transpose %887, [1, 0] : vector<8x32xf32> -> vector<32x8xf32>
    %cst_257 = arith.constant dense<0.000000e+00> : vector<8x8xf32>
    %890 = tpu.matmul %886, %889, %cst_257 {dimension_numbers = #tpu.dot_dimension_numbers<[1], [0], [0], [1], [0, 0, 1, 1], [], []>} : vector<8x32xf32>, vector<32x8xf32>, vector<8x8xf32> -> vector<8x8xf32>
    %cst_258 = arith.constant dense<0.000000e+00> : vector<8x15xf32>
    %891 = tpu.matmul %886, %56, %cst_258 {dimension_numbers = #tpu.dot_dimension_numbers<[1], [0], [0], [1], [0, 0, 1, 1], [], []>} : vector<8x32xf32>, vector<32x15xf32>, vector<8x15xf32> -> vector<8x15xf32>
    %c0_i32_259 = arith.constant 0 : i32
    %892 = vector.broadcast %c0_i32_259 : i32 to vector<8x8xi32>
    %893 = arith.cmpi eq, %61, %892 : vector<8x8xi32>
    %894 = vector.extract_strided_slice %891 {offsets = [0, 0], sizes = [8, 1], strides = [1, 1]} : vector<8x15xf32> to vector<8x1xf32>
    %cst_260 = arith.constant 0.000000e+00 : f32
    %895 = vector.shape_cast %894 : vector<8x1xf32> to vector<8x1xf32>
    %896 = vector.broadcast %895 : vector<8x1xf32> to vector<8x8xf32>
    %897 = vector.broadcast %cst_260 : f32 to vector<8x8xf32>
    %898 = arith.select %893, %896, %897 : vector<8x8xi1>, vector<8x8xf32>
    %c1_i32_261 = arith.constant 1 : i32
    %899 = vector.broadcast %c1_i32_261 : i32 to vector<8x8xi32>
    %900 = arith.cmpi eq, %61, %899 : vector<8x8xi32>
    %901 = vector.extract_strided_slice %891 {offsets = [0, 1], sizes = [8, 1], strides = [1, 1]} : vector<8x15xf32> to vector<8x1xf32>
    %cst_262 = arith.constant 0.000000e+00 : f32
    %902 = vector.shape_cast %901 : vector<8x1xf32> to vector<8x1xf32>
    %903 = vector.broadcast %902 : vector<8x1xf32> to vector<8x8xf32>
    %904 = vector.broadcast %cst_262 : f32 to vector<8x8xf32>
    %905 = arith.select %900, %903, %904 : vector<8x8xi1>, vector<8x8xf32>
    %906 = arith.addf %898, %905 : vector<8x8xf32>
    %c2_i32_263 = arith.constant 2 : i32
    %907 = vector.broadcast %c2_i32_263 : i32 to vector<8x8xi32>
    %908 = arith.cmpi eq, %61, %907 : vector<8x8xi32>
    %909 = vector.extract_strided_slice %891 {offsets = [0, 2], sizes = [8, 1], strides = [1, 1]} : vector<8x15xf32> to vector<8x1xf32>
    %cst_264 = arith.constant 0.000000e+00 : f32
    %910 = vector.shape_cast %909 : vector<8x1xf32> to vector<8x1xf32>
    %911 = vector.broadcast %910 : vector<8x1xf32> to vector<8x8xf32>
    %912 = vector.broadcast %cst_264 : f32 to vector<8x8xf32>
    %913 = arith.select %908, %911, %912 : vector<8x8xi1>, vector<8x8xf32>
    %914 = arith.addf %906, %913 : vector<8x8xf32>
    %c3_i32_265 = arith.constant 3 : i32
    %915 = vector.broadcast %c3_i32_265 : i32 to vector<8x8xi32>
    %916 = arith.cmpi eq, %61, %915 : vector<8x8xi32>
    %917 = vector.extract_strided_slice %891 {offsets = [0, 3], sizes = [8, 1], strides = [1, 1]} : vector<8x15xf32> to vector<8x1xf32>
    %cst_266 = arith.constant 0.000000e+00 : f32
    %918 = vector.shape_cast %917 : vector<8x1xf32> to vector<8x1xf32>
    %919 = vector.broadcast %918 : vector<8x1xf32> to vector<8x8xf32>
    %920 = vector.broadcast %cst_266 : f32 to vector<8x8xf32>
    %921 = arith.select %916, %919, %920 : vector<8x8xi1>, vector<8x8xf32>
    %922 = arith.addf %914, %921 : vector<8x8xf32>
    %c4_i32_267 = arith.constant 4 : i32
    %923 = vector.broadcast %c4_i32_267 : i32 to vector<8x8xi32>
    %924 = arith.cmpi eq, %61, %923 : vector<8x8xi32>
    %925 = vector.extract_strided_slice %891 {offsets = [0, 4], sizes = [8, 1], strides = [1, 1]} : vector<8x15xf32> to vector<8x1xf32>
    %cst_268 = arith.constant 0.000000e+00 : f32
    %926 = vector.shape_cast %925 : vector<8x1xf32> to vector<8x1xf32>
    %927 = vector.broadcast %926 : vector<8x1xf32> to vector<8x8xf32>
    %928 = vector.broadcast %cst_268 : f32 to vector<8x8xf32>
    %929 = arith.select %924, %927, %928 : vector<8x8xi1>, vector<8x8xf32>
    %930 = arith.addf %922, %929 : vector<8x8xf32>
    %c5_i32_269 = arith.constant 5 : i32
    %931 = vector.broadcast %c5_i32_269 : i32 to vector<8x8xi32>
    %932 = arith.cmpi eq, %61, %931 : vector<8x8xi32>
    %933 = vector.extract_strided_slice %891 {offsets = [0, 5], sizes = [8, 1], strides = [1, 1]} : vector<8x15xf32> to vector<8x1xf32>
    %cst_270 = arith.constant 0.000000e+00 : f32
    %934 = vector.shape_cast %933 : vector<8x1xf32> to vector<8x1xf32>
    %935 = vector.broadcast %934 : vector<8x1xf32> to vector<8x8xf32>
    %936 = vector.broadcast %cst_270 : f32 to vector<8x8xf32>
    %937 = arith.select %932, %935, %936 : vector<8x8xi1>, vector<8x8xf32>
    %938 = arith.addf %930, %937 : vector<8x8xf32>
    %c6_i32_271 = arith.constant 6 : i32
    %939 = vector.broadcast %c6_i32_271 : i32 to vector<8x8xi32>
    %940 = arith.cmpi eq, %61, %939 : vector<8x8xi32>
    %941 = vector.extract_strided_slice %891 {offsets = [0, 6], sizes = [8, 1], strides = [1, 1]} : vector<8x15xf32> to vector<8x1xf32>
    %cst_272 = arith.constant 0.000000e+00 : f32
    %942 = vector.shape_cast %941 : vector<8x1xf32> to vector<8x1xf32>
    %943 = vector.broadcast %942 : vector<8x1xf32> to vector<8x8xf32>
    %944 = vector.broadcast %cst_272 : f32 to vector<8x8xf32>
    %945 = arith.select %940, %943, %944 : vector<8x8xi1>, vector<8x8xf32>
    %946 = arith.addf %938, %945 : vector<8x8xf32>
    %c7_i32_273 = arith.constant 7 : i32
    %947 = vector.broadcast %c7_i32_273 : i32 to vector<8x8xi32>
    %948 = arith.cmpi eq, %61, %947 : vector<8x8xi32>
    %949 = vector.extract_strided_slice %891 {offsets = [0, 7], sizes = [8, 1], strides = [1, 1]} : vector<8x15xf32> to vector<8x1xf32>
    %cst_274 = arith.constant 0.000000e+00 : f32
    %950 = vector.shape_cast %949 : vector<8x1xf32> to vector<8x1xf32>
    %951 = vector.broadcast %950 : vector<8x1xf32> to vector<8x8xf32>
    %952 = vector.broadcast %cst_274 : f32 to vector<8x8xf32>
    %953 = arith.select %948, %951, %952 : vector<8x8xi1>, vector<8x8xf32>
    %954 = arith.addf %946, %953 : vector<8x8xf32>
    %c8_i32_275 = arith.constant 8 : i32
    %955 = vector.broadcast %c8_i32_275 : i32 to vector<8x8xi32>
    %956 = arith.cmpi eq, %61, %955 : vector<8x8xi32>
    %957 = vector.extract_strided_slice %891 {offsets = [0, 8], sizes = [8, 1], strides = [1, 1]} : vector<8x15xf32> to vector<8x1xf32>
    %cst_276 = arith.constant 0.000000e+00 : f32
    %958 = vector.shape_cast %957 : vector<8x1xf32> to vector<8x1xf32>
    %959 = vector.broadcast %958 : vector<8x1xf32> to vector<8x8xf32>
    %960 = vector.broadcast %cst_276 : f32 to vector<8x8xf32>
    %961 = arith.select %956, %959, %960 : vector<8x8xi1>, vector<8x8xf32>
    %962 = arith.addf %954, %961 : vector<8x8xf32>
    %c9_i32_277 = arith.constant 9 : i32
    %963 = vector.broadcast %c9_i32_277 : i32 to vector<8x8xi32>
    %964 = arith.cmpi eq, %61, %963 : vector<8x8xi32>
    %965 = vector.extract_strided_slice %891 {offsets = [0, 9], sizes = [8, 1], strides = [1, 1]} : vector<8x15xf32> to vector<8x1xf32>
    %cst_278 = arith.constant 0.000000e+00 : f32
    %966 = vector.shape_cast %965 : vector<8x1xf32> to vector<8x1xf32>
    %967 = vector.broadcast %966 : vector<8x1xf32> to vector<8x8xf32>
    %968 = vector.broadcast %cst_278 : f32 to vector<8x8xf32>
    %969 = arith.select %964, %967, %968 : vector<8x8xi1>, vector<8x8xf32>
    %970 = arith.addf %962, %969 : vector<8x8xf32>
    %c10_i32_279 = arith.constant 10 : i32
    %971 = vector.broadcast %c10_i32_279 : i32 to vector<8x8xi32>
    %972 = arith.cmpi eq, %61, %971 : vector<8x8xi32>
    %973 = vector.extract_strided_slice %891 {offsets = [0, 10], sizes = [8, 1], strides = [1, 1]} : vector<8x15xf32> to vector<8x1xf32>
    %cst_280 = arith.constant 0.000000e+00 : f32
    %974 = vector.shape_cast %973 : vector<8x1xf32> to vector<8x1xf32>
    %975 = vector.broadcast %974 : vector<8x1xf32> to vector<8x8xf32>
    %976 = vector.broadcast %cst_280 : f32 to vector<8x8xf32>
    %977 = arith.select %972, %975, %976 : vector<8x8xi1>, vector<8x8xf32>
    %978 = arith.addf %970, %977 : vector<8x8xf32>
    %c11_i32_281 = arith.constant 11 : i32
    %979 = vector.broadcast %c11_i32_281 : i32 to vector<8x8xi32>
    %980 = arith.cmpi eq, %61, %979 : vector<8x8xi32>
    %981 = vector.extract_strided_slice %891 {offsets = [0, 11], sizes = [8, 1], strides = [1, 1]} : vector<8x15xf32> to vector<8x1xf32>
    %cst_282 = arith.constant 0.000000e+00 : f32
    %982 = vector.shape_cast %981 : vector<8x1xf32> to vector<8x1xf32>
    %983 = vector.broadcast %982 : vector<8x1xf32> to vector<8x8xf32>
    %984 = vector.broadcast %cst_282 : f32 to vector<8x8xf32>
    %985 = arith.select %980, %983, %984 : vector<8x8xi1>, vector<8x8xf32>
    %986 = arith.addf %978, %985 : vector<8x8xf32>
    %c12_i32_283 = arith.constant 12 : i32
    %987 = vector.broadcast %c12_i32_283 : i32 to vector<8x8xi32>
    %988 = arith.cmpi eq, %61, %987 : vector<8x8xi32>
    %989 = vector.extract_strided_slice %891 {offsets = [0, 12], sizes = [8, 1], strides = [1, 1]} : vector<8x15xf32> to vector<8x1xf32>
    %cst_284 = arith.constant 0.000000e+00 : f32
    %990 = vector.shape_cast %989 : vector<8x1xf32> to vector<8x1xf32>
    %991 = vector.broadcast %990 : vector<8x1xf32> to vector<8x8xf32>
    %992 = vector.broadcast %cst_284 : f32 to vector<8x8xf32>
    %993 = arith.select %988, %991, %992 : vector<8x8xi1>, vector<8x8xf32>
    %994 = arith.addf %986, %993 : vector<8x8xf32>
    %c13_i32_285 = arith.constant 13 : i32
    %995 = vector.broadcast %c13_i32_285 : i32 to vector<8x8xi32>
    %996 = arith.cmpi eq, %61, %995 : vector<8x8xi32>
    %997 = vector.extract_strided_slice %891 {offsets = [0, 13], sizes = [8, 1], strides = [1, 1]} : vector<8x15xf32> to vector<8x1xf32>
    %cst_286 = arith.constant 0.000000e+00 : f32
    %998 = vector.shape_cast %997 : vector<8x1xf32> to vector<8x1xf32>
    %999 = vector.broadcast %998 : vector<8x1xf32> to vector<8x8xf32>
    %1000 = vector.broadcast %cst_286 : f32 to vector<8x8xf32>
    %1001 = arith.select %996, %999, %1000 : vector<8x8xi1>, vector<8x8xf32>
    %1002 = arith.addf %994, %1001 : vector<8x8xf32>
    %c14_i32_287 = arith.constant 14 : i32
    %1003 = vector.broadcast %c14_i32_287 : i32 to vector<8x8xi32>
    %1004 = arith.cmpi eq, %61, %1003 : vector<8x8xi32>
    %1005 = vector.extract_strided_slice %891 {offsets = [0, 14], sizes = [8, 1], strides = [1, 1]} : vector<8x15xf32> to vector<8x1xf32>
    %cst_288 = arith.constant 0.000000e+00 : f32
    %1006 = vector.shape_cast %1005 : vector<8x1xf32> to vector<8x1xf32>
    %1007 = vector.broadcast %1006 : vector<8x1xf32> to vector<8x8xf32>
    %1008 = vector.broadcast %cst_288 : f32 to vector<8x8xf32>
    %1009 = arith.select %1004, %1007, %1008 : vector<8x8xi1>, vector<8x8xf32>
    %1010 = arith.addf %1002, %1009 : vector<8x8xf32>
    %1011 = arith.addf %890, %1010 : vector<8x8xf32>
    %cst_289 = arith.constant 0.176776692 : f32
    %1012 = vector.broadcast %cst_289 : f32 to vector<8x8xf32>
    %1013 = arith.mulf %1011, %1012 : vector<8x8xf32>
    %cst_290 = arith.constant dense<0xFF800000> : vector<8xf32>
    %1014 = vector.multi_reduction <maximumf>, %1013, %cst_290 [1] : vector<8x8xf32> to vector<8xf32>
    %1015 = vector.shape_cast %1014 : vector<8xf32> to vector<8x1xf32>
    %1016 = vector.broadcast %1015 : vector<8x1xf32> to vector<8x8xf32>
    %1017 = arith.subf %1013, %1016 : vector<8x8xf32>
    %1018 = math.exp %1017 : vector<8x8xf32>
    %cst_291 = arith.constant dense<0.000000e+00> : vector<8xf32>
    %1019 = vector.multi_reduction <add>, %1018, %cst_291 [1] : vector<8x8xf32> to vector<8xf32>
    %1020 = vector.shape_cast %1019 : vector<8xf32> to vector<8x1xf32>
    %1021 = tpu.reciprocal %1020 {approx = true} : vector<8x1xf32> -> vector<8x1xf32>
    %1022 = vector.broadcast %1021 : vector<8x1xf32> to vector<8x8xf32>
    %1023 = arith.mulf %1018, %1022 : vector<8x8xf32>
    %cst_292 = arith.constant dense<0.000000e+00> : vector<8x32xf32>
    %1024 = tpu.matmul %1023, %888, %cst_292 {dimension_numbers = #tpu.dot_dimension_numbers<[1], [0], [0], [1], [0, 0, 1, 1], [], []>} : vector<8x8xf32>, vector<8x32xf32>, vector<8x32xf32> -> vector<8x32xf32>
    %1025 = vector.extract_strided_slice %744 {offsets = [32, 0], sizes = [32, 128], strides = [1, 1]} : vector<128x128xf32> to vector<32x128xf32>
    %cst_293 = arith.constant dense<0.000000e+00> : vector<8x128xf32>
    %1026 = tpu.matmul %1024, %1025, %cst_293 {dimension_numbers = #tpu.dot_dimension_numbers<[1], [0], [0], [1], [0, 0, 1, 1], [], []>} : vector<8x32xf32>, vector<32x128xf32>, vector<8x128xf32> -> vector<8x128xf32>
    %1027 = arith.addf %885, %1026 : vector<8x128xf32>
    %1028 = vector.extract_strided_slice %742 {offsets = [0, 64], sizes = [8, 32], strides = [1, 1]} : vector<8x384xf32> to vector<8x32xf32>
    %1029 = vector.extract_strided_slice %742 {offsets = [0, 192], sizes = [8, 32], strides = [1, 1]} : vector<8x384xf32> to vector<8x32xf32>
    %1030 = vector.extract_strided_slice %742 {offsets = [0, 320], sizes = [8, 32], strides = [1, 1]} : vector<8x384xf32> to vector<8x32xf32>
    %1031 = tpu.transpose %1029, [1, 0] : vector<8x32xf32> -> vector<32x8xf32>
    %cst_294 = arith.constant dense<0.000000e+00> : vector<8x8xf32>
    %1032 = tpu.matmul %1028, %1031, %cst_294 {dimension_numbers = #tpu.dot_dimension_numbers<[1], [0], [0], [1], [0, 0, 1, 1], [], []>} : vector<8x32xf32>, vector<32x8xf32>, vector<8x8xf32> -> vector<8x8xf32>
    %cst_295 = arith.constant dense<0.000000e+00> : vector<8x15xf32>
    %1033 = tpu.matmul %1028, %56, %cst_295 {dimension_numbers = #tpu.dot_dimension_numbers<[1], [0], [0], [1], [0, 0, 1, 1], [], []>} : vector<8x32xf32>, vector<32x15xf32>, vector<8x15xf32> -> vector<8x15xf32>
    %c0_i32_296 = arith.constant 0 : i32
    %1034 = vector.broadcast %c0_i32_296 : i32 to vector<8x8xi32>
    %1035 = arith.cmpi eq, %61, %1034 : vector<8x8xi32>
    %1036 = vector.extract_strided_slice %1033 {offsets = [0, 0], sizes = [8, 1], strides = [1, 1]} : vector<8x15xf32> to vector<8x1xf32>
    %cst_297 = arith.constant 0.000000e+00 : f32
    %1037 = vector.shape_cast %1036 : vector<8x1xf32> to vector<8x1xf32>
    %1038 = vector.broadcast %1037 : vector<8x1xf32> to vector<8x8xf32>
    %1039 = vector.broadcast %cst_297 : f32 to vector<8x8xf32>
    %1040 = arith.select %1035, %1038, %1039 : vector<8x8xi1>, vector<8x8xf32>
    %c1_i32_298 = arith.constant 1 : i32
    %1041 = vector.broadcast %c1_i32_298 : i32 to vector<8x8xi32>
    %1042 = arith.cmpi eq, %61, %1041 : vector<8x8xi32>
    %1043 = vector.extract_strided_slice %1033 {offsets = [0, 1], sizes = [8, 1], strides = [1, 1]} : vector<8x15xf32> to vector<8x1xf32>
    %cst_299 = arith.constant 0.000000e+00 : f32
    %1044 = vector.shape_cast %1043 : vector<8x1xf32> to vector<8x1xf32>
    %1045 = vector.broadcast %1044 : vector<8x1xf32> to vector<8x8xf32>
    %1046 = vector.broadcast %cst_299 : f32 to vector<8x8xf32>
    %1047 = arith.select %1042, %1045, %1046 : vector<8x8xi1>, vector<8x8xf32>
    %1048 = arith.addf %1040, %1047 : vector<8x8xf32>
    %c2_i32_300 = arith.constant 2 : i32
    %1049 = vector.broadcast %c2_i32_300 : i32 to vector<8x8xi32>
    %1050 = arith.cmpi eq, %61, %1049 : vector<8x8xi32>
    %1051 = vector.extract_strided_slice %1033 {offsets = [0, 2], sizes = [8, 1], strides = [1, 1]} : vector<8x15xf32> to vector<8x1xf32>
    %cst_301 = arith.constant 0.000000e+00 : f32
    %1052 = vector.shape_cast %1051 : vector<8x1xf32> to vector<8x1xf32>
    %1053 = vector.broadcast %1052 : vector<8x1xf32> to vector<8x8xf32>
    %1054 = vector.broadcast %cst_301 : f32 to vector<8x8xf32>
    %1055 = arith.select %1050, %1053, %1054 : vector<8x8xi1>, vector<8x8xf32>
    %1056 = arith.addf %1048, %1055 : vector<8x8xf32>
    %c3_i32_302 = arith.constant 3 : i32
    %1057 = vector.broadcast %c3_i32_302 : i32 to vector<8x8xi32>
    %1058 = arith.cmpi eq, %61, %1057 : vector<8x8xi32>
    %1059 = vector.extract_strided_slice %1033 {offsets = [0, 3], sizes = [8, 1], strides = [1, 1]} : vector<8x15xf32> to vector<8x1xf32>
    %cst_303 = arith.constant 0.000000e+00 : f32
    %1060 = vector.shape_cast %1059 : vector<8x1xf32> to vector<8x1xf32>
    %1061 = vector.broadcast %1060 : vector<8x1xf32> to vector<8x8xf32>
    %1062 = vector.broadcast %cst_303 : f32 to vector<8x8xf32>
    %1063 = arith.select %1058, %1061, %1062 : vector<8x8xi1>, vector<8x8xf32>
    %1064 = arith.addf %1056, %1063 : vector<8x8xf32>
    %c4_i32_304 = arith.constant 4 : i32
    %1065 = vector.broadcast %c4_i32_304 : i32 to vector<8x8xi32>
    %1066 = arith.cmpi eq, %61, %1065 : vector<8x8xi32>
    %1067 = vector.extract_strided_slice %1033 {offsets = [0, 4], sizes = [8, 1], strides = [1, 1]} : vector<8x15xf32> to vector<8x1xf32>
    %cst_305 = arith.constant 0.000000e+00 : f32
    %1068 = vector.shape_cast %1067 : vector<8x1xf32> to vector<8x1xf32>
    %1069 = vector.broadcast %1068 : vector<8x1xf32> to vector<8x8xf32>
    %1070 = vector.broadcast %cst_305 : f32 to vector<8x8xf32>
    %1071 = arith.select %1066, %1069, %1070 : vector<8x8xi1>, vector<8x8xf32>
    %1072 = arith.addf %1064, %1071 : vector<8x8xf32>
    %c5_i32_306 = arith.constant 5 : i32
    %1073 = vector.broadcast %c5_i32_306 : i32 to vector<8x8xi32>
    %1074 = arith.cmpi eq, %61, %1073 : vector<8x8xi32>
    %1075 = vector.extract_strided_slice %1033 {offsets = [0, 5], sizes = [8, 1], strides = [1, 1]} : vector<8x15xf32> to vector<8x1xf32>
    %cst_307 = arith.constant 0.000000e+00 : f32
    %1076 = vector.shape_cast %1075 : vector<8x1xf32> to vector<8x1xf32>
    %1077 = vector.broadcast %1076 : vector<8x1xf32> to vector<8x8xf32>
    %1078 = vector.broadcast %cst_307 : f32 to vector<8x8xf32>
    %1079 = arith.select %1074, %1077, %1078 : vector<8x8xi1>, vector<8x8xf32>
    %1080 = arith.addf %1072, %1079 : vector<8x8xf32>
    %c6_i32_308 = arith.constant 6 : i32
    %1081 = vector.broadcast %c6_i32_308 : i32 to vector<8x8xi32>
    %1082 = arith.cmpi eq, %61, %1081 : vector<8x8xi32>
    %1083 = vector.extract_strided_slice %1033 {offsets = [0, 6], sizes = [8, 1], strides = [1, 1]} : vector<8x15xf32> to vector<8x1xf32>
    %cst_309 = arith.constant 0.000000e+00 : f32
    %1084 = vector.shape_cast %1083 : vector<8x1xf32> to vector<8x1xf32>
    %1085 = vector.broadcast %1084 : vector<8x1xf32> to vector<8x8xf32>
    %1086 = vector.broadcast %cst_309 : f32 to vector<8x8xf32>
    %1087 = arith.select %1082, %1085, %1086 : vector<8x8xi1>, vector<8x8xf32>
    %1088 = arith.addf %1080, %1087 : vector<8x8xf32>
    %c7_i32_310 = arith.constant 7 : i32
    %1089 = vector.broadcast %c7_i32_310 : i32 to vector<8x8xi32>
    %1090 = arith.cmpi eq, %61, %1089 : vector<8x8xi32>
    %1091 = vector.extract_strided_slice %1033 {offsets = [0, 7], sizes = [8, 1], strides = [1, 1]} : vector<8x15xf32> to vector<8x1xf32>
    %cst_311 = arith.constant 0.000000e+00 : f32
    %1092 = vector.shape_cast %1091 : vector<8x1xf32> to vector<8x1xf32>
    %1093 = vector.broadcast %1092 : vector<8x1xf32> to vector<8x8xf32>
    %1094 = vector.broadcast %cst_311 : f32 to vector<8x8xf32>
    %1095 = arith.select %1090, %1093, %1094 : vector<8x8xi1>, vector<8x8xf32>
    %1096 = arith.addf %1088, %1095 : vector<8x8xf32>
    %c8_i32_312 = arith.constant 8 : i32
    %1097 = vector.broadcast %c8_i32_312 : i32 to vector<8x8xi32>
    %1098 = arith.cmpi eq, %61, %1097 : vector<8x8xi32>
    %1099 = vector.extract_strided_slice %1033 {offsets = [0, 8], sizes = [8, 1], strides = [1, 1]} : vector<8x15xf32> to vector<8x1xf32>
    %cst_313 = arith.constant 0.000000e+00 : f32
    %1100 = vector.shape_cast %1099 : vector<8x1xf32> to vector<8x1xf32>
    %1101 = vector.broadcast %1100 : vector<8x1xf32> to vector<8x8xf32>
    %1102 = vector.broadcast %cst_313 : f32 to vector<8x8xf32>
    %1103 = arith.select %1098, %1101, %1102 : vector<8x8xi1>, vector<8x8xf32>
    %1104 = arith.addf %1096, %1103 : vector<8x8xf32>
    %c9_i32_314 = arith.constant 9 : i32
    %1105 = vector.broadcast %c9_i32_314 : i32 to vector<8x8xi32>
    %1106 = arith.cmpi eq, %61, %1105 : vector<8x8xi32>
    %1107 = vector.extract_strided_slice %1033 {offsets = [0, 9], sizes = [8, 1], strides = [1, 1]} : vector<8x15xf32> to vector<8x1xf32>
    %cst_315 = arith.constant 0.000000e+00 : f32
    %1108 = vector.shape_cast %1107 : vector<8x1xf32> to vector<8x1xf32>
    %1109 = vector.broadcast %1108 : vector<8x1xf32> to vector<8x8xf32>
    %1110 = vector.broadcast %cst_315 : f32 to vector<8x8xf32>
    %1111 = arith.select %1106, %1109, %1110 : vector<8x8xi1>, vector<8x8xf32>
    %1112 = arith.addf %1104, %1111 : vector<8x8xf32>
    %c10_i32_316 = arith.constant 10 : i32
    %1113 = vector.broadcast %c10_i32_316 : i32 to vector<8x8xi32>
    %1114 = arith.cmpi eq, %61, %1113 : vector<8x8xi32>
    %1115 = vector.extract_strided_slice %1033 {offsets = [0, 10], sizes = [8, 1], strides = [1, 1]} : vector<8x15xf32> to vector<8x1xf32>
    %cst_317 = arith.constant 0.000000e+00 : f32
    %1116 = vector.shape_cast %1115 : vector<8x1xf32> to vector<8x1xf32>
    %1117 = vector.broadcast %1116 : vector<8x1xf32> to vector<8x8xf32>
    %1118 = vector.broadcast %cst_317 : f32 to vector<8x8xf32>
    %1119 = arith.select %1114, %1117, %1118 : vector<8x8xi1>, vector<8x8xf32>
    %1120 = arith.addf %1112, %1119 : vector<8x8xf32>
    %c11_i32_318 = arith.constant 11 : i32
    %1121 = vector.broadcast %c11_i32_318 : i32 to vector<8x8xi32>
    %1122 = arith.cmpi eq, %61, %1121 : vector<8x8xi32>
    %1123 = vector.extract_strided_slice %1033 {offsets = [0, 11], sizes = [8, 1], strides = [1, 1]} : vector<8x15xf32> to vector<8x1xf32>
    %cst_319 = arith.constant 0.000000e+00 : f32
    %1124 = vector.shape_cast %1123 : vector<8x1xf32> to vector<8x1xf32>
    %1125 = vector.broadcast %1124 : vector<8x1xf32> to vector<8x8xf32>
    %1126 = vector.broadcast %cst_319 : f32 to vector<8x8xf32>
    %1127 = arith.select %1122, %1125, %1126 : vector<8x8xi1>, vector<8x8xf32>
    %1128 = arith.addf %1120, %1127 : vector<8x8xf32>
    %c12_i32_320 = arith.constant 12 : i32
    %1129 = vector.broadcast %c12_i32_320 : i32 to vector<8x8xi32>
    %1130 = arith.cmpi eq, %61, %1129 : vector<8x8xi32>
    %1131 = vector.extract_strided_slice %1033 {offsets = [0, 12], sizes = [8, 1], strides = [1, 1]} : vector<8x15xf32> to vector<8x1xf32>
    %cst_321 = arith.constant 0.000000e+00 : f32
    %1132 = vector.shape_cast %1131 : vector<8x1xf32> to vector<8x1xf32>
    %1133 = vector.broadcast %1132 : vector<8x1xf32> to vector<8x8xf32>
    %1134 = vector.broadcast %cst_321 : f32 to vector<8x8xf32>
    %1135 = arith.select %1130, %1133, %1134 : vector<8x8xi1>, vector<8x8xf32>
    %1136 = arith.addf %1128, %1135 : vector<8x8xf32>
    %c13_i32_322 = arith.constant 13 : i32
    %1137 = vector.broadcast %c13_i32_322 : i32 to vector<8x8xi32>
    %1138 = arith.cmpi eq, %61, %1137 : vector<8x8xi32>
    %1139 = vector.extract_strided_slice %1033 {offsets = [0, 13], sizes = [8, 1], strides = [1, 1]} : vector<8x15xf32> to vector<8x1xf32>
    %cst_323 = arith.constant 0.000000e+00 : f32
    %1140 = vector.shape_cast %1139 : vector<8x1xf32> to vector<8x1xf32>
    %1141 = vector.broadcast %1140 : vector<8x1xf32> to vector<8x8xf32>
    %1142 = vector.broadcast %cst_323 : f32 to vector<8x8xf32>
    %1143 = arith.select %1138, %1141, %1142 : vector<8x8xi1>, vector<8x8xf32>
    %1144 = arith.addf %1136, %1143 : vector<8x8xf32>
    %c14_i32_324 = arith.constant 14 : i32
    %1145 = vector.broadcast %c14_i32_324 : i32 to vector<8x8xi32>
    %1146 = arith.cmpi eq, %61, %1145 : vector<8x8xi32>
    %1147 = vector.extract_strided_slice %1033 {offsets = [0, 14], sizes = [8, 1], strides = [1, 1]} : vector<8x15xf32> to vector<8x1xf32>
    %cst_325 = arith.constant 0.000000e+00 : f32
    %1148 = vector.shape_cast %1147 : vector<8x1xf32> to vector<8x1xf32>
    %1149 = vector.broadcast %1148 : vector<8x1xf32> to vector<8x8xf32>
    %1150 = vector.broadcast %cst_325 : f32 to vector<8x8xf32>
    %1151 = arith.select %1146, %1149, %1150 : vector<8x8xi1>, vector<8x8xf32>
    %1152 = arith.addf %1144, %1151 : vector<8x8xf32>
    %1153 = arith.addf %1032, %1152 : vector<8x8xf32>
    %cst_326 = arith.constant 0.176776692 : f32
    %1154 = vector.broadcast %cst_326 : f32 to vector<8x8xf32>
    %1155 = arith.mulf %1153, %1154 : vector<8x8xf32>
    %cst_327 = arith.constant dense<0xFF800000> : vector<8xf32>
    %1156 = vector.multi_reduction <maximumf>, %1155, %cst_327 [1] : vector<8x8xf32> to vector<8xf32>
    %1157 = vector.shape_cast %1156 : vector<8xf32> to vector<8x1xf32>
    %1158 = vector.broadcast %1157 : vector<8x1xf32> to vector<8x8xf32>
    %1159 = arith.subf %1155, %1158 : vector<8x8xf32>
    %1160 = math.exp %1159 : vector<8x8xf32>
    %cst_328 = arith.constant dense<0.000000e+00> : vector<8xf32>
    %1161 = vector.multi_reduction <add>, %1160, %cst_328 [1] : vector<8x8xf32> to vector<8xf32>
    %1162 = vector.shape_cast %1161 : vector<8xf32> to vector<8x1xf32>
    %1163 = tpu.reciprocal %1162 {approx = true} : vector<8x1xf32> -> vector<8x1xf32>
    %1164 = vector.broadcast %1163 : vector<8x1xf32> to vector<8x8xf32>
    %1165 = arith.mulf %1160, %1164 : vector<8x8xf32>
    %cst_329 = arith.constant dense<0.000000e+00> : vector<8x32xf32>
    %1166 = tpu.matmul %1165, %1030, %cst_329 {dimension_numbers = #tpu.dot_dimension_numbers<[1], [0], [0], [1], [0, 0, 1, 1], [], []>} : vector<8x8xf32>, vector<8x32xf32>, vector<8x32xf32> -> vector<8x32xf32>
    %1167 = vector.extract_strided_slice %744 {offsets = [64, 0], sizes = [32, 128], strides = [1, 1]} : vector<128x128xf32> to vector<32x128xf32>
    %cst_330 = arith.constant dense<0.000000e+00> : vector<8x128xf32>
    %1168 = tpu.matmul %1166, %1167, %cst_330 {dimension_numbers = #tpu.dot_dimension_numbers<[1], [0], [0], [1], [0, 0, 1, 1], [], []>} : vector<8x32xf32>, vector<32x128xf32>, vector<8x128xf32> -> vector<8x128xf32>
    %1169 = arith.addf %1027, %1168 : vector<8x128xf32>
    %1170 = vector.extract_strided_slice %742 {offsets = [0, 96], sizes = [8, 32], strides = [1, 1]} : vector<8x384xf32> to vector<8x32xf32>
    %1171 = vector.extract_strided_slice %742 {offsets = [0, 224], sizes = [8, 32], strides = [1, 1]} : vector<8x384xf32> to vector<8x32xf32>
    %1172 = vector.extract_strided_slice %742 {offsets = [0, 352], sizes = [8, 32], strides = [1, 1]} : vector<8x384xf32> to vector<8x32xf32>
    %1173 = tpu.transpose %1171, [1, 0] : vector<8x32xf32> -> vector<32x8xf32>
    %cst_331 = arith.constant dense<0.000000e+00> : vector<8x8xf32>
    %1174 = tpu.matmul %1170, %1173, %cst_331 {dimension_numbers = #tpu.dot_dimension_numbers<[1], [0], [0], [1], [0, 0, 1, 1], [], []>} : vector<8x32xf32>, vector<32x8xf32>, vector<8x8xf32> -> vector<8x8xf32>
    %cst_332 = arith.constant dense<0.000000e+00> : vector<8x15xf32>
    %1175 = tpu.matmul %1170, %56, %cst_332 {dimension_numbers = #tpu.dot_dimension_numbers<[1], [0], [0], [1], [0, 0, 1, 1], [], []>} : vector<8x32xf32>, vector<32x15xf32>, vector<8x15xf32> -> vector<8x15xf32>
    %c0_i32_333 = arith.constant 0 : i32
    %1176 = vector.broadcast %c0_i32_333 : i32 to vector<8x8xi32>
    %1177 = arith.cmpi eq, %61, %1176 : vector<8x8xi32>
    %1178 = vector.extract_strided_slice %1175 {offsets = [0, 0], sizes = [8, 1], strides = [1, 1]} : vector<8x15xf32> to vector<8x1xf32>
    %cst_334 = arith.constant 0.000000e+00 : f32
    %1179 = vector.shape_cast %1178 : vector<8x1xf32> to vector<8x1xf32>
    %1180 = vector.broadcast %1179 : vector<8x1xf32> to vector<8x8xf32>
    %1181 = vector.broadcast %cst_334 : f32 to vector<8x8xf32>
    %1182 = arith.select %1177, %1180, %1181 : vector<8x8xi1>, vector<8x8xf32>
    %c1_i32_335 = arith.constant 1 : i32
    %1183 = vector.broadcast %c1_i32_335 : i32 to vector<8x8xi32>
    %1184 = arith.cmpi eq, %61, %1183 : vector<8x8xi32>
    %1185 = vector.extract_strided_slice %1175 {offsets = [0, 1], sizes = [8, 1], strides = [1, 1]} : vector<8x15xf32> to vector<8x1xf32>
    %cst_336 = arith.constant 0.000000e+00 : f32
    %1186 = vector.shape_cast %1185 : vector<8x1xf32> to vector<8x1xf32>
    %1187 = vector.broadcast %1186 : vector<8x1xf32> to vector<8x8xf32>
    %1188 = vector.broadcast %cst_336 : f32 to vector<8x8xf32>
    %1189 = arith.select %1184, %1187, %1188 : vector<8x8xi1>, vector<8x8xf32>
    %1190 = arith.addf %1182, %1189 : vector<8x8xf32>
    %c2_i32_337 = arith.constant 2 : i32
    %1191 = vector.broadcast %c2_i32_337 : i32 to vector<8x8xi32>
    %1192 = arith.cmpi eq, %61, %1191 : vector<8x8xi32>
    %1193 = vector.extract_strided_slice %1175 {offsets = [0, 2], sizes = [8, 1], strides = [1, 1]} : vector<8x15xf32> to vector<8x1xf32>
    %cst_338 = arith.constant 0.000000e+00 : f32
    %1194 = vector.shape_cast %1193 : vector<8x1xf32> to vector<8x1xf32>
    %1195 = vector.broadcast %1194 : vector<8x1xf32> to vector<8x8xf32>
    %1196 = vector.broadcast %cst_338 : f32 to vector<8x8xf32>
    %1197 = arith.select %1192, %1195, %1196 : vector<8x8xi1>, vector<8x8xf32>
    %1198 = arith.addf %1190, %1197 : vector<8x8xf32>
    %c3_i32_339 = arith.constant 3 : i32
    %1199 = vector.broadcast %c3_i32_339 : i32 to vector<8x8xi32>
    %1200 = arith.cmpi eq, %61, %1199 : vector<8x8xi32>
    %1201 = vector.extract_strided_slice %1175 {offsets = [0, 3], sizes = [8, 1], strides = [1, 1]} : vector<8x15xf32> to vector<8x1xf32>
    %cst_340 = arith.constant 0.000000e+00 : f32
    %1202 = vector.shape_cast %1201 : vector<8x1xf32> to vector<8x1xf32>
    %1203 = vector.broadcast %1202 : vector<8x1xf32> to vector<8x8xf32>
    %1204 = vector.broadcast %cst_340 : f32 to vector<8x8xf32>
    %1205 = arith.select %1200, %1203, %1204 : vector<8x8xi1>, vector<8x8xf32>
    %1206 = arith.addf %1198, %1205 : vector<8x8xf32>
    %c4_i32_341 = arith.constant 4 : i32
    %1207 = vector.broadcast %c4_i32_341 : i32 to vector<8x8xi32>
    %1208 = arith.cmpi eq, %61, %1207 : vector<8x8xi32>
    %1209 = vector.extract_strided_slice %1175 {offsets = [0, 4], sizes = [8, 1], strides = [1, 1]} : vector<8x15xf32> to vector<8x1xf32>
    %cst_342 = arith.constant 0.000000e+00 : f32
    %1210 = vector.shape_cast %1209 : vector<8x1xf32> to vector<8x1xf32>
    %1211 = vector.broadcast %1210 : vector<8x1xf32> to vector<8x8xf32>
    %1212 = vector.broadcast %cst_342 : f32 to vector<8x8xf32>
    %1213 = arith.select %1208, %1211, %1212 : vector<8x8xi1>, vector<8x8xf32>
    %1214 = arith.addf %1206, %1213 : vector<8x8xf32>
    %c5_i32_343 = arith.constant 5 : i32
    %1215 = vector.broadcast %c5_i32_343 : i32 to vector<8x8xi32>
    %1216 = arith.cmpi eq, %61, %1215 : vector<8x8xi32>
    %1217 = vector.extract_strided_slice %1175 {offsets = [0, 5], sizes = [8, 1], strides = [1, 1]} : vector<8x15xf32> to vector<8x1xf32>
    %cst_344 = arith.constant 0.000000e+00 : f32
    %1218 = vector.shape_cast %1217 : vector<8x1xf32> to vector<8x1xf32>
    %1219 = vector.broadcast %1218 : vector<8x1xf32> to vector<8x8xf32>
    %1220 = vector.broadcast %cst_344 : f32 to vector<8x8xf32>
    %1221 = arith.select %1216, %1219, %1220 : vector<8x8xi1>, vector<8x8xf32>
    %1222 = arith.addf %1214, %1221 : vector<8x8xf32>
    %c6_i32_345 = arith.constant 6 : i32
    %1223 = vector.broadcast %c6_i32_345 : i32 to vector<8x8xi32>
    %1224 = arith.cmpi eq, %61, %1223 : vector<8x8xi32>
    %1225 = vector.extract_strided_slice %1175 {offsets = [0, 6], sizes = [8, 1], strides = [1, 1]} : vector<8x15xf32> to vector<8x1xf32>
    %cst_346 = arith.constant 0.000000e+00 : f32
    %1226 = vector.shape_cast %1225 : vector<8x1xf32> to vector<8x1xf32>
    %1227 = vector.broadcast %1226 : vector<8x1xf32> to vector<8x8xf32>
    %1228 = vector.broadcast %cst_346 : f32 to vector<8x8xf32>
    %1229 = arith.select %1224, %1227, %1228 : vector<8x8xi1>, vector<8x8xf32>
    %1230 = arith.addf %1222, %1229 : vector<8x8xf32>
    %c7_i32_347 = arith.constant 7 : i32
    %1231 = vector.broadcast %c7_i32_347 : i32 to vector<8x8xi32>
    %1232 = arith.cmpi eq, %61, %1231 : vector<8x8xi32>
    %1233 = vector.extract_strided_slice %1175 {offsets = [0, 7], sizes = [8, 1], strides = [1, 1]} : vector<8x15xf32> to vector<8x1xf32>
    %cst_348 = arith.constant 0.000000e+00 : f32
    %1234 = vector.shape_cast %1233 : vector<8x1xf32> to vector<8x1xf32>
    %1235 = vector.broadcast %1234 : vector<8x1xf32> to vector<8x8xf32>
    %1236 = vector.broadcast %cst_348 : f32 to vector<8x8xf32>
    %1237 = arith.select %1232, %1235, %1236 : vector<8x8xi1>, vector<8x8xf32>
    %1238 = arith.addf %1230, %1237 : vector<8x8xf32>
    %c8_i32_349 = arith.constant 8 : i32
    %1239 = vector.broadcast %c8_i32_349 : i32 to vector<8x8xi32>
    %1240 = arith.cmpi eq, %61, %1239 : vector<8x8xi32>
    %1241 = vector.extract_strided_slice %1175 {offsets = [0, 8], sizes = [8, 1], strides = [1, 1]} : vector<8x15xf32> to vector<8x1xf32>
    %cst_350 = arith.constant 0.000000e+00 : f32
    %1242 = vector.shape_cast %1241 : vector<8x1xf32> to vector<8x1xf32>
    %1243 = vector.broadcast %1242 : vector<8x1xf32> to vector<8x8xf32>
    %1244 = vector.broadcast %cst_350 : f32 to vector<8x8xf32>
    %1245 = arith.select %1240, %1243, %1244 : vector<8x8xi1>, vector<8x8xf32>
    %1246 = arith.addf %1238, %1245 : vector<8x8xf32>
    %c9_i32_351 = arith.constant 9 : i32
    %1247 = vector.broadcast %c9_i32_351 : i32 to vector<8x8xi32>
    %1248 = arith.cmpi eq, %61, %1247 : vector<8x8xi32>
    %1249 = vector.extract_strided_slice %1175 {offsets = [0, 9], sizes = [8, 1], strides = [1, 1]} : vector<8x15xf32> to vector<8x1xf32>
    %cst_352 = arith.constant 0.000000e+00 : f32
    %1250 = vector.shape_cast %1249 : vector<8x1xf32> to vector<8x1xf32>
    %1251 = vector.broadcast %1250 : vector<8x1xf32> to vector<8x8xf32>
    %1252 = vector.broadcast %cst_352 : f32 to vector<8x8xf32>
    %1253 = arith.select %1248, %1251, %1252 : vector<8x8xi1>, vector<8x8xf32>
    %1254 = arith.addf %1246, %1253 : vector<8x8xf32>
    %c10_i32_353 = arith.constant 10 : i32
    %1255 = vector.broadcast %c10_i32_353 : i32 to vector<8x8xi32>
    %1256 = arith.cmpi eq, %61, %1255 : vector<8x8xi32>
    %1257 = vector.extract_strided_slice %1175 {offsets = [0, 10], sizes = [8, 1], strides = [1, 1]} : vector<8x15xf32> to vector<8x1xf32>
    %cst_354 = arith.constant 0.000000e+00 : f32
    %1258 = vector.shape_cast %1257 : vector<8x1xf32> to vector<8x1xf32>
    %1259 = vector.broadcast %1258 : vector<8x1xf32> to vector<8x8xf32>
    %1260 = vector.broadcast %cst_354 : f32 to vector<8x8xf32>
    %1261 = arith.select %1256, %1259, %1260 : vector<8x8xi1>, vector<8x8xf32>
    %1262 = arith.addf %1254, %1261 : vector<8x8xf32>
    %c11_i32_355 = arith.constant 11 : i32
    %1263 = vector.broadcast %c11_i32_355 : i32 to vector<8x8xi32>
    %1264 = arith.cmpi eq, %61, %1263 : vector<8x8xi32>
    %1265 = vector.extract_strided_slice %1175 {offsets = [0, 11], sizes = [8, 1], strides = [1, 1]} : vector<8x15xf32> to vector<8x1xf32>
    %cst_356 = arith.constant 0.000000e+00 : f32
    %1266 = vector.shape_cast %1265 : vector<8x1xf32> to vector<8x1xf32>
    %1267 = vector.broadcast %1266 : vector<8x1xf32> to vector<8x8xf32>
    %1268 = vector.broadcast %cst_356 : f32 to vector<8x8xf32>
    %1269 = arith.select %1264, %1267, %1268 : vector<8x8xi1>, vector<8x8xf32>
    %1270 = arith.addf %1262, %1269 : vector<8x8xf32>
    %c12_i32_357 = arith.constant 12 : i32
    %1271 = vector.broadcast %c12_i32_357 : i32 to vector<8x8xi32>
    %1272 = arith.cmpi eq, %61, %1271 : vector<8x8xi32>
    %1273 = vector.extract_strided_slice %1175 {offsets = [0, 12], sizes = [8, 1], strides = [1, 1]} : vector<8x15xf32> to vector<8x1xf32>
    %cst_358 = arith.constant 0.000000e+00 : f32
    %1274 = vector.shape_cast %1273 : vector<8x1xf32> to vector<8x1xf32>
    %1275 = vector.broadcast %1274 : vector<8x1xf32> to vector<8x8xf32>
    %1276 = vector.broadcast %cst_358 : f32 to vector<8x8xf32>
    %1277 = arith.select %1272, %1275, %1276 : vector<8x8xi1>, vector<8x8xf32>
    %1278 = arith.addf %1270, %1277 : vector<8x8xf32>
    %c13_i32_359 = arith.constant 13 : i32
    %1279 = vector.broadcast %c13_i32_359 : i32 to vector<8x8xi32>
    %1280 = arith.cmpi eq, %61, %1279 : vector<8x8xi32>
    %1281 = vector.extract_strided_slice %1175 {offsets = [0, 13], sizes = [8, 1], strides = [1, 1]} : vector<8x15xf32> to vector<8x1xf32>
    %cst_360 = arith.constant 0.000000e+00 : f32
    %1282 = vector.shape_cast %1281 : vector<8x1xf32> to vector<8x1xf32>
    %1283 = vector.broadcast %1282 : vector<8x1xf32> to vector<8x8xf32>
    %1284 = vector.broadcast %cst_360 : f32 to vector<8x8xf32>
    %1285 = arith.select %1280, %1283, %1284 : vector<8x8xi1>, vector<8x8xf32>
    %1286 = arith.addf %1278, %1285 : vector<8x8xf32>
    %c14_i32_361 = arith.constant 14 : i32
    %1287 = vector.broadcast %c14_i32_361 : i32 to vector<8x8xi32>
    %1288 = arith.cmpi eq, %61, %1287 : vector<8x8xi32>
    %1289 = vector.extract_strided_slice %1175 {offsets = [0, 14], sizes = [8, 1], strides = [1, 1]} : vector<8x15xf32> to vector<8x1xf32>
    %cst_362 = arith.constant 0.000000e+00 : f32
    %1290 = vector.shape_cast %1289 : vector<8x1xf32> to vector<8x1xf32>
    %1291 = vector.broadcast %1290 : vector<8x1xf32> to vector<8x8xf32>
    %1292 = vector.broadcast %cst_362 : f32 to vector<8x8xf32>
    %1293 = arith.select %1288, %1291, %1292 : vector<8x8xi1>, vector<8x8xf32>
    %1294 = arith.addf %1286, %1293 : vector<8x8xf32>
    %1295 = arith.addf %1174, %1294 : vector<8x8xf32>
    %cst_363 = arith.constant 0.176776692 : f32
    %1296 = vector.broadcast %cst_363 : f32 to vector<8x8xf32>
    %1297 = arith.mulf %1295, %1296 : vector<8x8xf32>
    %cst_364 = arith.constant dense<0xFF800000> : vector<8xf32>
    %1298 = vector.multi_reduction <maximumf>, %1297, %cst_364 [1] : vector<8x8xf32> to vector<8xf32>
    %1299 = vector.shape_cast %1298 : vector<8xf32> to vector<8x1xf32>
    %1300 = vector.broadcast %1299 : vector<8x1xf32> to vector<8x8xf32>
    %1301 = arith.subf %1297, %1300 : vector<8x8xf32>
    %1302 = math.exp %1301 : vector<8x8xf32>
    %cst_365 = arith.constant dense<0.000000e+00> : vector<8xf32>
    %1303 = vector.multi_reduction <add>, %1302, %cst_365 [1] : vector<8x8xf32> to vector<8xf32>
    %1304 = vector.shape_cast %1303 : vector<8xf32> to vector<8x1xf32>
    %1305 = tpu.reciprocal %1304 {approx = true} : vector<8x1xf32> -> vector<8x1xf32>
    %1306 = vector.broadcast %1305 : vector<8x1xf32> to vector<8x8xf32>
    %1307 = arith.mulf %1302, %1306 : vector<8x8xf32>
    %cst_366 = arith.constant dense<0.000000e+00> : vector<8x32xf32>
    %1308 = tpu.matmul %1307, %1172, %cst_366 {dimension_numbers = #tpu.dot_dimension_numbers<[1], [0], [0], [1], [0, 0, 1, 1], [], []>} : vector<8x8xf32>, vector<8x32xf32>, vector<8x32xf32> -> vector<8x32xf32>
    %1309 = vector.extract_strided_slice %744 {offsets = [96, 0], sizes = [32, 128], strides = [1, 1]} : vector<128x128xf32> to vector<32x128xf32>
    %cst_367 = arith.constant dense<0.000000e+00> : vector<8x128xf32>
    %1310 = tpu.matmul %1308, %1309, %cst_367 {dimension_numbers = #tpu.dot_dimension_numbers<[1], [0], [0], [1], [0, 0, 1, 1], [], []>} : vector<8x32xf32>, vector<32x128xf32>, vector<8x128xf32> -> vector<8x128xf32>
    %1311 = arith.addf %1169, %1310 : vector<8x128xf32>
    %1312 = arith.addf %711, %1311 : vector<8x128xf32>
    %c1_368 = arith.constant 1 : index
    %c0_369 = arith.constant 0 : index
    %c0_370 = arith.constant 0 : index
    %1313 = vector.load %arg18[%c1_368, %c0_369, %c0_370] : memref<2x1x128xf32, #tpu.memory_space<vmem>>, vector<1x1x128xf32>
    %1314 = vector.shape_cast %1313 : vector<1x1x128xf32> to vector<1x128xf32>
    %1315 = vector.broadcast %1314 : vector<1x128xf32> to vector<8x128xf32>
    %1316 = arith.addf %1312, %1315 : vector<8x128xf32>
    %cst_371 = arith.constant dense<0.000000e+00> : vector<8xf32>
    %1317 = vector.multi_reduction <add>, %1316, %cst_371 [1] : vector<8x128xf32> to vector<8xf32>
    %1318 = vector.shape_cast %1317 : vector<8xf32> to vector<8x1xf32>
    %cst_372 = arith.constant 1.280000e+02 : f32
    %1319 = vector.broadcast %cst_372 : f32 to vector<8x1xf32>
    %1320 = arith.divf %1318, %1319 : vector<8x1xf32>
    %1321 = vector.broadcast %1320 : vector<8x1xf32> to vector<8x128xf32>
    %1322 = arith.subf %1316, %1321 : vector<8x128xf32>
    %1323 = vector.broadcast %1320 : vector<8x1xf32> to vector<8x128xf32>
    %1324 = arith.subf %1316, %1323 : vector<8x128xf32>
    %1325 = arith.mulf %1322, %1324 : vector<8x128xf32>
    %cst_373 = arith.constant dense<0.000000e+00> : vector<8xf32>
    %1326 = vector.multi_reduction <add>, %1325, %cst_373 [1] : vector<8x128xf32> to vector<8xf32>
    %1327 = vector.shape_cast %1326 : vector<8xf32> to vector<8x1xf32>
    %cst_374 = arith.constant 1.280000e+02 : f32
    %1328 = vector.broadcast %cst_374 : f32 to vector<8x1xf32>
    %1329 = arith.divf %1327, %1328 : vector<8x1xf32>
    %1330 = vector.broadcast %1320 : vector<8x1xf32> to vector<8x128xf32>
    %1331 = arith.subf %1316, %1330 : vector<8x128xf32>
    %cst_375 = arith.constant 9.99999974E-6 : f32
    %1332 = vector.broadcast %cst_375 : f32 to vector<8x1xf32>
    %1333 = arith.addf %1329, %1332 : vector<8x1xf32>
    %1334 = math.rsqrt %1333 : vector<8x1xf32>
    %1335 = vector.broadcast %1334 : vector<8x1xf32> to vector<8x128xf32>
    %1336 = arith.mulf %1331, %1335 : vector<8x128xf32>
    %1337 = vector.broadcast %1 : vector<1x128xf32> to vector<8x128xf32>
    %1338 = arith.mulf %1336, %1337 : vector<8x128xf32>
    %1339 = vector.broadcast %2 : vector<1x128xf32> to vector<8x128xf32>
    %1340 = arith.addf %1338, %1339 : vector<8x128xf32>
    %c1_376 = arith.constant 1 : index
    %c0_377 = arith.constant 0 : index
    %c0_378 = arith.constant 0 : index
    %1341 = vector.load %arg19[%c1_376, %c0_377, %c0_378] : memref<2x128x256xf32, #tpu.memory_space<vmem>>, vector<1x128x256xf32>
    %1342 = vector.shape_cast %1341 : vector<1x128x256xf32> to vector<128x256xf32>
    %cst_379 = arith.constant dense<0.000000e+00> : vector<8x256xf32>
    %1343 = tpu.matmul %1340, %1342, %cst_379 {dimension_numbers = #tpu.dot_dimension_numbers<[1], [0], [0], [1], [0, 0, 1, 1], [], []>} : vector<8x128xf32>, vector<128x256xf32>, vector<8x256xf32> -> vector<8x256xf32>
    %c1_380 = arith.constant 1 : index
    %c0_381 = arith.constant 0 : index
    %c0_382 = arith.constant 0 : index
    %1344 = vector.load %arg20[%c1_380, %c0_381, %c0_382] : memref<2x1x256xf32, #tpu.memory_space<vmem>>, vector<1x1x256xf32>
    %1345 = vector.shape_cast %1344 : vector<1x1x256xf32> to vector<1x256xf32>
    %1346 = vector.broadcast %1345 : vector<1x256xf32> to vector<8x256xf32>
    %1347 = arith.addf %1343, %1346 : vector<8x256xf32>
    %1348 = vector.extract_strided_slice %0 {offsets = [0, 5], sizes = [1, 1], strides = [1, 1]} : vector<1x6xf32> to vector<1x1xf32>
    %cst_383 = arith.constant 0.000000e+00 : f32
    %1349 = vector.broadcast %cst_383 : f32 to vector<8x256xf32>
    %1350 = arith.cmpf oge, %1347, %1349 : vector<8x256xf32>
    %1351 = vector.broadcast %1348 : vector<1x1xf32> to vector<8x256xf32>
    %1352 = arith.mulf %1351, %1347 : vector<8x256xf32>
    %1353 = arith.select %1350, %1347, %1352 : vector<8x256xi1>, vector<8x256xf32>
    %c1_384 = arith.constant 1 : index
    %c0_385 = arith.constant 0 : index
    %c0_386 = arith.constant 0 : index
    %1354 = vector.load %arg21[%c1_384, %c0_385, %c0_386] : memref<2x256x128xf32, #tpu.memory_space<vmem>>, vector<1x256x128xf32>
    %1355 = vector.shape_cast %1354 : vector<1x256x128xf32> to vector<256x128xf32>
    %cst_387 = arith.constant dense<0.000000e+00> : vector<8x128xf32>
    %1356 = tpu.matmul %1353, %1355, %cst_387 {dimension_numbers = #tpu.dot_dimension_numbers<[1], [0], [0], [1], [0, 0, 1, 1], [], []>} : vector<8x256xf32>, vector<256x128xf32>, vector<8x128xf32> -> vector<8x128xf32>
    %c1_388 = arith.constant 1 : index
    %c0_389 = arith.constant 0 : index
    %c0_390 = arith.constant 0 : index
    %1357 = vector.load %arg22[%c1_388, %c0_389, %c0_390] : memref<2x1x128xf32, #tpu.memory_space<vmem>>, vector<1x1x128xf32>
    %1358 = vector.shape_cast %1357 : vector<1x1x128xf32> to vector<1x128xf32>
    %1359 = vector.broadcast %1358 : vector<1x128xf32> to vector<8x128xf32>
    %1360 = arith.addf %1356, %1359 : vector<8x128xf32>
    %1361 = arith.addf %1316, %1360 : vector<8x128xf32>
    %c0_391 = arith.constant 0 : index
    %c0_392 = arith.constant 0 : index
    %1362 = vector.load %arg23[%c0_391, %c0_392] : memref<128x128xf32, #tpu.memory_space<vmem>>, vector<128x128xf32>
    %cst_393 = arith.constant dense<0.000000e+00> : vector<8x128xf32>
    %1363 = tpu.matmul %1361, %1362, %cst_393 {dimension_numbers = #tpu.dot_dimension_numbers<[1], [0], [0], [1], [0, 0, 1, 1], [], []>} : vector<8x128xf32>, vector<128x128xf32>, vector<8x128xf32> -> vector<8x128xf32>
    %c0_394 = arith.constant 0 : index
    %c0_395 = arith.constant 0 : index
    %1364 = vector.load %arg24[%c0_394, %c0_395] : memref<1x128xf32, #tpu.memory_space<vmem>>, vector<1x128xf32>
    %1365 = vector.broadcast %1364 : vector<1x128xf32> to vector<8x128xf32>
    %1366 = arith.addf %1363, %1365 : vector<8x128xf32>
    %1367 = vector.extract_strided_slice %0 {offsets = [0, 3], sizes = [1, 1], strides = [1, 1]} : vector<1x6xf32> to vector<1x1xf32>
    %cst_396 = arith.constant 0.000000e+00 : f32
    %1368 = vector.broadcast %cst_396 : f32 to vector<8x128xf32>
    %1369 = arith.cmpf oge, %1366, %1368 : vector<8x128xf32>
    %1370 = vector.broadcast %1367 : vector<1x1xf32> to vector<8x128xf32>
    %1371 = arith.mulf %1370, %1366 : vector<8x128xf32>
    %1372 = arith.select %1369, %1366, %1371 : vector<8x128xi1>, vector<8x128xf32>
    %c0_397 = arith.constant 0 : index
    %c0_398 = arith.constant 0 : index
    %1373 = vector.load %arg25[%c0_397, %c0_398] : memref<128x10xf32, #tpu.memory_space<vmem>>, vector<128x10xf32>
    %cst_399 = arith.constant dense<0.000000e+00> : vector<8x10xf32>
    %1374 = tpu.matmul %1372, %1373, %cst_399 {dimension_numbers = #tpu.dot_dimension_numbers<[1], [0], [0], [1], [0, 0, 1, 1], [], []>} : vector<8x128xf32>, vector<128x10xf32>, vector<8x10xf32> -> vector<8x10xf32>
    %c0_400 = arith.constant 0 : index
    %c0_401 = arith.constant 0 : index
    %1375 = vector.load %arg26[%c0_400, %c0_401] : memref<1x10xf32, #tpu.memory_space<vmem>>, vector<1x10xf32>
    %1376 = vector.broadcast %1375 : vector<1x10xf32> to vector<8x10xf32>
    %1377 = arith.addf %1374, %1376 : vector<8x10xf32>
    %c0_402 = arith.constant 0 : index
    %c0_403 = arith.constant 0 : index
    %c0_404 = arith.constant 0 : index
    %1378 = vector.load %arg27[%c0_402, %c0_403, %c0_404] : memref<1x8x10xf32, #tpu.memory_space<vmem>>, vector<1x8x10xf32>
    %1379 = vector.shape_cast %1378 : vector<1x8x10xf32> to vector<8x10xf32>
    %1380 = vector.shape_cast %1377 : vector<8x10xf32> to vector<1x8x10xf32>
    tpu.vector_store %arg27[%c0_402, %c0_403, %c0_404], %1380 {strides = array<i32>} : memref<1x8x10xf32, #tpu.memory_space<vmem>>, vector<1x8x10xf32>,
    return
  }
  func.func @transform_0(%arg0: i32) -> (i32, i32, i32) {
    %c0_i32 = arith.constant 0 : i32
    %c0_i32_0 = arith.constant 0 : i32
    %c0_i32_1 = arith.constant 0 : i32
    return %arg0, %c0_i32, %c0_i32_0 : i32, i32, i32
  }
  func.func @transform_1(%arg0: i32) -> (i32, i32, i32) {
    %c0_i32 = arith.constant 0 : i32
    %c0_i32_0 = arith.constant 0 : i32
    %c0_i32_1 = arith.constant 0 : i32
    return %arg0, %c0_i32, %c0_i32_0 : i32, i32, i32
  }
  func.func @transform_2(%arg0: i32) -> (i32, i32) {
    %c0_i32 = arith.constant 0 : i32
    %c0_i32_0 = arith.constant 0 : i32
    %c0_i32_1 = arith.constant 0 : i32
    return %c0_i32, %c0_i32_0 : i32, i32
  }
  func.func @transform_3(%arg0: i32) -> (i32, i32) {
    %c0_i32 = arith.constant 0 : i32
    %c0_i32_0 = arith.constant 0 : i32
    %c0_i32_1 = arith.constant 0 : i32
    return %c0_i32, %c0_i32_0 : i32, i32
  }
  func.func @transform_4(%arg0: i32) -> (i32, i32) {
    %c0_i32 = arith.constant 0 : i32
    %c0_i32_0 = arith.constant 0 : i32
    %c0_i32_1 = arith.constant 0 : i32
    return %c0_i32, %c0_i32_0 : i32, i32
  }
  func.func @transform_5(%arg0: i32) -> (i32, i32) {
    %c0_i32 = arith.constant 0 : i32
    %c0_i32_0 = arith.constant 0 : i32
    %c0_i32_1 = arith.constant 0 : i32
    return %c0_i32, %c0_i32_0 : i32, i32
  }
  func.func @transform_6(%arg0: i32) -> (i32, i32) {
    %c0_i32 = arith.constant 0 : i32
    %c0_i32_0 = arith.constant 0 : i32
    %c0_i32_1 = arith.constant 0 : i32
    return %c0_i32, %c0_i32_0 : i32, i32
  }
  func.func @transform_7(%arg0: i32) -> (i32, i32) {
    %c0_i32 = arith.constant 0 : i32
    %c0_i32_0 = arith.constant 0 : i32
    %c0_i32_1 = arith.constant 0 : i32
    return %c0_i32, %c0_i32_0 : i32, i32
  }
  func.func @transform_8(%arg0: i32) -> (i32, i32) {
    %c0_i32 = arith.constant 0 : i32
    %c0_i32_0 = arith.constant 0 : i32
    %c0_i32_1 = arith.constant 0 : i32
    return %c0_i32, %c0_i32_0 : i32, i32
  }
  func.func @transform_9(%arg0: i32) -> (i32, i32) {
    %c0_i32 = arith.constant 0 : i32
    %c0_i32_0 = arith.constant 0 : i32
    %c0_i32_1 = arith.constant 0 : i32
    return %c0_i32, %c0_i32_0 : i32, i32
  }
  func.func @transform_10(%arg0: i32) -> (i32, i32) {
    %c0_i32 = arith.constant 0 : i32
    %c0_i32_0 = arith.constant 0 : i32
    %c0_i32_1 = arith.constant 0 : i32
    return %c0_i32, %c0_i32_0 : i32, i32
  }
  func.func @transform_11(%arg0: i32) -> (i32, i32) {
    %c0_i32 = arith.constant 0 : i32
    %c0_i32_0 = arith.constant 0 : i32
    %c0_i32_1 = arith.constant 0 : i32
    return %c0_i32, %c0_i32_0 : i32, i32
  }
  func.func @transform_12(%arg0: i32) -> (i32, i32) {
    %c0_i32 = arith.constant 0 : i32
    %c0_i32_0 = arith.constant 0 : i32
    %c0_i32_1 = arith.constant 0 : i32
    return %c0_i32, %c0_i32_0 : i32, i32
  }
  func.func @transform_13(%arg0: i32) -> (i32, i32) {
    %c0_i32 = arith.constant 0 : i32
    %c0_i32_0 = arith.constant 0 : i32
    %c0_i32_1 = arith.constant 0 : i32
    return %c0_i32, %c0_i32_0 : i32, i32
  }
  func.func @transform_14(%arg0: i32) -> (i32, i32, i32) {
    %c0_i32 = arith.constant 0 : i32
    %c0_i32_0 = arith.constant 0 : i32
    %c0_i32_1 = arith.constant 0 : i32
    %c0_i32_2 = arith.constant 0 : i32
    return %c0_i32, %c0_i32_0, %c0_i32_1 : i32, i32, i32
  }
  func.func @transform_15(%arg0: i32) -> (i32, i32, i32) {
    %c0_i32 = arith.constant 0 : i32
    %c0_i32_0 = arith.constant 0 : i32
    %c0_i32_1 = arith.constant 0 : i32
    %c0_i32_2 = arith.constant 0 : i32
    return %c0_i32, %c0_i32_0, %c0_i32_1 : i32, i32, i32
  }
  func.func @transform_16(%arg0: i32) -> (i32, i32, i32) {
    %c0_i32 = arith.constant 0 : i32
    %c0_i32_0 = arith.constant 0 : i32
    %c0_i32_1 = arith.constant 0 : i32
    %c0_i32_2 = arith.constant 0 : i32
    return %c0_i32, %c0_i32_0, %c0_i32_1 : i32, i32, i32
  }
  func.func @transform_17(%arg0: i32) -> (i32, i32, i32) {
    %c0_i32 = arith.constant 0 : i32
    %c0_i32_0 = arith.constant 0 : i32
    %c0_i32_1 = arith.constant 0 : i32
    %c0_i32_2 = arith.constant 0 : i32
    return %c0_i32, %c0_i32_0, %c0_i32_1 : i32, i32, i32
  }
  func.func @transform_18(%arg0: i32) -> (i32, i32, i32) {
    %c0_i32 = arith.constant 0 : i32
    %c0_i32_0 = arith.constant 0 : i32
    %c0_i32_1 = arith.constant 0 : i32
    %c0_i32_2 = arith.constant 0 : i32
    return %c0_i32, %c0_i32_0, %c0_i32_1 : i32, i32, i32
  }
  func.func @transform_19(%arg0: i32) -> (i32, i32, i32) {
    %c0_i32 = arith.constant 0 : i32
    %c0_i32_0 = arith.constant 0 : i32
    %c0_i32_1 = arith.constant 0 : i32
    %c0_i32_2 = arith.constant 0 : i32
    return %c0_i32, %c0_i32_0, %c0_i32_1 : i32, i32, i32
  }
  func.func @transform_20(%arg0: i32) -> (i32, i32, i32) {
    %c0_i32 = arith.constant 0 : i32
    %c0_i32_0 = arith.constant 0 : i32
    %c0_i32_1 = arith.constant 0 : i32
    %c0_i32_2 = arith.constant 0 : i32
    return %c0_i32, %c0_i32_0, %c0_i32_1 : i32, i32, i32
  }
  func.func @transform_21(%arg0: i32) -> (i32, i32, i32) {
    %c0_i32 = arith.constant 0 : i32
    %c0_i32_0 = arith.constant 0 : i32
    %c0_i32_1 = arith.constant 0 : i32
    %c0_i32_2 = arith.constant 0 : i32
    return %c0_i32, %c0_i32_0, %c0_i32_1 : i32, i32, i32
  }
  func.func @transform_22(%arg0: i32) -> (i32, i32) {
    %c0_i32 = arith.constant 0 : i32
    %c0_i32_0 = arith.constant 0 : i32
    %c0_i32_1 = arith.constant 0 : i32
    return %c0_i32, %c0_i32_0 : i32, i32
  }
  func.func @transform_23(%arg0: i32) -> (i32, i32) {
    %c0_i32 = arith.constant 0 : i32
    %c0_i32_0 = arith.constant 0 : i32
    %c0_i32_1 = arith.constant 0 : i32
    return %c0_i32, %c0_i32_0 : i32, i32
  }
  func.func @transform_24(%arg0: i32) -> (i32, i32) {
    %c0_i32 = arith.constant 0 : i32
    %c0_i32_0 = arith.constant 0 : i32
    %c0_i32_1 = arith.constant 0 : i32
    return %c0_i32, %c0_i32_0 : i32, i32
  }
  func.func @transform_25(%arg0: i32) -> (i32, i32) {
    %c0_i32 = arith.constant 0 : i32
    %c0_i32_0 = arith.constant 0 : i32
    %c0_i32_1 = arith.constant 0 : i32
    return %c0_i32, %c0_i32_0 : i32, i32
  }
  func.func @transform_26(%arg0: i32) -> (i32, i32, i32) {
    %c0_i32 = arith.constant 0 : i32
    %c0_i32_0 = arith.constant 0 : i32
    %c0_i32_1 = arith.constant 0 : i32
    return %arg0, %c0_i32, %c0_i32_0 : i32, i32, i32
  }
}

</mosaic_0001>

<bundles_post_ra>
// kernel: kinematic_transformer_forward.1
= control target key start
LH: loop header
LB: loop body
LE: loop exit
PB: predicated region body
PF: predicated region fallthrough
CT: control target
= control target key end

     0   :  { %s5416_s0 = inlined_call_operand.vmem [shape: f32[2,8,32], index: 0, kind: input, shape index: {}]   ;;  %s5417_s1 = inlined_call_operand.vmem [shape: f32[2,8,2], index: 1, kind: input, shape index: {}]   ;;  %s5418_s2 = inlined_call_operand.vmem [shape: f32[32,15], index: 2, kind: input, shape index: {}]   ;;  %s5419_s3 = inlined_call_operand.vmem [shape: f32[1,6], index: 3, kind: input, shape index: {}]   ;;  %s5420_s4 = inlined_call_operand.vmem [shape: f32[32,128], index: 4, kind: input, shape index: {}]   ;;  %s5421_s5 = inlined_call_operand.vmem [shape: f32[1,128], index: 5, kind: input, shape index: {}]   ;;  %s5422_s6 = inlined_call_operand.vmem [shape: f32[128,128], index: 6, kind: input, shape index: {}]   ;;  %s5423_s7 = inlined_call_operand.vmem [shape: f32[1,128], index: 7, kind: input, shape index: {}]   ;;  %s5424_s8 = inlined_call_operand.vmem [shape: f32[2,128], index: 8, kind: input, shape index: {}]   ;;  %s5425_s9 = inlined_call_operand.vmem [shape: f32[1,128], index: 9, kind: input, shape index: {}]   ;;  %s5426_s10 = inlined_call_operand.hbm [shape: f32[128,128], index: 10, kind: input, shape index: {}]   ;;  %s5427_s11 = inlined_call_operand.vmem [shape: f32[1,128], index: 11, kind: input, shape index: {}]   ;;  %s5428_s12 = inlined_call_operand.vmem [shape: f32[1,128], index: 12, kind: input, shape index: {}]   ;;  %s5429_s13 = inlined_call_operand.vmem [shape: f32[1,128], index: 13, kind: input, shape index: {}]   ;;  %s5430_s14 = inlined_call_operand.hbm [shape: f32[2,128,384], index: 14, kind: input, shape index: {}]   ;;  %s5431_s15 = inlined_call_operand.vmem [shape: f32[2,1,384], index: 15, kind: input, shape index: {}]   ;;  %s5432_s16 = inlined_call_operand.hbm [shape: f32[2,128,128], index: 16, kind: input, shape index: {}]   ;;  %s5433_s17 = inlined_call_operand.vmem [shape: f32[2,1,128], index: 17, kind: input, shape index: {}]   ;;  %s5434_s18 = inlined_call_operand.hbm [shape: f32[2,128,256], index: 18, kind: input, shape index: {}]   ;;  %s5435_s19 = inlined_call_operand.vmem [shape: f32[2,1,256], index: 19, kind: input, shape index: {}]   ;;  %s5436_s20 = inlined_call_operand.hbm [shape: f32[2,256,128], index: 20, kind: input, shape index: {}]   ;;  %s5437_s21 = inlined_call_operand.vmem [shape: f32[2,1,128], index: 21, kind: input, shape index: {}]   ;;  %s5438_s22 = inlined_call_operand.hbm [shape: f32[128,128], index: 22, kind: input, shape index: {}]   ;;  %s5439_s23 = inlined_call_operand.vmem [shape: f32[1,128], index: 23, kind: input, shape index: {}]   ;;  %s5440_s24 = inlined_call_operand.vmem [shape: f32[128,10], index: 24, kind: input, shape index: {}]   ;;  %s5441_s25 = inlined_call_operand.vmem [shape: f32[1,10], index: 25, kind: input, shape index: {}]   ;;  %s5442_s26 = inlined_call_operand.hbm [shape: f32[2,8,10], index: 26, kind: output, shape index: {}]  }
   0x1   :  { %5463 = sst [smem:[#allocation27_spill]] %s5416_s0 }
   0x2   :  { %5464 = sst [smem:[#allocation28_spill]] %s5417_s1 }
   0x3   :  { %5465 = sst [smem:[#allocation29_spill]] %s5418_s2 }
   0x4   :  { %5466 = sst [smem:[#allocation30_spill]] %s5419_s3 }
   0x5   :  { %5467 = sst [smem:[#allocation31_spill]] %s5420_s4 }
   0x6   :  { %5468 = sst [smem:[#allocation32_spill]] %s5421_s5 }
   0x7   :  { %5469 = sst [smem:[#allocation33_spill]] %s5422_s6 }
   0x8   :  { %5470 = sst [smem:[#allocation34_spill]] %s5423_s7 }
   0x9   :  { %5471 = sst [smem:[#allocation35_spill]] %s5424_s8 }
   0xa   :  { %5472 = sst [smem:[#allocation36_spill]] %s5425_s9 }
   0xb   :  { %5473 = sst [smem:[#allocation37_spill]] %s5426_s10 }
   0xc   :  { %5474 = sst [smem:[#allocation38_spill]] %s5430_s14 }
   0xd   :  { %5475 = sst [smem:[#allocation39_spill]] %s5434_s18 }
   0xe   :  { %5476 = sst [smem:[#allocation40_spill]] %s5439_s23 }
   0xf   :  { %5477 = sst [smem:[#allocation41_spill]] %s5441_s25 }
  0x10   :  { %5478 = sst [smem:[#allocation42_spill]] %s5442_s26 }
  0x11   :  { %31 = vsyncpa [#allocation3], 0 }
  0x12   :  { %32 = vsyncpa [#allocation6], 0 }
  0x13   :  { %33 = vsyncpa [#allocation9], 0 }
  0x14   :  { %34 = vsyncpa [#allocation12], 0 }
  0x15   :  { %35 = vsyncpa [#allocation4], 0 }
  0x16   :  { %37 = vsyncpa [#allocation4 + $0x1], 0  ;;  %s4441_s27 = smov 0   ;;  %s4443_s3 = smov 0  }
  0x17   :  { %s4445_s7 = smov 0   ;;  %s4447_s28 = smov 0  }
  0x18 LB: > { %5479 = sst [smem:[#allocation19_spill]] %s4261_s27  ;;  %s4462_s8 = sadd.s32 4294967295, %s4273_s28   ;;  %s4273_s28 = sphi %s4447_s28, %s5557_s28   ;;  %s4269_s7 = sphi %s4445_s7, %s5560_s7   ;;  %s4265_s3 = sphi %s4443_s3, %s5559_s3   ;;  %s4261_s27 = sphi %s4441_s27, %s5558_s27  }
  0x19   : > { %5480 = sst [smem:[#allocation20_spill]] %s4265_s3  ;;  %s3630_s4 = sadd.s32 4294967294, %s4273_s28  }
  0x1a   : > { %5481 = sst [smem:[#allocation21_spill]] %s4269_s7  ;;  %s4466_s29 = sadd.s32 1, %s4273_s28  }
  0x1b   : > { %5482 = sst [smem:[#allocation22_spill]] %s4273_s28  ;;  %s606_s0 = sadd.s32 1, %s4269_s7 }
  0x1c   : > { %5483 = sst [smem:[#allocation23_spill]] %s4466_s29  ;;  %s603_s9 = ssub.s32 %s4273_s28, %s4466_s29 }
  0x1d   : > { %p616_p0 = scmp.ne.s32.totalorder %s4269_s7, %s4265_s3  ;;  %p604_p1 = scmp.eq.s32.totalorder %s603_s9, 0 }
  0x1e   : > { %p617_p2 = scmp.eq.s32.totalorder %s4462_s8, 1  ;;  %p622_p3 = scmp.ne.s32.totalorder %s4265_s3, %s4261_s27 }
  0x1f   : > { %p623_p4 = scmp.eq.s32.totalorder %s3630_s4, 1  ;;  %p3631_p7 = scmp.ge.s32.totalorder %s4273_s28, 1 }
  0x20   : > { %s4477_s30 = scalar_select %p604_p1, %s4269_s7, %s606_s0  }
  0x21   : > { %p4479_p5 = por %p617_p2, %p616_p0  ;;  %p4483_p6 = por %p623_p4, %p622_p3 }
  0x22   : > { %5484 = sst [smem:[#allocation24_spill]] %s4477_s30  ;;  %p630_p8 = scmp.lt.s32.totalorder %s4273_s28, 3 }
  0x23   : > { %s5485_s2 = scalar_select %p4479_p5, 1, 0 }
  0x24   : > { %s5487_s5 = scalar_select %p4483_p6, 1, 0 }
  0x25   : > { %5486 = sst [smem:[#allocation25_spill]] %s5485_s2  ;;  %p3747_p9 = scmp.eq.s32.totalorder %s4462_s8, 0 }
  0x26   : > { %5488 = sst [smem:[#allocation26_spill]] %s5487_s5  ;;  %p4490_p10 = pnand %p3631_p7, %p630_p8 }
  0x27   : > { %s5490_s14 = sld [smem:[#allocation38_spill]]  ;;  %s4275_s0 = smov [#allocation5]  }
  0x28   : > { %p3724_p11 = pneg %p4490_p10  ;;  %s690_s9 = sshll.u32 %s4275_s0, 4  ;;  %s691_s9 = int_to_ptr.vmem [resolvable:$true] %s690_s9 }
  0x29   : > { %s5492_s18 = sld [smem:[#allocation39_spill]]  ;;  %s4276_s6 = smov 384  }
  0x2a   : > { %p4501_p12 = pnand %p3747_p9, %p3724_p11  ;;  %s4277_s1 = smov 24  }
  0x2b   : > { %s4279_s27 = smov 256   ;;  %s4280_s28 = smov 16  }
  0x2c   : > { %s5493_s26 = sld [smem:[#allocation37_spill]]  ;;  %s4281_s29 = smov [#allocation2]  }
  0x2d   : > { %s688_s4 = sshll.u32 %s5490_s14, 4  ;;  %s4278_s14 = smov [#allocation8]   ;;  %s689_s4 = int_to_ptr.hbm [resolvable:$true] %s688_s4 }
  0x2e   : > { %3730 = dma.hbm_to_vmem [thread:$0]  (!%p4501_p12), %s689_s4, 12288, %s691_s9, [#allocation6], %s4276_s6, %s4276_s6, %s4277_s1  }
  0x2f   : > { %s722_s5 = sshll.u32 %s5492_s18, 4  ;;  %s724_s0 = sshll.u32 %s4278_s14, 4  ;;  %s723_s5 = int_to_ptr.hbm [resolvable:$true] %s722_s5  ;;  %s725_s0 = int_to_ptr.vmem [resolvable:$true] %s724_s0 }
  0x30   : > { %3736 = dma.hbm_to_vmem [thread:$0]  (!%p4501_p12), %s723_s5, 8192, %s725_s0, [#allocation9], %s4279_s27, %s4279_s27, %s4280_s28  }
  0x31   : > { %s667_s18 = sshll.u32 %s4281_s29, 4  ;;  %s705_s4 = sshll.u32 %s5432_s16, 4  ;;  %s668_s18 = int_to_ptr.vmem [resolvable:$true] %s667_s18  ;;  %s706_s4 = int_to_ptr.hbm [resolvable:$true] %s705_s4 }
  0x32   : > { %s665_s7 = sshll.u32 %s5493_s26, 4  ;;  %s4282_s14 = smov 128   ;;  %s666_s7 = int_to_ptr.hbm [resolvable:$true] %s665_s7 }
  0x33   : > { %s4283_s9 = smov 8   ;;  %s4284_s27 = smov [#allocation7]  }
  0x34   : > { %3727 = dma.hbm_to_vmem [thread:$0]  (!%p4501_p12), %s666_s7, 2048, %s668_s18, [#allocation3], %s4282_s14, %s4282_s14, %s4283_s9  }
  0x35   : > { %s707_s28 = sshll.u32 %s4284_s27, 4  ;;  %s739_s26 = sshll.u32 %s5436_s20, 4  ;;  %s708_s28 = int_to_ptr.vmem [resolvable:$true] %s707_s28  ;;  %s740_s26 = int_to_ptr.hbm [resolvable:$true] %s739_s26 }
  0x36   : > { %3733 = dma.hbm_to_vmem [thread:$0]  (!%p4501_p12), %s706_s4, 4096, %s708_s28, [#allocation6], %s4282_s14, %s4282_s14, %s4283_s9  }
  0x37   : > { %s756_s3 = sshll.u32 %s5438_s22, 4  ;;  %s4285_s6 = smov [#allocation10]   ;;  %s757_s3 = int_to_ptr.hbm [resolvable:$true] %s756_s3 }
  0x38   : > { %s741_s1 = sshll.u32 %s4285_s6, 4  ;;  %s4286_s18 = smov [#allocation11]   ;;  %s742_s1 = int_to_ptr.vmem [resolvable:$true] %s741_s1 }
  0x39   : > { %3739 = dma.hbm_to_vmem [thread:$0]  (!%p4501_p12), %s740_s26, 8192, %s742_s1, [#allocation9], %s4282_s14, %s4282_s14, %s4283_s9  }
  0x3a   : > { %s758_s0 = sshll.u32 %s4286_s18, 4  ;;  %797 = sbr.rel (%p4490_p10) target bundleno = 6118 (0x17e6), region = 124  ;;  %s759_s0 = int_to_ptr.vmem [resolvable:$true] %s758_s0 }
  0x3b   : > { %3742 = dma.hbm_to_vmem [thread:$0]  (!%p4501_p12), %s757_s3, 2048, %s759_s0, [#allocation12], %s4282_s14, %s4282_s14, %s4283_s9  }
  0x3f   : > { %4240 = dma.done.wait (%p3747_p9), [#allocation3], 2048  }
  0x40   : > { %4242 = vsyncadd (%p3747_p9), [#allocation3], 4294965248 }
  0x41   : > { %4244 = dma.done.wait (%p3747_p9), [#allocation6], 16384  }
  0x42   : > { %4246 = vsyncadd (%p3747_p9), [#allocation6], 4294950912 }
  0x43   : > { %4248 = dma.done.wait (%p3747_p9), [#allocation9], 16384  }
  0x44   : > { %4250 = vsyncadd (%p3747_p9), [#allocation9], 4294950912 }
  0x45   : > { %4252 = dma.done.wait (%p3747_p9), [#allocation12], 2048  }
  0x46   : > { %4254 = vsyncadd (%p3747_p9), [#allocation12], 4294965248  ;;  %p896_p13 = scmp.lt.s32.totalorder %s4462_s8, 1  ;;  %v4287_v0 = vmov 0   ;;  %v4288_v1 = vmov 1   ;;  %s5494_s4 = sld [smem:[#allocation28_spill]] }
  0x47   : > { %3823 = vset.pattern.permute.xlu0 %v4287_v0  ;;  %3824 = vset.pattern.permute.xlu1 %v4288_v1  ;;  %s5495_s28 = sld [smem:[#allocation31_spill]]  ;;  %v952_v7 = vld [vmem:[#allocation2 + $0x78] sm:$0xff]  ;;  %v951_v9 = vld [vmem:[#allocation2 + $0x70] sm:$0xff]  ;;  %vm5459_vm0 = vcmask 261120   ;;  %v950_v13 = vld [vmem:[#allocation2 + $0x68] sm:$0xff]  ;;  %v4289_v19 = vmov 2  }
  0x48   : > { %s897_s30 = scalar_select %p896_p13, %s4462_s8, 1  ;;  %3826 = vset.pattern.permute.xlu2 %v4288_v1  ;;  %957 = vmatpush.msra.mxu0 %v952_v7  ;;  %v949_v15 = vld [vmem:[#allocation2 + $0x60] sm:$0xff]  ;;  %v948_v17 = vld [vmem:[#allocation2 + $0x58] sm:$0xff]  ;;  %v947_v20 = vld [vmem:[#allocation2 + $0x50] sm:$0xff] }
  0x49   : > { %s5497_s1 = sld [smem:[#allocation27_spill]]  ;;  %v946_v22 = vld [vmem:[#allocation2 + $0x48] sm:$0xff]  ;;  %v945_v24 = vld [vmem:[#allocation2 + $0x40] sm:$0xff]  ;;  %v944_v26 = vld [vmem:[#allocation2 + $0x38] sm:$0xff]  ;;  %s4304_s9 = smov 64  }
  0x4a   : > { %s3647_s10 = sshll.u32 %s897_s30, 3  ;;  %s5498_s7 = sld [smem:[#allocation30_spill]]  ;;  %958 = vmatpush.msra.mxu0 %v951_v9  ;;  %v943_v28 = vld [vmem:[#allocation2 + $0x30] sm:$0xff]  ;;  %v942_v30 = vld [vmem:[#allocation2 + $0x28] sm:$0xff]  ;;  %v941_v32 = vld [vmem:[#allocation2 + $0x20] sm:$0xff]  ;;  %v4290_v9 = vmov 128.0  }
  0x4b   : > { %s5500_s27 = sld [smem:[#allocation33_spill]]  ;;  %v940_v34 = vld [vmem:[#allocation2 + $0x18] sm:$0xff]  ;;  %v939_v36 = vld [vmem:[#allocation2 + $0x10] sm:$0xff]  ;;  %v938_v38 = vld [vmem:[#allocation2 + $0x8] sm:$0xff]  ;;  %3963 = vrcp.f32 %v4290_v9 }
  0x4c   : > { %s903_s14 = scalar_lea.vmem %s5494_s4, %s3647_s10  ;;  %959 = vmatpush.msra.mxu0 %v950_v13  ;;  %v937_v40 = vld [vmem:[#allocation2] sm:$0xff]  ;;  %s5503_s23 = sld [smem:[#allocation36_spill]]  ;;  %v1152_v13 = vld [vmem:[#allocation5 + $0x150] sm:$0xff] }
  0x4d   : > { %s5496_s25 = smov %s5495_s28  ;;  %v981_v2 = vld [vmem:[%s5495_s28 + $0x18] sm:$0xff]  ;;  %v907_v6 = vld [vmem:[%s903_s14] sm:$0xff]  ;;  %s5505_s30 = sld [smem:[#allocation34_spill]] }
  0x4e   : > { %v980_v3 = vld [vmem:[%s5496_s25 + $0x10] sm:$0xff]  ;;  %1002 = vmatpush.msra.mxu3 %v981_v2  ;;  %v979_v4 = vld [vmem:[%s5496_s25 + $0x8] sm:$0xff]  ;;  %917 = vperm.xlu1 %3824, %v907_v6   ;;  %v978_v10 = vld [vmem:[%s5496_s25] sm:$0xff]  ;;  %s5506_s14 = sld [smem:[#allocation29_spill]]  ;;  %s4297_s4 = smov 96  }
  0x4f   : > { %s899_s18 = scalar_lea.vmem %s5497_s1, %s3647_s10  ;;  %960 = vmatpush.msra.mxu0 %v949_v15  ;;  %s5502_s10 = sld [smem:[#allocation35_spill]]  ;;  %v3953_v62 = vld [vmem:[%s5427_s11] ss:$0 sm:$0xff] }
  0x50   : > { %s5499_s29 = smov %s5498_s7  ;;  %v3950_v5 = vld [vmem:[%s5498_s7] ss:$0 sm:$0xff]  ;;  %1003 = vmatpush.msra.mxu3 %v980_v3  ;;  %s5504_s1 = sld [smem:[#allocation32_spill]] }
  0x51   : > { %s5501_s2 = smov %s5500_s27  ;;  %v1032_v8 = vld [vmem:[%s5500_s27 + $0x78] sm:$0xff]  ;;  %1012 = vperm.xlu0 %3823, %v3950_v5   ;;  %v977_v12 = vld [vmem:[%s899_s18] sm:$0xff]  ;;  %1059 = vperm.xlu2 %3826, %v3950_v5   ;;  %s4305_s27 = smov 32  }
  0x52   : > { %v1031_v11 = vld [vmem:[%s5501_s2 + $0x70] sm:$0xff]  ;;  %1004 = vmatpush.msra.mxu3 %v979_v4  ;;  %1037 = vmatpush.msra.mxu2 %v1032_v8  ;;  %v1030_v14 = vld [vmem:[%s5501_s2 + $0x68] sm:$0xff]  ;;  %v1029_v16 = vld [vmem:[%s5501_s2 + $0x60] sm:$0xff]  ;;  %s5549_s5 = sld [smem:[#allocation20_spill]]  ;;  %s3695_s28 = sshll.u32 %s4462_s8, 3 }
  0x53   : > { %v1028_v18 = vld [vmem:[%s5501_s2 + $0x58] sm:$0xff]  ;;  %v1027_v21 = vld [vmem:[%s5501_s2 + $0x50] sm:$0xff]  ;;  %961 = vmatpush.msra.mxu0 %v948_v17  ;;  %v1026_v23 = vld [vmem:[%s5501_s2 + $0x48] sm:$0xff]  ;;  %s5552_s18 = sld [smem:[#allocation41_spill]] }
  0x54   : > { %1005 = vmatpush.msra.mxu3 %v978_v10  ;;  %1038 = vmatpush.msra.mxu2 %v1031_v11  ;;  %v1025_v25 = vld [vmem:[%s5501_s2 + $0x40] sm:$0xff]  ;;  %v1024_v27 = vld [vmem:[%s5501_s2 + $0x38] sm:$0xff]  ;;  %v1023_v29 = vld [vmem:[%s5501_s2 + $0x30] sm:$0xff] }
  0x55   : > { %3649 = vmatmul.msk.f32.vlgmr.msra.gmra.mxu3 %vm5459_vm0, %v977_v12  ;;  %962 = vmatpush.msra.mxu0 %v947_v20  ;;  %v1022_v31 = vld [vmem:[%s5501_s2 + $0x28] sm:$0xff]  ;;  %v1021_v33 = vld [vmem:[%s5501_s2 + $0x20] sm:$0xff]  ;;  %v1020_v35 = vld [vmem:[%s5501_s2 + $0x18] sm:$0xff] }
  0x56   : > { %1039 = vmatpush.msra.mxu2 %v1030_v14  ;;  %3825 = vset.pattern.permute.xlu1 %v4289_v19  ;;  %v1019_v37 = vld [vmem:[%s5501_s2 + $0x10] sm:$0xff]  ;;  %v1018_v39 = vld [vmem:[%s5501_s2 + $0x8] sm:$0xff]  ;;  %v1017_v41 = vld [vmem:[%s5501_s2] sm:$0xff] }
  0x57   : > { %932 = vperm.xlu1 %3825, %v3950_v5   ;;  %963 = vmatpush.msra.mxu0 %v946_v22  ;;  %v908_v43 = vld [vmem:[%s5502_s10] sm:$0x3]  ;;  %v1155_v10 = vld [vmem:[#allocation5 + $0x168] sm:$0xff]  ;;  %v1156_v11 = vld [vmem:[#allocation5 + $0x170] sm:$0xff] }
  0x58   : > { %1040 = vmatpush.msra.mxu2 %v1029_v16  ;;  %v920_v45 = vperm.slane %v908_v43, 1  ;;  %v914_v46 = vperm.slane %v908_v43, 0  ;;  %v3951_v49 = vld [vmem:[%s5503_s23] ss:$0 sm:$0xff]  ;;  %v1157_v12 = vld [vmem:[#allocation5 + $0x178] sm:$0xff]  ;;  %1166 = vmatpush.msrb.mxu3 %v1155_v10  ;;  %v3964_v16 = vpop.eup %3963  ;;  %v1135_v43 = vld [vmem:[#allocation5 + $0xc8] sm:$0xff] }
  0x59   : > { %911 = vperm.xlu0 %3823, %v907_v6   ;;  %964 = vmatpush.msra.mxu0 %v945_v24  ;;  %v3952_v56 = vld [vmem:[%s5504_s1] ss:$0 sm:$0xff]  ;;  %v1153_v14 = vld [vmem:[#allocation5 + $0x158] sm:$0xff]  ;;  %v1078_v17 = vmul.f32 128.0, %v3964_v16  ;;  %vm1082_vm4 = vweird.f32 %v3964_v16  ;;  %s5551_s23 = sld [smem:[#allocation42_spill]] }
  0x5a   : > { %1041 = vmatpush.msra.mxu2 %v1028_v18  ;;  %v3954_v61 = vld [vmem:[%s5505_s30] ss:$0 sm:$0xff]  ;;  %1186 = vmatpush.msra.mxu1 %v1156_v11 }
  0x5b   : > { %965 = vmatpush.msra.mxu0 %v944_v26  ;;  %v1154_v15 = vld [vmem:[#allocation5 + $0x160] sm:$0xff]  ;;  %1167 = vmatpush.msrb.mxu3 %v1152_v13  ;;  %v1079_v18 = vsub.f32 1.0, %v1078_v17 }
  0x5c   : > { %1042 = vmatpush.msra.mxu2 %v1027_v21  ;;  %1187 = vmatpush.msra.mxu1 %v1153_v14  ;;  %v3955_v17 = vld [vmem:[%s5428_s12] ss:$0 sm:$0xff] }
  0x5d   : > { %966 = vmatpush.msra.mxu0 %v943_v28  ;;  %v1080_v20 = vmul.f32 %v3964_v16, %v1079_v18  ;;  %v1150_v28 = vld [vmem:[#allocation5 + $0x140] sm:$0xff] }
  0x5e   : > { %1043 = vmatpush.msra.mxu2 %v1026_v23  ;;  %1188 = vmatpush.msra.mxu1 %v1150_v28  ;;  %v4684_v28 = vld [vmem:[%s5506_s14] sm:$0xff] }
  0x5f   : > { %3827 = vset.pattern.permute.xlu1 %v4287_v0  ;;  %967 = vmatpush.msra.mxu0 %v942_v30  ;;  %v1081_v21 = vadd.f32 %v3964_v16, %v1080_v20  ;;  %v1146_v30 = vld [vmem:[#allocation5 + $0x120] sm:$0xff]  ;;  %s3494_s3 = scalar_lea.hbm %s5551_s23, %s3695_s28 }
  0x60   : > { %1044 = vmatpush.msra.mxu2 %v1025_v25 }
  0x61   : > { %968 = vmatpush.msra.mxu0 %v941_v32  ;;  %v4645_v22 = vsel %vm1082_vm4, %v3964_v16, %v1081_v21  ;;  %v1148_v32 = vld [vmem:[#allocation5 + $0x130] sm:$0xff]  ;;  %v3956_v21 = vld [vmem:[%s5429_s13] ss:$0 sm:$0xff] }
  0x62   : > { %1045 = vmatpush.msra.mxu2 %v1024_v27  ;;  %v1149_v27 = vld [vmem:[#allocation5 + $0x138] sm:$0xff] }
  0x63   : > { %969 = vmatpush.msra.mxu0 %v940_v34  ;;  %1168 = vmatpush.msrb.mxu3 %v1149_v27  ;;  %v1144_v34 = vld [vmem:[#allocation5 + $0x110] sm:$0xff] }
  0x64   : > { %1046 = vmatpush.msra.mxu2 %v1023_v29  ;;  %v1151_v29 = vld [vmem:[#allocation5 + $0x148] sm:$0xff]  ;;  %v4669_v27 = vld [vmem:[%s5506_s14 + $0x10] sm:$0xff] }
  0x65   : > { %970 = vmatpush.msra.mxu0 %v939_v36  ;;  %1169 = vmatpush.msrb.mxu3 %v1146_v30  ;;  %v1140_v36 = vld [vmem:[#allocation5 + $0xf0] sm:$0xff]  ;;  %v4292_v30 = vmov 7  }
  0x66   : > { %1047 = vmatpush.msra.mxu2 %v1022_v31  ;;  %v1147_v31 = vld [vmem:[#allocation5 + $0x128] sm:$0xff]  ;;  %3834 = vset.pattern.permute.xlu0 %v4292_v30 }
  0x67   : > { %971 = vmatpush.msra.mxu0 %v938_v38  ;;  %1189 = vmatpush.msra.mxu1 %v1147_v31  ;;  %v1142_v38 = vld [vmem:[#allocation5 + $0x100] sm:$0xff] }
  0x68   : > { %1048 = vmatpush.msra.mxu2 %v1021_v33  ;;  %v1143_v33 = vld [vmem:[#allocation5 + $0x108] sm:$0xff]  ;;  %v1158_v31 = vld [vmem:[%s5431_s15] sm:$0x7] }
  0x69   : > { %972 = vmatpush.msra.mxu0 %v937_v40  ;;  %1170 = vmatpush.msrb.mxu3 %v1143_v33  ;;  %v1138_v40 = vld [vmem:[#allocation5 + $0xe0] sm:$0xff]  ;;  %v1162_v33 = vperm.slane %v1158_v31, 2 }
  0x6a   : > { %1049 = vmatpush.msra.mxu2 %v1020_v35  ;;  %v1145_v35 = vld [vmem:[#allocation5 + $0x118] sm:$0xff]  ;;  %1190 = vmatpush.msra.mxu1 %v1144_v34 }
  0x6b   : > { %1206 = vmatpush.msrb.mxu0 %v1157_v12  ;;  %1171 = vmatpush.msrb.mxu3 %v1140_v36 }
  0x6c   : > { %1050 = vmatpush.msra.mxu2 %v1019_v37  ;;  %v1141_v37 = vld [vmem:[#allocation5 + $0xf8] sm:$0xff] }
  0x6d   : > { %1207 = vmatpush.msrb.mxu0 %v1154_v15  ;;  %1191 = vmatpush.msra.mxu1 %v1141_v37 }
  0x6e   : > { %1051 = vmatpush.msra.mxu2 %v1018_v39  ;;  %v1137_v39 = vld [vmem:[#allocation5 + $0xd8] sm:$0xff] }
  0x6f   : > { %1208 = vmatpush.msrb.mxu0 %v1151_v29  ;;  %1172 = vmatpush.msrb.mxu3 %v1137_v39  ;;  %v4291_v29 = vmov 5  }
  0x70   : > { %1052 = vmatpush.msra.mxu2 %v1017_v41  ;;  %v1139_v41 = vld [vmem:[#allocation5 + $0xe8] sm:$0xff]  ;;  %1192 = vmatpush.msra.mxu1 %v1138_v40 }
  0x71   : > { %1209 = vmatpush.msrb.mxu0 %v1148_v32  ;;  %3832 = vset.pattern.permute.xlu2 %v4291_v29  ;;  %v1161_v32 = vperm.slane %v1158_v31, 1 }
  0x72   : > { %1193 = vmatpush.msra.mxu1 %v1135_v43  ;;  %v4294_v43 = vmov 12  }
  0x73   : > { %1210 = vmatpush.msrb.mxu0 %v1145_v35 }
  0x75   : > { %1211 = vmatpush.msrb.mxu0 %v1142_v38  ;;  %v1160_v38 = vperm.slane %v1158_v31, 0 }
  0x77   : > { %1212 = vmatpush.msrb.mxu0 %v1139_v41 }
  0xab   : > { %v1060_v2 = vpop.permute.xlu2 %1059 }
  0xc0   : > { %v918_v44 = vpop.permute.xlu1 %917 }
  0xc1   : > { %v921_v47 = vmul.f32 %v920_v45, %v918_v44  ;;  %v1136_v44 = vld [vmem:[#allocation5 + $0xd0] sm:$0xff]  ;;  %v1131_v45 = vld [vmem:[#allocation5 + $0xa8] sm:$0xff] }
  0xc2   : > { %1213 = vmatpush.msrb.mxu0 %v1136_v44  ;;  %v4295_v44 = vmov 14  }
  0xc3   : > { %v1013_v42 = vpop.permute.xlu0 %1012 }
  0xc9   : > { %v933_v52 = vpop.permute.xlu1 %932 }
  0xcb   : > { %v912_v48 = vpop.permute.xlu0 %911 }
  0xcc   : > { %v915_v50 = vmul.f32 %v914_v46, %v912_v48  ;;  %v1132_v46 = vld [vmem:[#allocation5 + $0xb0] sm:$0xff] }
  0xcd   : > { %1194 = vmatpush.msra.mxu1 %v1132_v46  ;;  %v1128_v48 = vld [vmem:[#allocation5 + $0x90] sm:$0xff]  ;;  %v4298_v46 = vmov 4  }
  0xce   : > { %v922_v51 = vadd.f32 %v921_v47, %v915_v50  ;;  %v1133_v47 = vld [vmem:[#allocation5 + $0xb8] sm:$0xff]  ;;  %v1130_v50 = vld [vmem:[#allocation5 + $0xa0] sm:$0xff] }
  0xcf   : > { %1214 = vmatpush.msrb.mxu0 %v1133_v47  ;;  %v4299_v47 = vmov 6  }
  0xd0   : > { %v927_v53 = vadd.f32 %v3951_v49, %v922_v51  ;;  %v1129_v49 = vld [vmem:[#allocation5 + $0x98] sm:$0xff] }
  0xd1   : > { %1195 = vmatpush.msra.mxu1 %v1129_v49  ;;  %1215 = vmatpush.msrb.mxu0 %v1130_v50  ;;  %v1125_v51 = vld [vmem:[#allocation5 + $0x78] sm:$0xff]  ;;  %v4301_v49 = vmov 9   ;;  %v4302_v50 = vmov 11  }
  0xd2   : > { %v935_v54 = vmul.f32 %v933_v52, %v927_v53  ;;  %vm928_vm1 = vcmp.ge.f32.partialorder %v927_v53, 0.0  ;;  %v1126_v52 = vld [vmem:[#allocation5 + $0x80] sm:$0xff] }
  0xd3   : > { %1196 = vmatpush.msra.mxu1 %v1126_v52 }
  0xd4   : > { %v936_v55 = vsel %vm928_vm1, %v927_v53, %v935_v54  ;;  %v1127_v53 = vld [vmem:[#allocation5 + $0x88] sm:$0xff]  ;;  %v1122_v54 = vld [vmem:[#allocation5 + $0x60] sm:$0xff] }
  0xd5   : > { %973 = vmatmul.f32.vlgmr.msra.gmra.mxu0 %v936_v55  ;;  %v1123_v55 = vld [vmem:[#allocation5 + $0x68] sm:$0xff] }
  0xd6   : > { %1216 = vmatpush.msrb.mxu0 %v1127_v53  ;;  %1197 = vmatpush.msra.mxu1 %v1123_v55 }
  0xd8   : > { %v1007_v57 = vpop.f32.mrf.mxu3 }
  0xd9   : > { %v1008_v58 = vadd.f32 %v3952_v56, %v1007_v57  ;;  %v1124_v56 = vld [vmem:[#allocation5 + $0x70] sm:$0xff]  ;;  %v1119_v57 = vld [vmem:[#allocation5 + $0x48] sm:$0xff] }
  0xda   : > { %1217 = vmatpush.msrb.mxu0 %v1124_v56 }
  0xdb   : > { %vm1010_vm2 = vcmp.ge.f32.partialorder %v1008_v58, 0.0  ;;  %v1015_v59 = vmul.f32 %v1013_v42, %v1008_v58  ;;  %v1134_v42 = vld [vmem:[#allocation5 + $0xc0] sm:$0xff] }
  0xdc   : > { %1173 = vmatpush.msrb.mxu3 %v1134_v42  ;;  %v4293_v42 = vmov 10  }
  0xdd   : > { %v1016_v60 = vsel %vm1010_vm2, %v1008_v58, %v1015_v59  ;;  %v1120_v58 = vld [vmem:[#allocation5 + $0x50] sm:$0xff]  ;;  %v1121_v59 = vld [vmem:[#allocation5 + $0x58] sm:$0xff] }
  0xde   : > { %1053 = vmatmul.f32.vlgmr.msra.gmra.mxu2 %v1016_v60  ;;  %1174 = vmatpush.msrb.mxu3 %v1131_v45  ;;  %v1116_v60 = vld [vmem:[#allocation5 + $0x30] sm:$0xff]  ;;  %v4296_v45 = vmov 3  }
  0xdf   : > { %1198 = vmatpush.msra.mxu1 %v1120_v58  ;;  %1218 = vmatpush.msrb.mxu0 %v1121_v59 }
  0xe0   : > { %1175 = vmatpush.msrb.mxu3 %v1128_v48  ;;  %v4300_v48 = vmov 8  }
  0xe2   : > { %1176 = vmatpush.msrb.mxu3 %v1125_v51  ;;  %v4303_v51 = vmov 13  }
  0xe4   : > { %1177 = vmatpush.msrb.mxu3 %v1122_v54 }
  0xe6   : > { %1178 = vmatpush.msrb.mxu3 %v1119_v57 }
  0xe8   : > { %1179 = vmatpush.msrb.mxu3 %v1116_v60 }
 0x152   : > { %v974_v3 = vpop.f32.mrf.mxu0 }
 0x153   : > { %v975_v6 = vadd.f32 %v3953_v62, %v974_v3  ;;  %v1118_v62 = vld [vmem:[#allocation5 + $0x40] sm:$0xff]  ;;  %v1115_v3 = vld [vmem:[#allocation5 + $0x28] sm:$0xff] }
 0x154   : > { %1219 = vmatpush.msrb.mxu0 %v1118_v62  ;;  %v1069_v62 = vlaneseq }
 0x156   : > { %1220 = vmatpush.msrb.mxu0 %v1115_v3 }
 0x161   : > { %v1054_v63 = vpop.f32.mrf.mxu2 }
 0x162   : > { %v1055_v4 = vadd.f32 %v3954_v61, %v1054_v63  ;;  %v1117_v61 = vld [vmem:[#allocation5 + $0x38] sm:$0xff] }
 0x163   : > { %v1113_v63 = vld [vmem:[#allocation5 + $0x18] sm:$0xff]  ;;  %1199 = vmatpush.msra.mxu1 %v1117_v61 }
 0x164   : > { %vm1057_vm3 = vcmp.ge.f32.partialorder %v1055_v4, 0.0  ;;  %v1062_v5 = vmul.f32 %v1060_v2, %v1055_v4  ;;  %v1114_v2 = vld [vmem:[#allocation5 + $0x20] sm:$0xff]  ;;  %1180 = vmatpush.msrb.mxu3 %v1113_v63  ;;  %v1070_v63 = vand.u32 127, %v1069_v62 }
 0x165   : > { %1200 = vmatpush.msra.mxu1 %v1114_v2  ;;  %v1072_v2 = vshrl.u32 %v1069_v62, 7 }
 0x166   : > { %v1063_v7 = vsel %vm1057_vm3, %v1055_v4, %v1062_v5  ;;  %v1110_v4 = vld [vmem:[#allocation5] sm:$0xff]  ;;  %v1111_v5 = vld [vmem:[#allocation5 + $0x8] sm:$0xff] }
 0x167   : > { %v4642_v8 = vadd.f32 %v1063_v7, %v975_v6  ;;  %v1112_v6 = vld [vmem:[#allocation5 + $0x10] sm:$0xff]  ;;  %1181 = vmatpush.msrb.mxu3 %v1110_v4  ;;  %1201 = vmatpush.msra.mxu1 %v1111_v5  ;;  %v1073_v4 = vsub.s32 %v1070_v63, %v1072_v2 }
 0x168   : > { %1221 = vmatpush.msrb.mxu0 %v1112_v6 }
 0x169   : > { %1075 = vadd.xlane.f32.xlu2 %v4642_v8  ;;  %v4731_v5 = vadd.s32 7, %v1073_v4 }
 0x16b   : > { %vm1272_vm8 = vcmp.eq.s32.totalorder %v4731_v5, 1  ;;  %vm1265_vm9 = vcmp.eq.s32.totalorder %v4731_v5, 0  ;;  %vm1279_vm10 = vcmp.eq.s32.totalorder %v4731_v5, 2  ;;  %vm1286_vm11 = vcmp.eq.s32.totalorder %v4731_v5, 3 }
 0x16c   : > { %vm1293_vm12 = vcmp.eq.s32.totalorder %v4731_v5, 4  ;;  %vm1300_vm13 = vcmp.eq.s32.totalorder %v4731_v5, 5  ;;  %vm1307_vm14 = vcmp.eq.s32.totalorder %v4731_v5, 6  ;;  %vm5458_vm15 = vcmp.eq.s32.totalorder %v4731_v5, 7 }
 0x16d   : > { %vm1321_vm1 = vcmp.eq.s32.totalorder %v4731_v5, 8  ;;  %vm1328_vm2 = vcmp.eq.s32.totalorder %v4731_v5, 9  ;;  %vm1335_vm3 = vcmp.eq.s32.totalorder %v4731_v5, 10  ;;  %vm5457_vm4 = vcmp.eq.s32.totalorder %v4731_v5, 11 }
 0x1dc   : > { %v1076_v23 = vpop.xlane.xlu2 %1075 }
 0x1dd   : > { %v1084_v24 = vmul.f32 %v4645_v22, %v1076_v23 }
 0x1df   : > { %v4649_v25 = vsub.f32 %v4642_v8, %v1084_v24 }
 0x1e1   : > { %v1086_v26 = vmul.f32 %v4649_v25, %v4649_v25 }
 0x1e3   : > { %1087 = vadd.xlane.f32.xlu0 %v1086_v26  ;;  %v4664_v26 = vld [vmem:[%s5506_s14 + $0x18] sm:$0xff] }
 0x1e4   : > { %1257 = vmatpush.msra.mxu0 %v4664_v26  ;;  %1445 = vmatpush.msrb.mxu2 %v4664_v26 }
 0x1e6   : > { %1258 = vmatpush.msra.mxu0 %v4669_v27  ;;  %1446 = vmatpush.msrb.mxu2 %v4669_v27 }
 0x256   : > { %v1088_v7 = vpop.xlane.xlu0 %1087 }
 0x257   : > { %v1089_v9 = vmul.f32 %v1088_v7, %v4645_v22 }
 0x259   : > { %v1090_v10 = vadd.f32 1e-05, %v1089_v9 }
 0x25b   : > { %3965 = vrsqrt.f32 %v1090_v10  ;;  %vm1097_vm6 = vweird.f32 %v1090_v10 }
 0x261   : > { %v3966_v11 = vpop.eup %3965 }
 0x262   : > { %v1092_v12 = vmul.f32 %v3966_v11, %v1090_v10  ;;  %vm1098_vm5 = vweird.f32 %v3966_v11 }
 0x263   : > { %vm1099_vm7 = vmor %vm1097_vm6, %vm1098_vm5  ;;  %vm1349_vm5 = vcmp.eq.s32.totalorder %v4731_v5, 12  ;;  %vm1356_vm6 = vcmp.eq.s32.totalorder %v4731_v5, 13 }
 0x264   : > { %v1093_v13 = vmul.f32 %v3966_v11, %v1092_v12 }
 0x266   : > { %v1094_v14 = vmul.f32 0.5, %v1093_v13 }
 0x268   : > { %v1095_v15 = vsub.f32 1.5, %v1094_v14 }
 0x26a   : > { %v1096_v16 = vmul.f32 %v3966_v11, %v1095_v15 }
 0x26c   : > { %v1100_v18 = vsel %vm1099_vm7, %v3966_v11, %v1096_v16  ;;  %vm5461_vm7 = vcmp.eq.s32.totalorder %v4731_v5, 14 }
 0x26d   : > { %v1101_v20 = vmul.f32 %v1100_v18, %v4649_v25  ;;  %v4676_v25 = vld [vmem:[%s5506_s14 + $0x8] sm:$0xff] }
 0x26e   : > { %1259 = vmatpush.msra.mxu0 %v4676_v25  ;;  %1447 = vmatpush.msrb.mxu2 %v4676_v25 }
 0x26f   : > { %v1105_v23 = vmul.f32 %v3955_v17, %v1101_v20 }
 0x270   : > { %1260 = vmatpush.msra.mxu0 %v4684_v28  ;;  %1448 = vmatpush.msrb.mxu2 %v4684_v28 }
 0x271   : > { %v1109_v24 = vadd.f32 %v3956_v21, %v1105_v23 }
 0x273   : > { %1182 = vmatmul.f32.vlgmr.msrb.gmra.mxu3 %v1109_v24  ;;  %1202 = vmatmul.f32.vlgmr.msra.gmra.mxu1 %v1109_v24 }
 0x274   : > { %1222 = vmatmul.f32.vlgmr.msrb.gmra.mxu0 %v1109_v24 }
 0x2f0   : > { %v1203_v34 = vpop.f32.mrf.mxu1 }
 0x2f1   : > { %v4694_v35 = vadd.f32 %v1203_v34, %v1161_v32  ;;  %v1223_v36 = vpop.f32.mrf.mxu0 }
 0x2f2   : > { %v4696_v37 = vadd.f32 %v1223_v36, %v1162_v33 }
 0x2f3   : > { %3651 = vmatpush.xpose.msk.msra.mxu3 %vm5459_vm0, %v4694_v35 }
 0x2f6   : > { %v1183_v39 = vpop.f32.mrf.mxu3 }
 0x2f7   : > { %1424 = vmatpush.msrb.mxu3 %v4696_v37  ;;  %v4701_v40 = vadd.f32 %v1183_v39, %v1160_v38 }
 0x2f9   : > { %3650 = vmatmul.msk.f32.vlgmr.msra.gmra.mxu0 %vm5459_vm0, %v4701_v40  ;;  %3652 = vmatmul.msk.f32.vlgmr.msra.gmra.mxu3 %vm5459_vm0, %v4701_v40 }
 0x376   : > { %v1262_v41 = vpop.f32.mrf.mxu0 }
 0x377   : > { %1316 = vperm.xlu0 %3834, %v1262_v41   ;;  %1302 = vperm.xlu2 %3832, %v1262_v41  }
 0x378   : > { %1268 = vperm.xlu1 %3827, %v1262_v41  }
 0x37c   : > { %v1390_v4 = vpop.f32.mrf.mxu3 }
 0x37f   : > { %3837 = vset.pattern.permute.xlu2 %v4293_v42  ;;  %3847 = vset.pattern.permute.xlu0 %v4291_v29 }
 0x380   : > { %3828 = vset.pattern.permute.xlu1 %v4288_v1  ;;  %1337 = vperm.xlu2 %3837, %v1262_v41  }
 0x381   : > { %1274 = vperm.xlu1 %3828, %v1262_v41  }
 0x388   : > { %3839 = vset.pattern.permute.xlu2 %v4294_v43 }
 0x389   : > { %3829 = vset.pattern.permute.xlu1 %v4289_v19  ;;  %1351 = vperm.xlu2 %3839, %v1262_v41  }
 0x38a   : > { %1281 = vperm.xlu1 %3829, %v1262_v41  }
 0x391   : > { %3841 = vset.pattern.permute.xlu2 %v4295_v44 }
 0x392   : > { %3830 = vset.pattern.permute.xlu1 %v4296_v45  ;;  %1365 = vperm.xlu2 %3841, %v1262_v41  }
 0x393   : > { %1288 = vperm.xlu1 %3830, %v1262_v41  }
 0x39a   : > { %1429 = vrot.lane.b32.xlu2 %v4701_v40, %s4297_s4 }
 0x39b   : > { %3831 = vset.pattern.permute.xlu1 %v4298_v46  ;;  %3842 = vset.pattern.permute.xlu2 %v4287_v0 }
 0x39c   : > { %1295 = vperm.xlu1 %3831, %v1262_v41  }
 0x3a2   : > { %1543 = vrot.lane.b32.xlu2 %v4694_v35, %s4297_s4 }
 0x3a4   : > { %3833 = vset.pattern.permute.xlu1 %v4299_v47 }
 0x3a5   : > { %1309 = vperm.xlu1 %3833, %v1262_v41  }
 0x3ad   : > { %3835 = vset.pattern.permute.xlu1 %v4300_v48 }
 0x3ae   : > { %1323 = vperm.xlu1 %3835, %v1262_v41  }
 0x3b6   : > { %3836 = vset.pattern.permute.xlu1 %v4301_v49 }
 0x3b7   : > { %1330 = vperm.xlu1 %3836, %v1262_v41  }
 0x3bf   : > { %3838 = vset.pattern.permute.xlu1 %v4302_v50 }
 0x3c0   : > { %1344 = vperm.xlu1 %3838, %v1262_v41  }
 0x3c8   : > { %3840 = vset.pattern.permute.xlu1 %v4303_v51 }
 0x3c9   : > { %1358 = vperm.xlu1 %3840, %v1262_v41  }
 0x3d1   : > { %v1303_v52 = vpop.permute.xlu2 %1302  ;;  %3846 = vset.pattern.permute.xlu1 %v4298_v46 }
 0x3d2   : > { %v1305_v18 = vsel %vm1300_vm13, %v1303_v52, 0.0 }
 0x3da   : > { %v1338_v53 = vpop.permute.xlu2 %1337 }
 0x3db   : > { %v1340_v52 = vsel %vm1335_vm3, %v1338_v53, 0.0 }
 0x3e3   : > { %v1352_v54 = vpop.permute.xlu2 %1351 }
 0x3e9   : > { %v1317_v23 = vpop.permute.xlu0 %1316 }
 0x3ea   : > { %v1269_v55 = vpop.permute.xlu1 %1268  ;;  %v1319_v32 = vsel %vm5458_vm15, %v1317_v23, 0.0 }
 0x3eb   : > { %v1271_v9 = vsel %vm1265_vm9, %v1269_v55, 0.0 }
 0x3ec   : > { %v1366_v56 = vpop.permute.xlu2 %1365 }
 0x3ed   : > { %v1368_v2 = vsel %vm5461_vm7, %v1366_v56, 0.0 }
 0x3f3   : > { %v1275_v57 = vpop.permute.xlu1 %1274 }
 0x3f4   : > { %v4726_v58 = vpop.permute.xlu2 %1429  ;;  %v1277_v7 = vsel %vm1272_vm8, %v1275_v57, 0.0 }
 0x3f5   : > { %3654 = vmatmul.msk.f32.vlgmr.msrb.gmra.mxu2 %vm5459_vm0, %v4726_v58  ;;  %v1278_v11 = vadd.f32 %v1277_v7, %v1271_v9 }
 0x3fc   : > { %v1282_v59 = vpop.permute.xlu1 %1281  ;;  %v1544_v60 = vpop.permute.xlu2 %1543 }
 0x3fd   : > { %3655 = vmatpush.xpose.msk.msra.mxu3 %vm5459_vm0, %v1544_v60  ;;  %v1284_v10 = vsel %vm1279_vm10, %v1282_v59, 0.0  ;;  %v1354_v60 = vsel %vm1349_vm5, %v1352_v54, 0.0 }
 0x3fe   : > { %v1285_v13 = vadd.f32 %v1284_v10, %v1278_v11 }
 0x405   : > { %v1289_v61 = vpop.permute.xlu1 %1288 }
 0x406   : > { %v1291_v12 = vsel %vm1286_vm11, %v1289_v61, 0.0 }
 0x407   : > { %v1292_v16 = vadd.f32 %v1291_v12, %v1285_v13 }
 0x40e   : > { %v1296_v3 = vpop.permute.xlu1 %1295 }
 0x40f   : > { %v1298_v14 = vsel %vm1293_vm12, %v1296_v3, 0.0 }
 0x410   : > { %v1299_v17 = vadd.f32 %v1298_v14, %v1292_v16 }
 0x412   : > { %v1306_v21 = vadd.f32 %v1305_v18, %v1299_v17 }
 0x417   : > { %v1310_v6 = vpop.permute.xlu1 %1309 }
 0x418   : > { %v1312_v20 = vsel %vm1307_vm14, %v1310_v6, 0.0 }
 0x419   : > { %v1313_v24 = vadd.f32 %v1312_v20, %v1306_v21 }
 0x41b   : > { %v1320_v34 = vadd.f32 %v1319_v32, %v1313_v24 }
 0x420   : > { %v1324_v15 = vpop.permute.xlu1 %1323 }
 0x421   : > { %v1326_v33 = vsel %vm1321_vm1, %v1324_v15, 0.0 }
 0x422   : > { %v1327_v38 = vadd.f32 %v1326_v33, %v1320_v34 }
 0x429   : > { %v1331_v31 = vpop.permute.xlu1 %1330 }
 0x42a   : > { %v1333_v36 = vsel %vm1328_vm2, %v1331_v31, 0.0 }
 0x42b   : > { %v1334_v39 = vadd.f32 %v1333_v36, %v1327_v38 }
 0x42d   : > { %v1341_v57 = vadd.f32 %v1340_v52, %v1334_v39 }
 0x432   : > { %v1345_v41 = vpop.permute.xlu1 %1344 }
 0x433   : > { %v1347_v55 = vsel %vm5457_vm4, %v1345_v41, 0.0  ;;  %vm5460_vm4 = vcmask 64512  }
 0x434   : > { %v1348_v59 = vadd.f32 %v1347_v55, %v1341_v57 }
 0x436   : > { %v1355_v61 = vadd.f32 %v1354_v60, %v1348_v59 }
 0x43b   : > { %v1359_v62 = vpop.permute.xlu1 %1358 }
 0x43c   : > { %v1361_v63 = vsel %vm1356_vm6, %v1359_v62, 0.0  ;;  %v1232_v62 = vld [vmem:[#allocation7 + $0x30] sm:$0xff] }
 0x43d   : > { %v1362_v53 = vadd.f32 %v1361_v63, %v1355_v61  ;;  %v1233_v61 = vld [vmem:[#allocation7 + $0x38] sm:$0xff] }
 0x43e   : > { %1621 = vmatpush.msra.mxu2 %v1233_v61 }
 0x43f   : > { %v1369_v3 = vadd.f32 %v1368_v2, %v1362_v53 }
 0x440   : > { %1622 = vmatpush.msra.mxu2 %v1232_v62 }
 0x441   : > { %v1391_v6 = vadd.f32 %v1390_v4, %v1369_v3  ;;  %v1231_v3 = vld [vmem:[#allocation7 + $0x28] sm:$0xff] }
 0x442   : > { %1623 = vmatpush.msra.mxu2 %v1231_v3 }
 0x443   : > { %v1393_v7 = vmul.f32 0.17677669, %v1391_v6 }
 0x445   : > { %v1395_v9 = vsel %vm5460_vm4, %v1393_v7, -inf }
 0x446   : > { %1396 = vmax.xlane.f32.xlu1 %v1395_v9 }
 0x478   : > { %v1450_v54 = vpop.f32.mrf.mxu2 }
 0x479   : > { %1455 = vperm.xlu2 %3842, %v1450_v54   ;;  %1478 = vperm.xlu1 %3846, %v1450_v54  }
 0x481   : > { %3843 = vset.pattern.permute.xlu2 %v4288_v1  ;;  %3851 = vset.pattern.permute.xlu1 %v4301_v49 }
 0x482   : > { %1460 = vperm.xlu2 %3843, %v1450_v54   ;;  %1508 = vperm.xlu1 %3851, %v1450_v54  }
 0x48a   : > { %3844 = vset.pattern.permute.xlu2 %v4289_v19  ;;  %3853 = vset.pattern.permute.xlu1 %v4302_v50 }
 0x48b   : > { %1466 = vperm.xlu2 %3844, %v1450_v54   ;;  %1520 = vperm.xlu1 %3853, %v1450_v54  }
 0x493   : > { %3845 = vset.pattern.permute.xlu2 %v4296_v45  ;;  %3855 = vset.pattern.permute.xlu1 %v4303_v51 }
 0x494   : > { %1472 = vperm.xlu2 %3845, %v1450_v54   ;;  %1532 = vperm.xlu1 %3855, %v1450_v54  }
 0x49c   : > { %3848 = vset.pattern.permute.xlu2 %v4299_v47  ;;  %3858 = vset.pattern.permute.xlu1 %v4288_v1 }
 0x49d   : > { %1490 = vperm.xlu2 %3848, %v1450_v54  }
 0x4a5   : > { %3849 = vset.pattern.permute.xlu2 %v4292_v30 }
 0x4a6   : > { %1496 = vperm.xlu2 %3849, %v1450_v54  }
 0x4ae   : > { %3850 = vset.pattern.permute.xlu2 %v4300_v48 }
 0x4af   : > { %1502 = vperm.xlu2 %3850, %v1450_v54  }
 0x4b7   : > { %3852 = vset.pattern.permute.xlu2 %v4293_v42 }
 0x4b8   : > { %1514 = vperm.xlu2 %3852, %v1450_v54  }
 0x4b9   : > { %v1397_v56 = vpop.xlane.xlu1 %1396 }
 0x4ba   : > { %v1398_v10 = vsub.f32 %v1393_v7, %v1397_v56  ;;  %v1230_v7 = vld [vmem:[#allocation7 + $0x20] sm:$0xff] }
 0x4bb   : > { %1624 = vmatpush.msra.mxu2 %v1230_v7 }
 0x4bc   : > { %v1399_v11 = vmul.f32 1.442695, %v1398_v10 }
 0x4be   : > { %3967 = vpow2.f32 %v1399_v11 }
 0x4c0   : > { %3854 = vset.pattern.permute.xlu2 %v4294_v43 }
 0x4c1   : > { %1526 = vperm.xlu2 %3854, %v1450_v54  }
 0x4c4   : > { %v3968_v12 = vpop.eup %3967 }
 0x4c5   : > { %v1401_v13 = vsel %vm5460_vm4, %v3968_v12, 0.0 }
 0x4c6   : > { %1402 = vadd.xlane.f32.xlu0 %v1401_v13  ;;  %v1229_v13 = vld [vmem:[#allocation7 + $0x18] sm:$0xff] }
 0x4c9   : > { %3860 = vset.pattern.permute.xlu2 %v4296_v45 }
 0x4d3   : > { %v1456_v14 = vpop.permute.xlu2 %1455 }
 0x4da   : > { %1484 = vperm.xlu0 %3847, %v1450_v54  }
 0x4dc   : > { %v1461_v15 = vpop.permute.xlu2 %1460 }
 0x4dd   : > { %v1463_v31 = vsel %vm1272_vm8, %v1461_v15, 0.0 }
 0x4e2   : > { %3856 = vset.pattern.permute.xlu0 %v4295_v44 }
 0x4e3   : > { %1538 = vperm.xlu0 %3856, %v1450_v54  }
 0x4e5   : > { %v1467_v16 = vpop.permute.xlu2 %1466 }
 0x4e6   : > { %v1469_v33 = vsel %vm1279_vm10, %v1467_v16, 0.0 }
 0x4eb   : > { %1580 = vrot.lane.b32.xlu0 %v4696_v37, %s4297_s4  ;;  %v1479_v23 = vpop.permute.xlu1 %1478 }
 0x4ec   : > { %3857 = vset.pattern.permute.xlu0 %v4287_v0  ;;  %v1481_v55 = vsel %vm1293_vm12, %v1479_v23, 0.0 }
 0x4ee   : > { %v1473_v17 = vpop.permute.xlu2 %1472 }
 0x4ef   : > { %v1475_v38 = vsel %vm1286_vm11, %v1473_v17, 0.0 }
 0x4f3   : > { %1652 = vrot.lane.b32.xlu0 %v4701_v40, %s4304_s9 }
 0x4f4   : > { %v1509_v41 = vpop.permute.xlu1 %1508 }
 0x4f5   : > { %v1511_v10 = vsel %vm1328_vm2, %v1509_v41, 0.0 }
 0x4f7   : > { %v1491_v18 = vpop.permute.xlu2 %1490 }
 0x4f8   : > { %v1493_v2 = vsel %vm1307_vm14, %v1491_v18, 0.0  ;;  %v1227_v18 = vld [vmem:[#allocation7 + $0x8] sm:$0xff] }
 0x4fb   : > { %1852 = vrot.lane.b32.xlu0 %v4701_v40, %s4305_s27  ;;  %v1458_v40 = vsel %vm1265_vm9, %v1456_v14, 0.0  ;;  %v1228_v14 = vld [vmem:[#allocation7 + $0x10] sm:$0xff] }
 0x4fc   : > { %v1464_v34 = vadd.f32 %v1463_v31, %v1458_v40 }
 0x4fd   : > { %v1521_v4 = vpop.permute.xlu1 %1520 }
 0x4fe   : > { %v1470_v39 = vadd.f32 %v1469_v33, %v1464_v34 }
 0x500   : > { %v1497_v21 = vpop.permute.xlu2 %1496  ;;  %v1476_v52 = vadd.f32 %v1475_v38, %v1470_v39 }
 0x502   : > { %v1482_v59 = vadd.f32 %v1481_v55, %v1476_v52  ;;  %v1226_v52 = vld [vmem:[#allocation7] sm:$0xff] }
 0x503   : > { %1766 = vrot.lane.b32.xlu0 %v4694_v35, %s4304_s9 }
 0x509   : > { %v1503_v36 = vpop.permute.xlu2 %1502 }
 0x50a   : > { %v1505_v54 = vsel %vm1321_vm1, %v1503_v36, 0.0 }
 0x512   : > { %v1515_v63 = vpop.permute.xlu2 %1514 }
 0x513   : > { %v1517_v15 = vsel %vm1335_vm3, %v1515_v63, 0.0 }
 0x51b   : > { %v1527_v16 = vpop.permute.xlu2 %1526 }
 0x539   : > { %v1403_v20 = vpop.xlane.xlu0 %1402 }
 0x53a   : > { %3969 = vrcp.f32 %v1403_v20 }
 0x540   : > { %v3970_v24 = vpop.eup %3969 }
 0x541   : > { %v1405_v32 = vmul.f32 %v3970_v24, %v3968_v12  ;;  %v1529_v24 = vsel %vm1349_vm5, %v1527_v16, 0.0 }
 0x543   : > { %3653 = vmatmul.msk.f32.vlgmr.msrb.gmra.mxu3 %vm5460_vm4, %v1405_v32 }
 0x544   : > { %1644 = vmatpush.msrb.mxu3 %v1229_v13 }
 0x546   : > { %1645 = vmatpush.msrb.mxu3 %v1228_v14 }
 0x548   : > { %1646 = vmatpush.msrb.mxu3 %v1227_v18 }
 0x54a   : > { %1647 = vmatpush.msrb.mxu3 %v1226_v52 }
 0x54b   : > { %3656 = vmatmul.msk.f32.vlgmr.msra.gmra.mxu3 %vm5459_vm0, %v4726_v58  ;;  %v1499_v58 = vsel %vm5458_vm15, %v1497_v21, 0.0  ;;  %vm5507_vm15 = vcmp.eq.s32.totalorder %v4731_v5, 11  ;;  %v1533_v21 = vpop.permute.xlu1 %1532 }
 0x54c   : > { %v1485_v57 = vpop.permute.xlu0 %1484  ;;  %v1523_v20 = vsel %vm5507_vm15, %v1521_v4, 0.0  ;;  %v1535_v32 = vsel %vm1356_vm6, %v1533_v21, 0.0  ;;  %vm5508_vm15 = vcmp.eq.s32.totalorder %v4731_v5, 7 }
 0x54d   : > { %v1487_v60 = vsel %vm1300_vm13, %v1485_v57, 0.0 }
 0x54e   : > { %v1488_v53 = vadd.f32 %v1487_v60, %v1482_v59 }
 0x550   : > { %v1494_v6 = vadd.f32 %v1493_v2, %v1488_v53 }
 0x552   : > { %v1500_v9 = vadd.f32 %v1499_v58, %v1494_v6 }
 0x554   : > { %v1506_v56 = vadd.f32 %v1505_v54, %v1500_v9 }
 0x555   : > { %v1539_v11 = vpop.permute.xlu0 %1538 }
 0x556   : > { %v1512_v12 = vadd.f32 %v1511_v10, %v1506_v56  ;;  %v1541_v34 = vsel %vm5461_vm7, %v1539_v11, 0.0 }
 0x558   : > { %v1518_v17 = vadd.f32 %v1517_v15, %v1512_v12 }
 0x55a   : > { %v1524_v23 = vadd.f32 %v1523_v20, %v1518_v17 }
 0x55c   : > { %v1530_v31 = vadd.f32 %v1529_v24, %v1524_v23 }
 0x55d   : > { %v1581_v40 = vpop.permute.xlu0 %1580 }
 0x55e   : > { %v1536_v33 = vadd.f32 %v1535_v32, %v1530_v31  ;;  %1601 = vmatpush.msrb.mxu1 %v1581_v40 }
 0x560   : > { %1668 = vmatpush.msra.mxu1 %v4664_v26  ;;  %v1542_v36 = vadd.f32 %v1541_v34, %v1536_v33 }
 0x562   : > { %1669 = vmatpush.msra.mxu1 %v4669_v27 }
 0x564   : > { %1670 = vmatpush.msra.mxu1 %v4676_v25 }
 0x565   : > { %v1653_v38 = vpop.permute.xlu0 %1652 }
 0x566   : > { %1671 = vmatpush.msra.mxu1 %v4684_v28 }
 0x56d   : > { %v1853_v39 = vpop.permute.xlu0 %1852 }
 0x575   : > { %v1767_v41 = vpop.permute.xlu0 %1766 }
 0x576   : > { %3661 = vmatpush.xpose.msk.msrb.mxu2 %vm5459_vm0, %v1767_v41 }
 0x5c6   : > { %v1426_v55 = vpop.f32.mrf.mxu3 }
 0x5c7   : > { %3659 = vmatmul.msk.f32.vlgmr.msrb.gmra.mxu3 %vm5459_vm0, %v1426_v55 }
 0x5ce   : > { %v1564_v57 = vpop.f32.mrf.mxu3 }
 0x5cf   : > { %v1565_v59 = vadd.f32 %v1564_v57, %v1542_v36 }
 0x5d1   : > { %v1567_v60 = vmul.f32 0.17677669, %v1565_v59 }
 0x5d3   : > { %v1568_v61 = vsel %vm5460_vm4, %v1567_v60, -inf }
 0x5d4   : > { %1569 = vmax.xlane.f32.xlu2 %v1568_v61 }
 0x5ec   : > { %1966 = vrot.lane.b32.xlu2 %v4694_v35, %s4305_s27 }
 0x647   : > { %v1570_v62 = vpop.xlane.xlu2 %1569 }
 0x648   : > { %v1571_v63 = vsub.f32 %v1567_v60, %v1570_v62 }
 0x64a   : > { %v1572_v53 = vmul.f32 1.442695, %v1571_v63 }
 0x64c   : > { %3971 = vpow2.f32 %v1572_v53 }
 0x64f   : > { %v1967_v7 = vpop.permute.xlu2 %1966 }
 0x652   : > { %v3972_v2 = vpop.eup %3971 }
 0x653   : > { %v1574_v3 = vsel %vm5460_vm4, %v3972_v2, 0.0 }
 0x654   : > { %1575 = vadd.xlane.f32.xlu1 %v1574_v3 }
 0x6c7   : > { %v1576_v4 = vpop.xlane.xlu1 %1575 }
 0x6c8   : > { %3973 = vrcp.f32 %v1576_v4 }
 0x6ce   : > { %v3974_v6 = vpop.eup %3973 }
 0x6cf   : > { %v1578_v58 = vmul.f32 %v3974_v6, %v3972_v2 }
 0x6d1   : > { %3657 = vmatmul.msk.f32.vlgmr.msrb.gmra.mxu1 %vm5460_vm4, %v1578_v58 }
 0x6d2   : > { %1868 = vmatpush.msrb.mxu1 %v4664_v26 }
 0x6d4   : > { %1869 = vmatpush.msrb.mxu1 %v4669_v27 }
 0x6d6   : > { %1870 = vmatpush.msrb.mxu1 %v4676_v25 }
 0x6d8   : > { %1871 = vmatpush.msrb.mxu1 %v4684_v28 }
 0x6d9   : > { %3660 = vmatmul.msk.f32.vlgmr.msra.gmra.mxu1 %vm5459_vm0, %v1653_v38 }
 0x6e1   : > { %3665 = vmatmul.msk.f32.vlgmr.msrb.gmra.mxu1 %vm5459_vm0, %v1853_v39 }
 0x74e   : > { %v1603_v35 = vpop.f32.mrf.mxu1 }
 0x74f   : > { %3658 = vmatmul.msk.f32.vlgmr.msra.gmra.mxu2 %vm5459_vm0, %v1603_v35 }
 0x750   : > { %3666 = vmatpush.xpose.msk.msra.mxu2 %vm5459_vm0, %v1967_v7 }
 0x756   : > { %v1673_v9 = vpop.f32.mrf.mxu1 }
 0x757   : > { %1695 = vperm.xlu2 %3860, %v1673_v9   ;;  %1683 = vperm.xlu1 %3858, %v1673_v9  }
 0x758   : > { %1678 = vperm.xlu0 %3857, %v1673_v9   ;;  %3662 = vmatmul.msk.f32.vlgmr.msrb.gmra.mxu2 %vm5459_vm0, %v1653_v38 }
 0x75e   : > { %v1873_v26 = vpop.f32.mrf.mxu1 }
 0x75f   : > { %3862 = vset.pattern.permute.xlu2 %v4291_v29  ;;  %3861 = vset.pattern.permute.xlu1 %v4298_v46 }
 0x760   : > { %3859 = vset.pattern.permute.xlu0 %v4289_v19  ;;  %3667 = vmatmul.msk.f32.vlgmr.msra.gmra.mxu2 %vm5459_vm0, %v1853_v39  ;;  %vm5509_vm0 = vcmp.eq.s32.totalorder %v4731_v5, 11 }
 0x761   : > { %1707 = vperm.xlu2 %3862, %v1673_v9   ;;  %1701 = vperm.xlu1 %3861, %v1673_v9  }
 0x762   : > { %1689 = vperm.xlu0 %3859, %v1673_v9  }
 0x769   : > { %3863 = vset.pattern.permute.xlu2 %v4299_v47  ;;  %3865 = vset.pattern.permute.xlu1 %v4300_v48 }
 0x76a   : > { %3867 = vset.pattern.permute.xlu0 %v4293_v42  ;;  %1713 = vperm.xlu2 %3863, %v1673_v9  }
 0x76b   : > { %1725 = vperm.xlu1 %3865, %v1673_v9   ;;  %1737 = vperm.xlu0 %3867, %v1673_v9  }
 0x772   : > { %3864 = vset.pattern.permute.xlu2 %v4292_v30 }
 0x773   : > { %3866 = vset.pattern.permute.xlu1 %v4301_v49  ;;  %3872 = vset.pattern.permute.xlu0 %v4287_v0 }
 0x774   : > { %1719 = vperm.xlu2 %3864, %v1673_v9   ;;  %1731 = vperm.xlu1 %3866, %v1673_v9  }
 0x775   : > { %1878 = vperm.xlu0 %3872, %v1873_v26  }
 0x77c   : > { %3868 = vset.pattern.permute.xlu2 %v4302_v50  ;;  %3870 = vset.pattern.permute.xlu1 %v4303_v51 }
 0x77d   : > { %3875 = vset.pattern.permute.xlu0 %v4296_v45  ;;  %1743 = vperm.xlu2 %3868, %v1673_v9  }
 0x77e   : > { %1755 = vperm.xlu1 %3870, %v1673_v9   ;;  %1895 = vperm.xlu0 %3875, %v1873_v26  }
 0x785   : > { %3869 = vset.pattern.permute.xlu2 %v4294_v43 }
 0x786   : > { %3871 = vset.pattern.permute.xlu1 %v4295_v44  ;;  %3880 = vset.pattern.permute.xlu0 %v4300_v48 }
 0x787   : > { %1749 = vperm.xlu2 %3869, %v1673_v9   ;;  %1761 = vperm.xlu1 %3871, %v1673_v9  }
 0x788   : > { %1925 = vperm.xlu0 %3880, %v1873_v26  }
 0x78f   : > { %3876 = vset.pattern.permute.xlu2 %v4298_v46  ;;  %3873 = vset.pattern.permute.xlu1 %v4288_v1 }
 0x790   : > { %3883 = vset.pattern.permute.xlu0 %v4302_v50  ;;  %1901 = vperm.xlu2 %3876, %v1873_v26  }
 0x791   : > { %1883 = vperm.xlu1 %3873, %v1873_v26   ;;  %1943 = vperm.xlu0 %3883, %v1873_v26  }
 0x798   : > { %3877 = vset.pattern.permute.xlu2 %v4291_v29 }
 0x799   : > { %3874 = vset.pattern.permute.xlu1 %v4289_v19  ;;  %1907 = vperm.xlu2 %3877, %v1873_v26  }
 0x79a   : > { %1889 = vperm.xlu1 %3874, %v1873_v26   ;;  %3887 = vset.pattern.permute.xlu0 %v4298_v46 }
 0x7a1   : > { %3881 = vset.pattern.permute.xlu2 %v4301_v49 }
 0x7a2   : > { %3878 = vset.pattern.permute.xlu1 %v4299_v47  ;;  %1931 = vperm.xlu2 %3881, %v1873_v26  }
 0x7a3   : > { %1913 = vperm.xlu1 %3878, %v1873_v26  }
 0x7aa   : > { %3882 = vset.pattern.permute.xlu2 %v4293_v42 }
 0x7ab   : > { %3879 = vset.pattern.permute.xlu1 %v4292_v30  ;;  %1937 = vperm.xlu2 %3882, %v1873_v26  }
 0x7ac   : > { %1919 = vperm.xlu1 %3879, %v1873_v26  }
 0x7b1   : > { %v1696_v27 = vpop.permute.xlu2 %1695 }
 0x7b2   : > { %v1698_v17 = vsel %vm1286_vm11, %v1696_v27, 0.0 }
 0x7b3   : > { %3885 = vset.pattern.permute.xlu2 %v4303_v51 }
 0x7b4   : > { %3884 = vset.pattern.permute.xlu1 %v4294_v43  ;;  %1955 = vperm.xlu2 %3885, %v1873_v26  }
 0x7b5   : > { %1949 = vperm.xlu1 %3884, %v1873_v26  }
 0x7bb   : > { %v1708_v25 = vpop.permute.xlu2 %1707 }
 0x7bc   : > { %3888 = vset.pattern.permute.xlu2 %v4287_v0  ;;  %v1710_v23 = vsel %vm1300_vm13, %v1708_v25, 0.0 }
 0x7bd   : > { %3886 = vset.pattern.permute.xlu1 %v4295_v44 }
 0x7be   : > { %1961 = vperm.xlu1 %3886, %v1873_v26  }
 0x7c4   : > { %v1714_v11 = vpop.permute.xlu2 %1713 }
 0x7c5   : > { %v1716_v40 = vsel %vm1307_vm14, %v1714_v11, 0.0 }
 0x7c6   : > { %3894 = vset.pattern.permute.xlu1 %v4299_v47 }
 0x7c9   : > { %v1684_v28 = vpop.permute.xlu1 %1683 }
 0x7ca   : > { %v1679_v54 = vpop.permute.xlu0 %1678  ;;  %v1686_v56 = vsel %vm1272_vm8, %v1684_v28, 0.0 }
 0x7cb   : > { %v1681_v10 = vsel %vm1265_vm9, %v1679_v54, 0.0 }
 0x7cc   : > { %v1687_v13 = vadd.f32 %v1686_v56, %v1681_v10 }
 0x7ce   : > { %v1720_v31 = vpop.permute.xlu2 %1719 }
 0x7cf   : > { %v1722_v34 = vsel %vm5508_vm15, %v1720_v31, 0.0 }
 0x7d2   : > { %v4911_v3 = vpop.f32.mrf.mxu2 }
 0x7d3   : > { %v1702_v12 = vpop.permute.xlu1 %1701 }
 0x7d4   : > { %v1690_v14 = vpop.permute.xlu0 %1689  ;;  %v1704_v20 = vsel %vm1293_vm12, %v1702_v12, 0.0 }
 0x7d5   : > { %v1692_v15 = vsel %vm1279_vm10, %v1690_v14, 0.0 }
 0x7d6   : > { %v1693_v16 = vadd.f32 %v1692_v15, %v1687_v13 }
 0x7d7   : > { %v1744_v41 = vpop.permute.xlu2 %1743 }
 0x7d8   : > { %v1699_v18 = vadd.f32 %v1698_v17, %v1693_v16  ;;  %v1746_v62 = vsel %vm5509_vm0, %v1744_v41, 0.0  ;;  %vm5510_vm0 = vmmov %vm5508_vm15  ;;  %vm5511_vm15 = vcmp.eq.s32.totalorder %v4731_v5, 11 }
 0x7da   : > { %v1705_v21 = vadd.f32 %v1704_v20, %v1699_v18 }
 0x7db   : > { %v1787_v27 = vpop.f32.mrf.mxu2 }
 0x7dc   : > { %v1711_v24 = vadd.f32 %v1710_v23, %v1705_v21 }
 0x7dd   : > { %v1726_v32 = vpop.permute.xlu1 %1725  ;;  %v1738_v57 = vpop.permute.xlu0 %1737 }
 0x7de   : > { %v1717_v33 = vadd.f32 %v1716_v40, %v1711_v24  ;;  %v1728_v38 = vsel %vm1321_vm1, %v1726_v32, 0.0  ;;  %v1740_v60 = vsel %vm1335_vm3, %v1738_v57, 0.0 }
 0x7e0   : > { %v1723_v36 = vadd.f32 %v1722_v34, %v1717_v33 }
 0x7e1   : > { %v1750_v53 = vpop.permute.xlu2 %1749 }
 0x7e2   : > { %v1729_v52 = vadd.f32 %v1728_v38, %v1723_v36  ;;  %v1752_v4 = vsel %vm1349_vm5, %v1750_v53, 0.0 }
 0x7e6   : > { %v1732_v39 = vpop.permute.xlu1 %1731 }
 0x7e7   : > { %v1734_v55 = vsel %vm1328_vm2, %v1732_v39, 0.0  ;;  %v1879_v10 = vpop.permute.xlu0 %1878 }
 0x7e8   : > { %v1735_v59 = vadd.f32 %v1734_v55, %v1729_v52  ;;  %v1881_v13 = vsel %vm1265_vm9, %v1879_v10, 0.0  ;;  %v1987_v10 = vpop.f32.mrf.mxu2 }
 0x7ea   : > { %v1741_v61 = vadd.f32 %v1740_v60, %v1735_v59  ;;  %v1902_v11 = vpop.permute.xlu2 %1901 }
 0x7eb   : > { %v1904_v24 = vsel %vm1293_vm12, %v1902_v11, 0.0 }
 0x7ec   : > { %v1747_v2 = vadd.f32 %v1746_v62, %v1741_v61 }
 0x7ee   : > { %v1753_v6 = vadd.f32 %v1752_v4, %v1747_v2 }
 0x7f0   : > { %v1756_v63 = vpop.permute.xlu1 %1755  ;;  %v1896_v17 = vpop.permute.xlu0 %1895 }
 0x7f1   : > { %v1758_v58 = vsel %vm1356_vm6, %v1756_v63, 0.0  ;;  %v1898_v21 = vsel %vm1286_vm11, %v1896_v17, 0.0 }
 0x7f2   : > { %v1759_v35 = vadd.f32 %v1758_v58, %v1753_v6 }
 0x7f3   : > { %v1908_v18 = vpop.permute.xlu2 %1907 }
 0x7f4   : > { %v1910_v33 = vsel %vm1300_vm13, %v1908_v18, 0.0 }
 0x7f9   : > { %v1762_v7 = vpop.permute.xlu1 %1761 }
 0x7fa   : > { %v1764_v9 = vsel %vm5461_vm7, %v1762_v7, 0.0  ;;  %v1926_v34 = vpop.permute.xlu0 %1925 }
 0x7fb   : > { %v1765_v26 = vadd.f32 %v1764_v9, %v1759_v35  ;;  %v1928_v57 = vsel %vm1321_vm1, %v1926_v34, 0.0 }
 0x7fc   : > { %v1932_v40 = vpop.permute.xlu2 %1931 }
 0x7fd   : > { %v1788_v25 = vadd.f32 %v1787_v27, %v1765_v26  ;;  %v1934_v61 = vsel %vm1328_vm2, %v1932_v40, 0.0 }
 0x7ff   : > { %v1790_v28 = vmul.f32 0.17677669, %v1788_v25 }
 0x801   : > { %v1791_v54 = vsel %vm5460_vm4, %v1790_v28, -inf }
 0x802   : > { %1792 = vmax.xlane.f32.xlu2 %v1791_v54 }
 0x803   : > { %v1884_v56 = vpop.permute.xlu1 %1883  ;;  %v1944_v62 = vpop.permute.xlu0 %1943 }
 0x804   : > { %v1886_v12 = vsel %vm1272_vm8, %v1884_v56, 0.0  ;;  %v1946_v4 = vsel %vm5511_vm15, %v1944_v62, 0.0  ;;  %v1238_v62 = vld [vmem:[#allocation7 + $0x60] sm:$0xff] }
 0x805   : > { %v1887_v14 = vadd.f32 %v1886_v12, %v1881_v13  ;;  %v1938_v59 = vpop.permute.xlu2 %1937 }
 0x806   : > { %v1940_v53 = vsel %vm1335_vm3, %v1938_v59, 0.0  ;;  %v1241_v59 = vld [vmem:[#allocation7 + $0x78] sm:$0xff] }
 0x80c   : > { %v1890_v15 = vpop.permute.xlu1 %1889 }
 0x80d   : > { %v1892_v16 = vsel %vm1279_vm10, %v1890_v15, 0.0 }
 0x80e   : > { %v1893_v20 = vadd.f32 %v1892_v16, %v1887_v14  ;;  %v1956_v7 = vpop.permute.xlu2 %1955  ;;  %v4005_v14 = vld [vmem:[%s5499_s29] ss:$0 sm:$0xff] }
 0x80f   : > { %v1958_v26 = vsel %vm1356_vm6, %v1956_v7, 0.0 }
 0x810   : > { %v1899_v23 = vadd.f32 %v1898_v21, %v1893_v20 }
 0x812   : > { %v1905_v32 = vadd.f32 %v1904_v24, %v1899_v23 }
 0x814   : > { %v1911_v36 = vadd.f32 %v1910_v33, %v1905_v32 }
 0x815   : > { %v1914_v31 = vpop.permute.xlu1 %1913 }
 0x816   : > { %v1916_v38 = vsel %vm1307_vm14, %v1914_v31, 0.0 }
 0x817   : > { %v1917_v39 = vadd.f32 %v1916_v38, %v1911_v36  ;;  %v1237_v38 = vld [vmem:[#allocation7 + $0x58] sm:$0xff] }
 0x818   : > { %1843 = vmatpush.msrb.mxu0 %v1237_v38  ;;  %v2091_v38 = vld [vmem:[#allocation8 + $0x58] sm:$0xff] }
 0x81e   : > { %v1920_v41 = vpop.permute.xlu1 %1919 }
 0x81f   : > { %v1922_v52 = vsel %vm5510_vm0, %v1920_v41, 0.0  ;;  %vm5512_vm0 = vcmask 261120  }
 0x820   : > { %v1923_v55 = vadd.f32 %v1922_v52, %v1917_v39  ;;  %v1235_v39 = vld [vmem:[#allocation7 + $0x48] sm:$0xff]  ;;  %vm5513_vm15 = vmmov %vm5512_vm0 }
 0x822   : > { %v1929_v60 = vadd.f32 %v1928_v57, %v1923_v55  ;;  %v1234_v57 = vld [vmem:[#allocation7 + $0x40] sm:$0xff] }
 0x824   : > { %v1935_v63 = vadd.f32 %v1934_v61, %v1929_v60  ;;  %v1240_v60 = vld [vmem:[#allocation7 + $0x70] sm:$0xff]  ;;  %v1239_v61 = vld [vmem:[#allocation7 + $0x68] sm:$0xff] }
 0x826   : > { %v1941_v2 = vadd.f32 %v1940_v53, %v1935_v63  ;;  %v1649_v63 = vpop.f32.mrf.mxu3 }
 0x827   : > { %v1950_v6 = vpop.permute.xlu1 %1949 }
 0x828   : > { %v1947_v58 = vadd.f32 %v1946_v4, %v1941_v2  ;;  %v1952_v35 = vsel %vm1349_vm5, %v1950_v6, 0.0  ;;  %v1650_v6 = vadd.f32 %v1649_v63, %v4911_v3  ;;  %v2183_v63 = vld [vmem:[#allocation10 + $0x78] sm:$0xff] }
 0x82a   : > { %v1953_v9 = vadd.f32 %v1952_v35, %v1947_v58 }
 0x82c   : > { %v1959_v25 = vadd.f32 %v1958_v26, %v1953_v9  ;;  %v3957_v9 = vld [vmem:[%s5433_s17] ss:$0 sm:$0xff] }
 0x830   : > { %v1962_v27 = vpop.permute.xlu1 %1961 }
 0x831   : > { %v1964_v54 = vsel %vm5461_vm7, %v1962_v27, 0.0 }
 0x832   : > { %v1965_v56 = vadd.f32 %v1964_v54, %v1959_v25  ;;  %v2110_v25 = vld [vmem:[#allocation8 + $0xf0] sm:$0xff]  ;;  %v2111_v54 = vld [vmem:[#allocation8 + $0xf8] sm:$0xff] }
 0x833   : > { %2118 = vmatpush.msra.mxu1 %v2110_v25  ;;  %2138 = vmatpush.msrb.mxu2 %v2111_v54  ;;  %v2179_v54 = vld [vmem:[#allocation10 + $0x58] sm:$0xff] }
 0x834   : > { %v1988_v11 = vadd.f32 %v1987_v10, %v1965_v56  ;;  %v2108_v56 = vld [vmem:[#allocation8 + $0xe0] sm:$0xff]  ;;  %v2109_v10 = vld [vmem:[#allocation8 + $0xe8] sm:$0xff] }
 0x835   : > { %2119 = vmatpush.msra.mxu1 %v2108_v56  ;;  %2139 = vmatpush.msrb.mxu2 %v2109_v10  ;;  %v2195_v56 = vld [vmem:[#allocation10 + $0xd8] sm:$0xff]  ;;  %v2178_v10 = vld [vmem:[#allocation10 + $0x50] sm:$0xff] }
 0x836   : > { %v1990_v12 = vmul.f32 0.17677669, %v1988_v11 }
 0x838   : > { %v1991_v13 = vsel %vm5460_vm4, %v1990_v12, -inf }
 0x839   : > { %1992 = vmax.xlane.f32.xlu0 %v1991_v13  ;;  %v2106_v13 = vld [vmem:[#allocation8 + $0xd0] sm:$0xff] }
 0x83a   : > { %2120 = vmatpush.msra.mxu1 %v2106_v13  ;;  %v2176_v13 = vld [vmem:[#allocation10 + $0x40] sm:$0xff] }
 0x84d   : > { %1802 = vrot.lane.b32.xlu0 %v4696_v37, %s4304_s9 }
 0x855   : > { %2161 = vperm.xlu0 %3887, %v4005_v14   ;;  %v2107_v14 = vld [vmem:[#allocation8 + $0xd8] sm:$0xff] }
 0x856   : > { %2140 = vmatpush.msrb.mxu2 %v2107_v14  ;;  %v2192_v14 = vld [vmem:[#allocation10 + $0xc0] sm:$0xff] }
 0x85d   : > { %3889 = vset.pattern.permute.xlu0 %v4288_v1 }
 0x875   : > { %v1793_v15 = vpop.xlane.xlu2 %1792 }
 0x876   : > { %v1794_v16 = vsub.f32 %v1790_v28, %v1793_v15  ;;  %v2104_v15 = vld [vmem:[#allocation8 + $0xc0] sm:$0xff] }
 0x877   : > { %2121 = vmatpush.msra.mxu1 %v2104_v15 }
 0x878   : > { %v1795_v17 = vmul.f32 1.442695, %v1794_v16  ;;  %v2105_v16 = vld [vmem:[#allocation8 + $0xc8] sm:$0xff] }
 0x879   : > { %2141 = vmatpush.msrb.mxu2 %v2105_v16  ;;  %v2175_v16 = vld [vmem:[#allocation10 + $0x38] sm:$0xff] }
 0x87a   : > { %3975 = vpow2.f32 %v1795_v17  ;;  %v2102_v17 = vld [vmem:[#allocation8 + $0xb0] sm:$0xff] }
 0x87b   : > { %2122 = vmatpush.msra.mxu1 %v2102_v17 }
 0x880   : > { %v3976_v18 = vpop.eup %3975 }
 0x881   : > { %v1797_v20 = vsel %vm5460_vm4, %v3976_v18, 0.0 }
 0x882   : > { %1798 = vadd.xlane.f32.xlu1 %v1797_v20  ;;  %v2100_v20 = vld [vmem:[#allocation8 + $0xa0] sm:$0xff] }
 0x883   : > { %2123 = vmatpush.msra.mxu1 %v2100_v20  ;;  %v2174_v20 = vld [vmem:[#allocation10 + $0x30] sm:$0xff] }
 0x89b   : > { %2002 = vrot.lane.b32.xlu1 %v4696_v37, %s4305_s27  ;;  %v1236_v37 = vld [vmem:[#allocation7 + $0x50] sm:$0xff] }
 0x89c   : > { %1844 = vmatpush.msrb.mxu0 %v1236_v37  ;;  %v2088_v37 = vld [vmem:[#allocation8 + $0x40] sm:$0xff] }
 0x89e   : > { %1845 = vmatpush.msrb.mxu0 %v1235_v39  ;;  %v2089_v39 = vld [vmem:[#allocation8 + $0x48] sm:$0xff] }
 0x8a0   : > { %1846 = vmatpush.msrb.mxu0 %v1234_v57  ;;  %v2085_v57 = vld [vmem:[#allocation8 + $0x28] sm:$0xff] }
 0x8a2   : > { %2043 = vmatpush.msra.mxu0 %v1241_v59  ;;  %v2082_v59 = vld [vmem:[#allocation8 + $0x10] sm:$0xff] }
 0x8a4   : > { %2044 = vmatpush.msra.mxu0 %v1240_v60  ;;  %v2083_v60 = vld [vmem:[#allocation8 + $0x18] sm:$0xff] }
 0x8a6   : > { %2045 = vmatpush.msra.mxu0 %v1239_v61  ;;  %v2080_v61 = vld [vmem:[#allocation8] sm:$0xff] }
 0x8a8   : > { %2046 = vmatpush.msra.mxu0 %v1238_v62  ;;  %v2081_v62 = vld [vmem:[#allocation8 + $0x8] sm:$0xff] }
 0x8ac   : > { %v1993_v21 = vpop.xlane.xlu0 %1992 }
 0x8ad   : > { %v1994_v23 = vsub.f32 %v1990_v12, %v1993_v21  ;;  %v2101_v21 = vld [vmem:[#allocation8 + $0xa8] sm:$0xff] }
 0x8af   : > { %v1995_v24 = vmul.f32 1.442695, %v1994_v23  ;;  %v2098_v23 = vld [vmem:[#allocation8 + $0x90] sm:$0xff] }
 0x8b0   : > { %2124 = vmatpush.msra.mxu1 %v2098_v23  ;;  %v2190_v23 = vld [vmem:[#allocation10 + $0xb0] sm:$0xff] }
 0x8b1   : > { %3977 = vpow2.f32 %v1995_v24  ;;  %v2099_v24 = vld [vmem:[#allocation8 + $0x98] sm:$0xff] }
 0x8b7   : > { %v3978_v31 = vpop.eup %3977 }
 0x8b8   : > { %v1997_v32 = vsel %vm5460_vm4, %v3978_v31, 0.0 }
 0x8b9   : > { %1998 = vadd.xlane.f32.xlu2 %v1997_v32  ;;  %v2097_v32 = vld [vmem:[#allocation8 + $0x88] sm:$0xff] }
 0x8bf   : > { %v1803_v40 = vpop.permute.xlu0 %1802 }
 0x8c0   : > { %1823 = vmatpush.msra.mxu3 %v1803_v40  ;;  %v2094_v40 = vld [vmem:[#allocation8 + $0x70] sm:$0xff] }
 0x8f5   : > { %v1799_v28 = vpop.xlane.xlu1 %1798 }
 0x8f6   : > { %3979 = vrcp.f32 %v1799_v28  ;;  %v2095_v28 = vld [vmem:[#allocation8 + $0x78] sm:$0xff] }
 0x8fc   : > { %v3980_v33 = vpop.eup %3979 }
 0x8fd   : > { %v1801_v34 = vmul.f32 %v3980_v33, %v3976_v18  ;;  %v2103_v18 = vld [vmem:[#allocation8 + $0xb8] sm:$0xff]  ;;  %v2092_v33 = vld [vmem:[#allocation8 + $0x60] sm:$0xff] }
 0x8fe   : > { %2142 = vmatpush.msrb.mxu2 %v2103_v18  ;;  %v2191_v18 = vld [vmem:[#allocation10 + $0xb8] sm:$0xff] }
 0x8ff   : > { %3663 = vmatmul.msk.f32.vlgmr.msra.gmra.mxu3 %vm5460_vm4, %v1801_v34  ;;  %v2093_v34 = vld [vmem:[#allocation8 + $0x68] sm:$0xff] }
 0x900   : > { %2143 = vmatpush.msrb.mxu2 %v2101_v21 }
 0x902   : > { %2144 = vmatpush.msrb.mxu2 %v2099_v24  ;;  %v2173_v24 = vld [vmem:[#allocation10 + $0x28] sm:$0xff] }
 0x904   : > { %2145 = vmatpush.msrb.mxu2 %v2097_v32  ;;  %v2172_v32 = vld [vmem:[#allocation10 + $0x20] sm:$0xff] }
 0x906   : > { %2146 = vmatpush.msrb.mxu2 %v2095_v28  ;;  %v2171_v28 = vld [vmem:[#allocation10 + $0x18] sm:$0xff] }
 0x908   : > { %2147 = vmatpush.msrb.mxu2 %v2093_v34 }
 0x90a   : > { %2148 = vmatpush.msrb.mxu2 %v2091_v38  ;;  %v4984_v38 = vld [vmem:[%s5428_s12] ss:$0 sm:$0xff] }
 0x90c   : > { %2149 = vmatpush.msrb.mxu2 %v2089_v39  ;;  %v4990_v39 = vld [vmem:[%s5429_s13] ss:$0 sm:$0xff] }
 0x90d   : > { %v2003_v36 = vpop.permute.xlu1 %2002 }
 0x90e   : > { %2023 = vmatpush.msrb.mxu3 %v2003_v36  ;;  %v2090_v36 = vld [vmem:[#allocation8 + $0x50] sm:$0xff] }
 0x910   : > { %2204 = vmatpush.msra.mxu3 %v2183_v63  ;;  %v2184_v63 = vld [vmem:[#allocation10 + $0x80] sm:$0xff] }
 0x92c   : > { %v1999_v41 = vpop.xlane.xlu2 %1998 }
 0x92d   : > { %3981 = vrcp.f32 %v1999_v41  ;;  %v2086_v41 = vld [vmem:[#allocation8 + $0x30] sm:$0xff] }
 0x933   : > { %v3982_v52 = vpop.eup %3981 }
 0x934   : > { %v2001_v55 = vmul.f32 %v3982_v52, %v3978_v31  ;;  %v2096_v31 = vld [vmem:[#allocation8 + $0x80] sm:$0xff]  ;;  %v2087_v52 = vld [vmem:[#allocation8 + $0x38] sm:$0xff] }
 0x935   : > { %2125 = vmatpush.msra.mxu1 %v2096_v31  ;;  %2150 = vmatpush.msrb.mxu2 %v2087_v52  ;;  %v2170_v52 = vld [vmem:[#allocation10 + $0x10] sm:$0xff] }
 0x936   : > { %3668 = vmatmul.msk.f32.vlgmr.msrb.gmra.mxu3 %vm5460_vm4, %v2001_v55  ;;  %v2084_v55 = vld [vmem:[#allocation8 + $0x20] sm:$0xff] }
 0x937   : > { %2126 = vmatpush.msra.mxu1 %v2094_v40  ;;  %2151 = vmatpush.msrb.mxu2 %v2085_v57  ;;  %v2188_v57 = vld [vmem:[#allocation10 + $0xa0] sm:$0xff] }
 0x939   : > { %2127 = vmatpush.msra.mxu1 %v2092_v33  ;;  %2152 = vmatpush.msrb.mxu2 %v2083_v60  ;;  %v2187_v60 = vld [vmem:[#allocation10 + $0x98] sm:$0xff] }
 0x93b   : > { %2128 = vmatpush.msra.mxu1 %v2090_v36  ;;  %2153 = vmatpush.msrb.mxu2 %v2081_v62  ;;  %v2185_v62 = vld [vmem:[#allocation10 + $0x88] sm:$0xff] }
 0x93d   : > { %2129 = vmatpush.msra.mxu1 %v2088_v37 }
 0x93f   : > { %2130 = vmatpush.msra.mxu1 %v2086_v41 }
 0x941   : > { %2131 = vmatpush.msra.mxu1 %v2084_v55  ;;  %v2189_v55 = vld [vmem:[#allocation10 + $0xa8] sm:$0xff] }
 0x943   : > { %2132 = vmatpush.msra.mxu1 %v2082_v59  ;;  %v2168_v59 = vld [vmem:[#allocation10] sm:$0xff] }
 0x945   : > { %2133 = vmatpush.msra.mxu1 %v2080_v61  ;;  %v2186_v61 = vld [vmem:[#allocation10 + $0x90] sm:$0xff] }
 0x982   : > { %v1825_v53 = vpop.f32.mrf.mxu3 }
 0x983   : > { %3664 = vmatmul.msk.f32.vlgmr.msrb.gmra.mxu0 %vm5512_vm0, %v1825_v53  ;;  %v2182_v53 = vld [vmem:[#allocation10 + $0x70] sm:$0xff] }
 0x984   : > { %2205 = vmatpush.msra.mxu3 %v2182_v53  ;;  %v4996_v53 = vld [vmem:[%s5506_s14 + $0x18] sm:$0xff] }
 0x9b9   : > { %v2025_v2 = vpop.f32.mrf.mxu3 }
 0x9ba   : > { %3669 = vmatmul.msk.f32.vlgmr.msra.gmra.mxu0 %vm5513_vm15, %v2025_v2  ;;  %v2199_v2 = vld [vmem:[#allocation10 + $0xf8] sm:$0xff] }
 0x9bb   : > { %2224 = vmatpush.msrb.mxu0 %v2199_v2  ;;  %v5002_v2 = vld [vmem:[%s5506_s14 + $0x10] sm:$0xff] }
 0xa00   : > { %v1848_v4 = vpop.f32.mrf.mxu0 }
 0xa01   : > { %v1851_v58 = vadd.f32 %v1848_v4, %v1650_v6  ;;  %v2181_v4 = vld [vmem:[#allocation10 + $0x68] sm:$0xff]  ;;  %v2198_v6 = vld [vmem:[#allocation10 + $0xf0] sm:$0xff] }
 0xa02   : > { %2225 = vmatpush.msrb.mxu0 %v2198_v6  ;;  %2206 = vmatpush.msra.mxu3 %v2181_v4  ;;  %v5008_v4 = vld [vmem:[%s5506_s14 + $0x8] sm:$0xff]  ;;  %v5014_v6 = vld [vmem:[%s5506_s14] sm:$0xff] }
 0xa37   : > { %v2048_v35 = vpop.f32.mrf.mxu0 }
 0xa38   : > { %v2051_v7 = vadd.f32 %v2048_v35, %v1851_v58  ;;  %v2197_v35 = vld [vmem:[#allocation10 + $0xe8] sm:$0xff] }
 0xa39   : > { %2226 = vmatpush.msrb.mxu0 %v2197_v35 }
 0xa3a   : > { %v2052_v26 = vadd.f32 %v2051_v7, %v4642_v8 }
 0xa3c   : > { %v4970_v27 = vadd.f32 %v3957_v9, %v2052_v26  ;;  %v2180_v9 = vld [vmem:[#allocation10 + $0x60] sm:$0xff] }
 0xa3d   : > { %v2196_v26 = vld [vmem:[#allocation10 + $0xe0] sm:$0xff]  ;;  %2207 = vmatpush.msra.mxu3 %v2180_v9  ;;  %v2162_v9 = vpop.permute.xlu0 %2161 }
 0xa3e   : > { %2058 = vadd.xlane.f32.xlu2 %v4970_v27  ;;  %2227 = vmatpush.msrb.mxu0 %v2196_v26 }
 0xa3f   : > { %2208 = vmatpush.msra.mxu3 %v2179_v54 }
 0xa40   : > { %2228 = vmatpush.msrb.mxu0 %v2195_v56 }
 0xa41   : > { %2209 = vmatpush.msra.mxu3 %v2178_v10 }
 0xab1   : > { %v2059_v3 = vpop.xlane.xlu2 %2058 }
 0xab2   : > { %v2060_v11 = vmul.f32 %v2059_v3, %v4645_v22  ;;  %v2194_v3 = vld [vmem:[#allocation10 + $0xd0] sm:$0xff] }
 0xab3   : > { %2229 = vmatpush.msrb.mxu0 %v2194_v3 }
 0xab4   : > { %v4975_v12 = vsub.f32 %v4970_v27, %v2060_v11  ;;  %v2177_v11 = vld [vmem:[#allocation10 + $0x48] sm:$0xff] }
 0xab5   : > { %2210 = vmatpush.msra.mxu3 %v2177_v11 }
 0xab6   : > { %v2062_v8 = vmul.f32 %v4975_v12, %v4975_v12 }
 0xab7   : > { %2211 = vmatpush.msra.mxu3 %v2176_v13  ;;  %v3958_v13 = vld [vmem:[%s5437_s21] ss:$0 sm:$0xff] }
 0xab8   : > { %2063 = vadd.xlane.f32.xlu2 %v2062_v8  ;;  %v2193_v8 = vld [vmem:[#allocation10 + $0xc8] sm:$0xff] }
 0xab9   : > { %2230 = vmatpush.msrb.mxu0 %v2193_v8  ;;  %2212 = vmatpush.msra.mxu3 %v2175_v16 }
 0xabb   : > { %2231 = vmatpush.msrb.mxu0 %v2192_v14  ;;  %2213 = vmatpush.msra.mxu3 %v2174_v20  ;;  %v2313_v20 = vld [vmem:[#allocation5 + $0x2e8] sm:$0xff] }
 0xabc   : > { %2325 = vmatpush.msrb.mxu1 %v2313_v20  ;;  %v2277_v20 = vld [vmem:[#allocation5 + $0x1c8] sm:$0xff] }
 0xabd   : > { %2232 = vmatpush.msrb.mxu0 %v2191_v18  ;;  %2214 = vmatpush.msra.mxu3 %v2173_v24  ;;  %v2310_v24 = vld [vmem:[#allocation5 + $0x2d0] sm:$0xff] }
 0xabe   : > { %2326 = vmatpush.msrb.mxu1 %v2310_v24  ;;  %v2274_v24 = vld [vmem:[#allocation5 + $0x1b0] sm:$0xff] }
 0xabf   : > { %2233 = vmatpush.msrb.mxu0 %v2190_v23  ;;  %2215 = vmatpush.msra.mxu3 %v2172_v32  ;;  %v2315_v23 = vld [vmem:[#allocation5 + $0x2f8] sm:$0xff]  ;;  %v2312_v32 = vld [vmem:[#allocation5 + $0x2e0] sm:$0xff] }
 0xac1   : > { %2216 = vmatpush.msra.mxu3 %v2171_v28  ;;  %2234 = vmatpush.msrb.mxu0 %v2189_v55  ;;  %v2306_v55 = vld [vmem:[#allocation5 + $0x2b0] sm:$0xff] }
 0xac3   : > { %2217 = vmatpush.msra.mxu3 %v2170_v52  ;;  %2235 = vmatpush.msrb.mxu0 %v2188_v57  ;;  %v2305_v52 = vld [vmem:[#allocation5 + $0x2a8] sm:$0xff]  ;;  %v2302_v57 = vld [vmem:[#allocation5 + $0x290] sm:$0xff] }
 0xac5   : > { %2236 = vmatpush.msrb.mxu0 %v2187_v60  ;;  %v2298_v60 = vld [vmem:[#allocation5 + $0x270] sm:$0xff] }
 0xac7   : > { %2237 = vmatpush.msrb.mxu0 %v2186_v61  ;;  %v2299_v61 = vld [vmem:[#allocation5 + $0x278] sm:$0xff] }
 0xac9   : > { %2238 = vmatpush.msrb.mxu0 %v2185_v62  ;;  %v2300_v62 = vld [vmem:[#allocation5 + $0x280] sm:$0xff] }
 0xacb   : > { %2239 = vmatpush.msrb.mxu0 %v2184_v63  ;;  %v2295_v63 = vld [vmem:[#allocation5 + $0x258] sm:$0xff] }
 0xacd   : > { %2417 = vmatpush.msra.mxu0 %v4996_v53 }
 0xacf   : > { %2418 = vmatpush.msra.mxu0 %v5002_v2 }
 0xad1   : > { %2419 = vmatpush.msra.mxu0 %v5008_v4 }
 0xad3   : > { %2420 = vmatpush.msra.mxu0 %v5014_v6 }
 0xb2b   : > { %v2064_v58 = vpop.xlane.xlu2 %2063 }
 0xb2c   : > { %v2065_v7 = vmul.f32 %v2064_v58, %v4645_v22  ;;  %v2112_v58 = vld [vmem:[%s5435_s19] sm:$0x3] }
 0xb2d   : > { %v2114_v35 = vperm.slane %v2112_v58, 0  ;;  %v2115_v54 = vperm.slane %v2112_v58, 1  ;;  %v2296_v58 = vld [vmem:[#allocation5 + $0x260] sm:$0xff] }
 0xb2e   : > { %v2066_v25 = vadd.f32 1e-05, %v2065_v7 }
 0xb30   : > { %3983 = vrsqrt.f32 %v2066_v25  ;;  %vm2073_vm15 = vweird.f32 %v2066_v25 }
 0xb36   : > { %v3984_v15 = vpop.eup %3983 }
 0xb37   : > { %v2068_v17 = vmul.f32 %v3984_v15, %v2066_v25  ;;  %vm2074_vm0 = vweird.f32 %v3984_v15 }
 0xb38   : > { %vm2075_vm4 = vmor %vm2073_vm15, %vm2074_vm0 }
 0xb39   : > { %v2069_v21 = vmul.f32 %v3984_v15, %v2068_v17 }
 0xb3b   : > { %v2070_v31 = vmul.f32 0.5, %v2069_v21  ;;  %v2314_v21 = vld [vmem:[#allocation5 + $0x2f0] sm:$0xff] }
 0xb3c   : > { %2345 = vmatpush.msra.mxu2 %v2314_v21  ;;  %v2278_v21 = vld [vmem:[#allocation5 + $0x1d0] sm:$0xff] }
 0xb3d   : > { %v2071_v40 = vsub.f32 1.5, %v2070_v31  ;;  %v2311_v31 = vld [vmem:[#allocation5 + $0x2d8] sm:$0xff] }
 0xb3e   : > { %2346 = vmatpush.msra.mxu2 %v2311_v31  ;;  %v2275_v31 = vld [vmem:[#allocation5 + $0x1b8] sm:$0xff] }
 0xb3f   : > { %v2072_v33 = vmul.f32 %v3984_v15, %v2071_v40 }
 0xb41   : > { %v2076_v34 = vsel %vm2075_vm4, %v3984_v15, %v2072_v33 }
 0xb42   : > { %v2077_v36 = vmul.f32 %v2076_v34, %v4975_v12  ;;  %v2169_v12 = vld [vmem:[#allocation10 + $0x8] sm:$0xff]  ;;  %v2307_v34 = vld [vmem:[#allocation5 + $0x2b8] sm:$0xff] }
 0xb43   : > { %2218 = vmatpush.msra.mxu3 %v2169_v12  ;;  %2327 = vmatpush.msrb.mxu1 %v2307_v34  ;;  %v2301_v12 = vld [vmem:[#allocation5 + $0x288] sm:$0xff]  ;;  %v2268_v34 = vld [vmem:[#allocation5 + $0x180] sm:$0xff] }
 0xb44   : > { %v2078_v37 = vmul.f32 %v4984_v38, %v2077_v36  ;;  %v2308_v36 = vld [vmem:[#allocation5 + $0x2c0] sm:$0xff] }
 0xb45   : > { %2219 = vmatpush.msra.mxu3 %v2168_v59  ;;  %2347 = vmatpush.msra.mxu2 %v2308_v36  ;;  %v2303_v59 = vld [vmem:[#allocation5 + $0x298] sm:$0xff]  ;;  %v2269_v36 = vld [vmem:[#allocation5 + $0x188] sm:$0xff] }
 0xb46   : > { %v2079_v41 = vadd.f32 %v4990_v39, %v2078_v37  ;;  %v2309_v37 = vld [vmem:[#allocation5 + $0x2c8] sm:$0xff] }
 0xb47   : > { %2365 = vmatpush.msrb.mxu3 %v2315_v23  ;;  %2348 = vmatpush.msra.mxu2 %v2305_v52  ;;  %v2279_v23 = vld [vmem:[#allocation5 + $0x1d8] sm:$0xff] }
 0xb48   : > { %2134 = vmatmul.f32.vlgmr.msra.gmra.mxu1 %v2079_v41  ;;  %2154 = vmatmul.f32.vlgmr.msrb.gmra.mxu2 %v2079_v41  ;;  %v2304_v41 = vld [vmem:[#allocation5 + $0x2a0] sm:$0xff] }
 0xb49   : > { %2366 = vmatpush.msrb.mxu3 %v2312_v32  ;;  %2328 = vmatpush.msrb.mxu1 %v2304_v41  ;;  %v2276_v32 = vld [vmem:[#allocation5 + $0x1c0] sm:$0xff] }
 0xb4a   : > { %2349 = vmatpush.msra.mxu2 %v2302_v57 }
 0xb4b   : > { %2367 = vmatpush.msrb.mxu3 %v2309_v37  ;;  %2329 = vmatpush.msrb.mxu1 %v2301_v12  ;;  %v2270_v37 = vld [vmem:[#allocation5 + $0x190] sm:$0xff] }
 0xb4c   : > { %2350 = vmatpush.msra.mxu2 %v2299_v61 }
 0xb4d   : > { %2368 = vmatpush.msrb.mxu3 %v2306_v55  ;;  %2330 = vmatpush.msrb.mxu1 %v2298_v60 }
 0xb4e   : > { %2351 = vmatpush.msra.mxu2 %v2296_v58 }
 0xb4f   : > { %2369 = vmatpush.msrb.mxu3 %v2303_v59  ;;  %2331 = vmatpush.msrb.mxu1 %v2295_v63 }
 0xb51   : > { %2370 = vmatpush.msrb.mxu3 %v2300_v62 }
 0xbc5   : > { %v2135_v7 = vpop.f32.mrf.mxu1 }
 0xbc6   : > { %v2136_v26 = vadd.f32 %v2135_v7, %v2114_v35  ;;  %v2297_v35 = vld [vmem:[#allocation5 + $0x268] sm:$0xff]  ;;  %v2292_v7 = vld [vmem:[#allocation5 + $0x240] sm:$0xff] }
 0xbc7   : > { %2371 = vmatpush.msrb.mxu3 %v2297_v35  ;;  %2332 = vmatpush.msrb.mxu1 %v2292_v7 }
 0xbc8   : > { %vm2158_vm4 = vcmp.ge.f32.partialorder %v2136_v26, 0.0  ;;  %v2164_v25 = vmul.f32 %v2162_v9, %v2136_v26 }
 0xbca   : > { %v2166_v56 = vsel %vm2158_vm4, %v2136_v26, %v2164_v25  ;;  %v2294_v26 = vld [vmem:[#allocation5 + $0x250] sm:$0xff]  ;;  %v2289_v25 = vld [vmem:[#allocation5 + $0x228] sm:$0xff] }
 0xbcb   : > { %v2155_v10 = vpop.f32.mrf.mxu2  ;;  %2220 = vmatmul.f32.vlgmr.msra.gmra.mxu3 %v2166_v56  ;;  %v2291_v56 = vld [vmem:[#allocation5 + $0x238] sm:$0xff]  ;;  %2333 = vmatpush.msrb.mxu1 %v2289_v25 }
 0xbcc   : > { %v2156_v3 = vadd.f32 %v2155_v10, %v2115_v54  ;;  %2372 = vmatpush.msrb.mxu3 %v2294_v26  ;;  %v2290_v54 = vld [vmem:[#allocation5 + $0x230] sm:$0xff] }
 0xbcd   : > { %v2286_v10 = vld [vmem:[#allocation5 + $0x210] sm:$0xff] }
 0xbce   : > { %vm2159_vm0 = vcmp.ge.f32.partialorder %v2156_v3, 0.0  ;;  %v2165_v11 = vmul.f32 %v2162_v9, %v2156_v3  ;;  %v2293_v9 = vld [vmem:[#allocation5 + $0x248] sm:$0xff]  ;;  %2373 = vmatpush.msrb.mxu3 %v2291_v56  ;;  %2334 = vmatpush.msrb.mxu1 %v2286_v10 }
 0xbcf   : > { %2352 = vmatpush.msra.mxu2 %v2293_v9  ;;  %v3670_v9 = vld [vmem:[%s5431_s15 + $0x3] sm:$0x7] }
 0xbd0   : > { %v2167_v8 = vsel %vm2159_vm0, %v2156_v3, %v2165_v11  ;;  %v2287_v3 = vld [vmem:[#allocation5 + $0x218] sm:$0xff]  ;;  %v2288_v11 = vld [vmem:[#allocation5 + $0x220] sm:$0xff]  ;;  %v2319_v26 = vperm.slane %v3670_v9, 0  ;;  %v2320_v56 = vperm.slane %v3670_v9, 1 }
 0xbd1   : > { %2240 = vmatmul.f32.vlgmr.msrb.gmra.mxu0 %v2167_v8  ;;  %2353 = vmatpush.msra.mxu2 %v2290_v54  ;;  %v2283_v8 = vld [vmem:[#allocation5 + $0x1f8] sm:$0xff] }
 0xbd2   : > { %2374 = vmatpush.msrb.mxu3 %v2288_v11  ;;  %2335 = vmatpush.msrb.mxu1 %v2283_v8 }
 0xbd3   : > { %2354 = vmatpush.msra.mxu2 %v2287_v3 }
 0xc4e   : > { %v2221_v14 = vpop.f32.mrf.mxu3  ;;  %v2241_v16 = vpop.f32.mrf.mxu0 }
 0xc4f   : > { %v2222_v15 = vadd.f32 %v3958_v13, %v2221_v14  ;;  %v2284_v13 = vld [vmem:[#allocation5 + $0x200] sm:$0xff]  ;;  %v2285_v14 = vld [vmem:[#allocation5 + $0x208] sm:$0xff] }
 0xc50   : > { %2355 = vmatpush.msra.mxu2 %v2284_v13  ;;  %2375 = vmatpush.msrb.mxu3 %v2285_v14 }
 0xc51   : > { %v2242_v17 = vadd.f32 %v2241_v16, %v2222_v15  ;;  %v2280_v15 = vld [vmem:[#allocation5 + $0x1e0] sm:$0xff]  ;;  %v2281_v16 = vld [vmem:[#allocation5 + $0x1e8] sm:$0xff] }
 0xc52   : > { %2336 = vmatpush.msrb.mxu1 %v2280_v15  ;;  %2356 = vmatpush.msra.mxu2 %v2281_v16 }
 0xc53   : > { %v5024_v18 = vadd.f32 %v2242_v17, %v4970_v27  ;;  %v2282_v17 = vld [vmem:[#allocation5 + $0x1f0] sm:$0xff] }
 0xc54   : > { %2376 = vmatpush.msrb.mxu3 %v2282_v17  ;;  %2337 = vmatpush.msrb.mxu1 %v2277_v20 }
 0xc55   : > { %2245 = vadd.xlane.f32.xlu2 %v5024_v18  ;;  %2357 = vmatpush.msra.mxu2 %v2278_v21 }
 0xc56   : > { %2377 = vmatpush.msrb.mxu3 %v2279_v23  ;;  %2338 = vmatpush.msrb.mxu1 %v2274_v24 }
 0xc57   : > { %2358 = vmatpush.msra.mxu2 %v2275_v31 }
 0xc58   : > { %2378 = vmatpush.msrb.mxu3 %v2276_v32 }
 0xcc8   : > { %v2246_v40 = vpop.xlane.xlu2 %2245 }
 0xcc9   : > { %v2247_v28 = vmul.f32 %v2246_v40, %v4645_v22  ;;  %v2271_v40 = vld [vmem:[#allocation5 + $0x198] sm:$0xff] }
 0xcca   : > { %2339 = vmatpush.msrb.mxu1 %v2271_v40 }
 0xccb   : > { %v5029_v27 = vsub.f32 %v5024_v18, %v2247_v28  ;;  %v2272_v28 = vld [vmem:[#allocation5 + $0x1a0] sm:$0xff] }
 0xccc   : > { %2359 = vmatpush.msra.mxu2 %v2272_v28  ;;  %2340 = vmatpush.msrb.mxu1 %v2268_v34 }
 0xccd   : > { %v2249_v33 = vmul.f32 %v5029_v27, %v5029_v27 }
 0xcce   : > { %2360 = vmatpush.msra.mxu2 %v2269_v36 }
 0xccf   : > { %2250 = vadd.xlane.f32.xlu1 %v2249_v33  ;;  %v2273_v33 = vld [vmem:[#allocation5 + $0x1a8] sm:$0xff] }
 0xcd0   : > { %2379 = vmatpush.msrb.mxu3 %v2273_v33 }
 0xcd2   : > { %2380 = vmatpush.msrb.mxu3 %v2270_v37 }
 0xd42   : > { %v2251_v41 = vpop.xlane.xlu1 %2250 }
 0xd43   : > { %v2252_v52 = vmul.f32 %v2251_v41, %v4645_v22 }
 0xd45   : > { %v2253_v55 = vadd.f32 1e-05, %v2252_v52 }
 0xd47   : > { %3985 = vrsqrt.f32 %v2253_v55  ;;  %vm2260_vm4 = vweird.f32 %v2253_v55 }
 0xd4d   : > { %v3986_v12 = vpop.eup %3985 }
 0xd4e   : > { %v2255_v57 = vmul.f32 %v3986_v12, %v2253_v55  ;;  %vm2261_vm15 = vweird.f32 %v3986_v12 }
 0xd4f   : > { %vm2262_vm0 = vmor %vm2260_vm4, %vm2261_vm15  ;;  %vm5514_vm15 = vcmask 261120  }
 0xd50   : > { %v2256_v59 = vmul.f32 %v3986_v12, %v2255_v57  ;;  %vm5515_vm4 = vmmov %vm5514_vm15 }
 0xd52   : > { %v2257_v60 = vmul.f32 0.5, %v2256_v59 }
 0xd54   : > { %v2258_v61 = vsub.f32 1.5, %v2257_v60 }
 0xd56   : > { %v2259_v62 = vmul.f32 %v3986_v12, %v2258_v61 }
 0xd58   : > { %v2263_v63 = vsel %vm2262_vm0, %v3986_v12, %v2259_v62  ;;  %vm5516_vm0 = vmmov %vm5515_vm4 }
 0xd59   : > { %v2264_v58 = vmul.f32 %v2263_v63, %v5029_v27  ;;  %v2321_v27 = vperm.slane %v3670_v9, 2 }
 0xd5b   : > { %v2265_v35 = vmul.f32 %v4984_v38, %v2264_v58 }
 0xd5d   : > { %v2266_v7 = vadd.f32 %v4990_v39, %v2265_v35 }
 0xd5f   : > { %2341 = vmatmul.f32.vlgmr.msrb.gmra.mxu1 %v2266_v7  ;;  %2361 = vmatmul.f32.vlgmr.msra.gmra.mxu2 %v2266_v7 }
 0xd60   : > { %2381 = vmatmul.f32.vlgmr.msrb.gmra.mxu3 %v2266_v7 }
 0xddc   : > { %v2342_v25 = vpop.f32.mrf.mxu1 }
 0xddd   : > { %v5040_v54 = vadd.f32 %v2342_v25, %v2319_v26 }
 0xddf   : > { %3671 = vmatmul.msk.f32.vlgmr.msra.gmra.mxu0 %vm5514_vm15, %v5040_v54  ;;  %vm5517_vm15 = vcmp.eq.s32.totalorder %v4731_v5, 7 }
 0xde2   : > { %v2362_v10 = vpop.f32.mrf.mxu2 }
 0xde3   : > { %v5044_v38 = vadd.f32 %v2362_v10, %v2320_v56  ;;  %v2382_v39 = vpop.f32.mrf.mxu3 }
 0xde4   : > { %v5046_v3 = vadd.f32 %v2382_v39, %v2321_v27 }
 0xde5   : > { %3672 = vmatpush.xpose.msk.msrb.mxu0 %vm5515_vm4, %v5044_v38  ;;  %vm5518_vm4 = vcmp.eq.s32.totalorder %v4731_v5, 11 }
 0xde8   : > { %3673 = vmatmul.msk.f32.vlgmr.msrb.gmra.mxu0 %vm5516_vm0, %v5040_v54  ;;  %vm5519_vm0 = vcmask 64512  }
 0xde9   : > { %2568 = vmatpush.msra.mxu0 %v5046_v3 }
 0xdeb   : > { %2589 = vmatpush.msrb.mxu0 %v4996_v53 }
 0xded   : > { %2590 = vmatpush.msrb.mxu0 %v5002_v2 }
 0xdef   : > { %2591 = vmatpush.msrb.mxu0 %v5008_v4 }
 0xdf1   : > { %2592 = vmatpush.msrb.mxu0 %v5014_v6 }
 0xe5c   : > { %v2422_v11 = vpop.f32.mrf.mxu0 }
 0xe5d   : > { %2462 = vperm.xlu1 %3894, %v2422_v11   ;;  %2432 = vperm.xlu0 %3889, %v2422_v11  }
 0xe5e   : > { %2427 = vperm.xlu2 %3888, %v2422_v11  }
 0xe65   : > { %3900 = vset.pattern.permute.xlu1 %v4294_v43  ;;  %3890 = vset.pattern.permute.xlu0 %v4289_v19 }
 0xe66   : > { %3891 = vset.pattern.permute.xlu2 %v4296_v45  ;;  %2498 = vperm.xlu1 %3900, %v2422_v11  }
 0xe67   : > { %2438 = vperm.xlu0 %3890, %v2422_v11   ;;  %2444 = vperm.xlu2 %3891, %v2422_v11  }
 0xe6e   : > { %3904 = vset.pattern.permute.xlu1 %v4288_v1 }
 0xe6f   : > { %3893 = vset.pattern.permute.xlu0 %v4291_v29  ;;  %3892 = vset.pattern.permute.xlu2 %v4298_v46 }
 0xe70   : > { %2456 = vperm.xlu0 %3893, %v2422_v11   ;;  %2450 = vperm.xlu2 %3892, %v2422_v11  }
 0xe78   : > { %3897 = vset.pattern.permute.xlu0 %v4301_v49  ;;  %3895 = vset.pattern.permute.xlu2 %v4292_v30 }
 0xe79   : > { %2480 = vperm.xlu0 %3897, %v2422_v11   ;;  %2468 = vperm.xlu2 %3895, %v2422_v11  }
 0xe81   : > { %3901 = vset.pattern.permute.xlu0 %v4303_v51  ;;  %3896 = vset.pattern.permute.xlu2 %v4300_v48 }
 0xe82   : > { %2504 = vperm.xlu0 %3901, %v2422_v11   ;;  %2474 = vperm.xlu2 %3896, %v2422_v11  }
 0xe8a   : > { %2573 = vrot.lane.b32.xlu0 %v5040_v54, %s4297_s4  ;;  %3898 = vset.pattern.permute.xlu2 %v4293_v42 }
 0xe8b   : > { %2486 = vperm.xlu2 %3898, %v2422_v11   ;;  %3903 = vset.pattern.permute.xlu0 %v4287_v0 }
 0xe92   : > { %2687 = vrot.lane.b32.xlu0 %v5044_v38, %s4297_s4 }
 0xe93   : > { %3899 = vset.pattern.permute.xlu2 %v4302_v50 }
 0xe94   : > { %2492 = vperm.xlu2 %3899, %v2422_v11  }
 0xe9c   : > { %3902 = vset.pattern.permute.xlu2 %v4295_v44 }
 0xe9d   : > { %2510 = vperm.xlu2 %3902, %v2422_v11  }
 0xea5   : > { %3906 = vset.pattern.permute.xlu2 %v4296_v45 }
 0xeb8   : > { %v2428_v8 = vpop.permute.xlu2 %2427 }
 0xeb9   : > { %v2430_v20 = vsel %vm1265_vm9, %v2428_v8, 0.0 }
 0xec1   : > { %v2445_v13 = vpop.permute.xlu2 %2444 }
 0xec2   : > { %v2447_v40 = vsel %vm1286_vm11, %v2445_v13, 0.0 }
 0xeca   : > { %v2451_v14 = vpop.permute.xlu2 %2450 }
 0xecb   : > { %v2453_v33 = vsel %vm1293_vm12, %v2451_v14, 0.0 }
 0xecf   : > { %v2433_v15 = vpop.permute.xlu0 %2432  ;;  %v2463_v34 = vpop.permute.xlu1 %2462 }
 0xed0   : > { %v2435_v17 = vsel %vm1272_vm8, %v2433_v15, 0.0  ;;  %v2465_v55 = vsel %vm1307_vm14, %v2463_v34, 0.0 }
 0xed1   : > { %v2436_v21 = vadd.f32 %v2435_v17, %v2430_v20  ;;  %v2535_v17 = vpop.f32.mrf.mxu0 }
 0xed3   : > { %v2469_v16 = vpop.permute.xlu2 %2468 }
 0xed4   : > { %v2471_v59 = vsel %vm5517_vm15, %v2469_v16, 0.0  ;;  %vm5520_vm15 = vcmask 261120  }
 0xed8   : > { %v2499_v26 = vpop.permute.xlu1 %2498 }
 0xed9   : > { %v2439_v23 = vpop.permute.xlu0 %2438  ;;  %v2501_v10 = vsel %vm1349_vm5, %v2499_v26, 0.0 }
 0xeda   : > { %v2441_v24 = vsel %vm1279_vm10, %v2439_v23, 0.0 }
 0xedb   : > { %v2442_v31 = vadd.f32 %v2441_v24, %v2436_v21 }
 0xedc   : > { %v2475_v32 = vpop.permute.xlu2 %2474 }
 0xedd   : > { %v2448_v28 = vadd.f32 %v2447_v40, %v2442_v31  ;;  %v2477_v61 = vsel %vm1321_vm1, %v2475_v32, 0.0 }
 0xedf   : > { %v2454_v37 = vadd.f32 %v2453_v33, %v2448_v28 }
 0xee2   : > { %v2457_v36 = vpop.permute.xlu0 %2456 }
 0xee3   : > { %v2459_v41 = vsel %vm1300_vm13, %v2457_v36, 0.0 }
 0xee4   : > { %v2460_v52 = vadd.f32 %v2459_v41, %v2454_v37 }
 0xee5   : > { %v2487_v12 = vpop.permute.xlu2 %2486 }
 0xee6   : > { %v2466_v57 = vadd.f32 %v2465_v55, %v2460_v52  ;;  %v2489_v7 = vsel %vm1335_vm3, %v2487_v12, 0.0  ;;  %v2389_v52 = vld [vmem:[#allocation7 + $0x98] sm:$0xff] }
 0xee8   : > { %v2472_v60 = vadd.f32 %v2471_v59, %v2466_v57 }
 0xeea   : > { %v2478_v62 = vadd.f32 %v2477_v61, %v2472_v60 }
 0xeeb   : > { %v2481_v63 = vpop.permute.xlu0 %2480 }
 0xeec   : > { %v2483_v58 = vsel %vm1328_vm2, %v2481_v63, 0.0 }
 0xeed   : > { %v2484_v35 = vadd.f32 %v2483_v58, %v2478_v62 }
 0xeee   : > { %v2493_v9 = vpop.permute.xlu2 %2492 }
 0xeef   : > { %v2490_v25 = vadd.f32 %v2489_v7, %v2484_v35  ;;  %v2495_v56 = vsel %vm5518_vm4, %v2493_v9, 0.0  ;;  %vm5521_vm4 = vmmov %vm5520_vm15 }
 0xef1   : > { %v2496_v27 = vadd.f32 %v2495_v56, %v2490_v25 }
 0xef3   : > { %v2502_v39 = vadd.f32 %v2501_v10, %v2496_v27 }
 0xef4   : > { %v2505_v11 = vpop.permute.xlu0 %2504 }
 0xef5   : > { %v2507_v8 = vsel %vm1356_vm6, %v2505_v11, 0.0 }
 0xef6   : > { %v2508_v13 = vadd.f32 %v2507_v8, %v2502_v39 }
 0xef7   : > { %v2511_v14 = vpop.permute.xlu2 %2510 }
 0xef8   : > { %v2513_v15 = vsel %vm5461_vm7, %v2511_v14, 0.0  ;;  %vm5523_vm7 = vmmov %vm5521_vm4 }
 0xef9   : > { %v2514_v16 = vadd.f32 %v2513_v15, %v2508_v13 }
 0xefb   : > { %v2536_v20 = vadd.f32 %v2535_v17, %v2514_v16 }
 0xefc   : > { %v2574_v21 = vpop.permute.xlu0 %2573 }
 0xefd   : > { %v2538_v23 = vmul.f32 0.17677669, %v2536_v20 }
 0xeff   : > { %v2539_v24 = vsel %vm5519_vm0, %v2538_v23, -inf }
 0xf00   : > { %2540 = vmax.xlane.f32.xlu1 %v2539_v24 }
 0xf04   : > { %v2688_v31 = vpop.permute.xlu0 %2687 }
 0xf05   : > { %3676 = vmatpush.xpose.msk.msra.mxu1 %vm5520_vm15, %v2688_v31  ;;  %vm5522_vm15 = vmmov %vm5519_vm0 }
 0xf08   : > { %3677 = vmatmul.msk.f32.vlgmr.msra.gmra.mxu1 %vm5521_vm4, %v2574_v21 }
 0xf09   : > { %2812 = vmatpush.msrb.mxu1 %v4996_v53 }
 0xf0b   : > { %2813 = vmatpush.msrb.mxu1 %v5002_v2 }
 0xf0d   : > { %2814 = vmatpush.msrb.mxu1 %v5008_v4 }
 0xf0f   : > { %2815 = vmatpush.msrb.mxu1 %v5014_v6 }
 0xf11   : > { %3012 = vmatpush.msra.mxu1 %v4996_v53  ;;  %v2388_v53 = vld [vmem:[#allocation7 + $0x90] sm:$0xff] }
 0xf13   : > { %3013 = vmatpush.msra.mxu1 %v5002_v2  ;;  %v2387_v2 = vld [vmem:[#allocation7 + $0x88] sm:$0xff] }
 0xf15   : > { %3014 = vmatpush.msra.mxu1 %v5008_v4  ;;  %v2386_v4 = vld [vmem:[#allocation7 + $0x80] sm:$0xff] }
 0xf17   : > { %3015 = vmatpush.msra.mxu1 %v5014_v6 }
 0xf73   : > { %v2541_v32 = vpop.xlane.xlu1 %2540 }
 0xf74   : > { %v2542_v40 = vsub.f32 %v2538_v23, %v2541_v32 }
 0xf76   : > { %v2543_v28 = vmul.f32 1.442695, %v2542_v40 }
 0xf78   : > { %3987 = vpow2.f32 %v2543_v28 }
 0xf7e   : > { %v3988_v33 = vpop.eup %3987 }
 0xf7f   : > { %v2545_v34 = vsel %vm5519_vm0, %v3988_v33, 0.0  ;;  %vm5525_vm0 = vcmp.eq.s32.totalorder %v4731_v5, 7 }
 0xf80   : > { %2546 = vadd.xlane.f32.xlu2 %v2545_v34 }
 0xff3   : > { %v2547_v36 = vpop.xlane.xlu2 %2546 }
 0xff4   : > { %3989 = vrcp.f32 %v2547_v36 }
 0xffa   : > { %v3990_v37 = vpop.eup %3989 }
 0xffb   : > { %v2549_v41 = vmul.f32 %v3990_v37, %v3988_v33 }
 0xffd   : > { %3674 = vmatmul.msk.f32.vlgmr.msra.gmra.mxu0 %vm5522_vm15, %v2549_v41  ;;  %vm5526_vm15 = vcmp.eq.s32.totalorder %v4731_v5, 11 }
 0xffe   : > { %2788 = vmatpush.msra.mxu0 %v2389_v52 }
0x1000   : > { %2789 = vmatpush.msra.mxu0 %v2388_v53 }
0x1002   : > { %2790 = vmatpush.msra.mxu0 %v2387_v2 }
0x1004   : > { %2791 = vmatpush.msra.mxu0 %v2386_v4 }
0x1005   : > { %3675 = vmatmul.msk.f32.vlgmr.msrb.gmra.mxu0 %vm5521_vm4, %v2574_v21 }
0x107a   : > { %v2570_v6 = vpop.f32.mrf.mxu0 }
0x107b   : > { %3680 = vmatmul.msk.f32.vlgmr.msra.gmra.mxu0 %vm5523_vm7, %v2570_v6  ;;  %vm5524_vm7 = vmmov %vm5521_vm4  ;;  %vm5527_vm4 = vcmp.eq.s32.totalorder %v4731_v5, 14 }
0x1082   : > { %v2594_v55 = vpop.f32.mrf.mxu0 }
0x1083   : > { %2616 = vperm.xlu2 %3906, %v2594_v55   ;;  %2604 = vperm.xlu1 %3904, %v2594_v55  }
0x1084   : > { %2599 = vperm.xlu0 %3903, %v2594_v55  }
0x108b   : > { %3909 = vset.pattern.permute.xlu2 %v4299_v47  ;;  %3908 = vset.pattern.permute.xlu1 %v4291_v29 }
0x108c   : > { %3905 = vset.pattern.permute.xlu0 %v4289_v19  ;;  %2634 = vperm.xlu2 %3909, %v2594_v55  }
0x108d   : > { %2628 = vperm.xlu1 %3908, %v2594_v55   ;;  %2610 = vperm.xlu0 %3905, %v2594_v55  }
0x1094   : > { %3912 = vset.pattern.permute.xlu2 %v4301_v49 }
0x1095   : > { %3910 = vset.pattern.permute.xlu1 %v4292_v30  ;;  %3907 = vset.pattern.permute.xlu0 %v4298_v46 }
0x1096   : > { %2652 = vperm.xlu2 %3912, %v2594_v55   ;;  %2640 = vperm.xlu1 %3910, %v2594_v55  }
0x1097   : > { %2622 = vperm.xlu0 %3907, %v2594_v55  }
0x109e   : > { %3914 = vset.pattern.permute.xlu2 %v4302_v50  ;;  %3913 = vset.pattern.permute.xlu1 %v4293_v42 }
0x109f   : > { %3911 = vset.pattern.permute.xlu0 %v4300_v48  ;;  %2664 = vperm.xlu2 %3914, %v2594_v55  }
0x10a0   : > { %2658 = vperm.xlu1 %3913, %v2594_v55   ;;  %2646 = vperm.xlu0 %3911, %v2594_v55  }
0x10a7   : > { %3917 = vset.pattern.permute.xlu2 %v4295_v44 }
0x10a8   : > { %3915 = vset.pattern.permute.xlu1 %v4294_v43  ;;  %3916 = vset.pattern.permute.xlu0 %v4303_v51 }
0x10a9   : > { %2682 = vperm.xlu2 %3917, %v2594_v55   ;;  %2670 = vperm.xlu1 %3915, %v2594_v55  }
0x10aa   : > { %2676 = vperm.xlu0 %3916, %v2594_v55  }
0x10b1   : > { %2796 = vrot.lane.b32.xlu2 %v5040_v54, %s4304_s9  ;;  %3918 = vset.pattern.permute.xlu1 %v4287_v0 }
0x10b2   : > { %2996 = vrot.lane.b32.xlu0 %v5040_v54, %s4305_s27  ;;  %3920 = vset.pattern.permute.xlu2 %v4289_v19 }
0x10b3   : > { %3919 = vset.pattern.permute.xlu0 %v4288_v1 }
0x10ba   : > { %2724 = vrot.lane.b32.xlu0 %v5046_v3, %s4297_s4 }
0x10c2   : > { %2910 = vrot.lane.b32.xlu0 %v5044_v38, %s4304_s9 }
0x10ca   : > { %3110 = vrot.lane.b32.xlu0 %v5044_v38, %s4305_s27 }
0x10dd   : > { %v2617_v12 = vpop.permute.xlu2 %2616 }
0x10de   : > { %v2619_v25 = vsel %vm1286_vm11, %v2617_v12, 0.0  ;;  %v2708_v12 = vpop.f32.mrf.mxu1 }
0x10e6   : > { %v2635_v57 = vpop.permute.xlu2 %2634 }
0x10e7   : > { %v2637_v15 = vsel %vm1307_vm14, %v2635_v57, 0.0 }
0x10f0   : > { %v2653_v59 = vpop.permute.xlu2 %2652 }
0x10f1   : > { %v2655_v32 = vsel %vm1328_vm2, %v2653_v59, 0.0 }
0x10f5   : > { %v2605_v60 = vpop.permute.xlu1 %2604 }
0x10f6   : > { %v2600_v61 = vpop.permute.xlu0 %2599  ;;  %v2607_v58 = vsel %vm1272_vm8, %v2605_v60, 0.0 }
0x10f7   : > { %v2602_v35 = vsel %vm1265_vm9, %v2600_v61, 0.0 }
0x10f8   : > { %v2608_v9 = vadd.f32 %v2607_v58, %v2602_v35 }
0x10f9   : > { %v2665_v62 = vpop.permute.xlu2 %2664 }
0x10fa   : > { %v2667_v34 = vsel %vm5526_vm15, %v2665_v62, 0.0  ;;  %vm5529_vm15 = vmmov %vm5524_vm7 }
0x10ff   : > { %v2629_v54 = vpop.permute.xlu1 %2628  ;;  %v2611_v63 = vpop.permute.xlu0 %2610 }
0x1100   : > { %v2613_v7 = vsel %vm1279_vm10, %v2611_v63, 0.0  ;;  %v2631_v13 = vsel %vm1300_vm13, %v2629_v54, 0.0 }
0x1101   : > { %v2614_v38 = vadd.f32 %v2613_v7, %v2608_v9 }
0x1103   : > { %v2683_v26 = vpop.permute.xlu2 %2682  ;;  %v2620_v27 = vadd.f32 %v2619_v25, %v2614_v38 }
0x1104   : > { %v2685_v6 = vsel %vm5527_vm4, %v2683_v26, 0.0 }
0x1108   : > { %v2641_v56 = vpop.permute.xlu1 %2640 }
0x1109   : > { %v2623_v10 = vpop.permute.xlu0 %2622  ;;  %v2643_v17 = vsel %vm5525_vm0, %v2641_v56, 0.0  ;;  %vm5528_vm0 = vcmask 64512  }
0x110a   : > { %v2625_v39 = vsel %vm1293_vm12, %v2623_v10, 0.0  ;;  %vm5530_vm4 = vmmov %vm5528_vm0 }
0x110b   : > { %v2626_v11 = vadd.f32 %v2625_v39, %v2620_v27  ;;  %v5156_v8 = vpop.permute.xlu2 %2796 }
0x110c   : > { %3681 = vmatmul.msk.f32.vlgmr.msrb.gmra.mxu1 %vm5524_vm7, %v5156_v8 }
0x110d   : > { %v2632_v14 = vadd.f32 %v2631_v13, %v2626_v11 }
0x110f   : > { %v2638_v16 = vadd.f32 %v2637_v15, %v2632_v14 }
0x1111   : > { %v2644_v20 = vadd.f32 %v2643_v17, %v2638_v16 }
0x1112   : > { %v2659_v21 = vpop.permute.xlu1 %2658  ;;  %v2647_v23 = vpop.permute.xlu0 %2646 }
0x1113   : > { %v2649_v24 = vsel %vm1321_vm1, %v2647_v23, 0.0  ;;  %v2661_v28 = vsel %vm1335_vm3, %v2659_v21, 0.0 }
0x1114   : > { %v2650_v31 = vadd.f32 %v2649_v24, %v2644_v20  ;;  %v2390_v24 = vld [vmem:[#allocation7 + $0xa0] sm:$0xff] }
0x1116   : > { %v2656_v40 = vadd.f32 %v2655_v32, %v2650_v31 }
0x1118   : > { %v2662_v33 = vadd.f32 %v2661_v28, %v2656_v40 }
0x111a   : > { %v2668_v36 = vadd.f32 %v2667_v34, %v2662_v33 }
0x111b   : > { %v2671_v37 = vpop.permute.xlu1 %2670 }
0x111c   : > { %v2673_v41 = vsel %vm1349_vm5, %v2671_v37, 0.0  ;;  %v2677_v52 = vpop.permute.xlu0 %2676 }
0x111d   : > { %v2674_v53 = vadd.f32 %v2673_v41, %v2668_v36  ;;  %v2679_v2 = vsel %vm1356_vm6, %v2677_v52, 0.0 }
0x111f   : > { %v2680_v4 = vadd.f32 %v2679_v2, %v2674_v53 }
0x1121   : > { %v2686_v55 = vadd.f32 %v2685_v6, %v2680_v4 }
0x1123   : > { %v2709_v57 = vadd.f32 %v2708_v12, %v2686_v55 }
0x1124   : > { %v5180_v59 = vpop.permute.xlu0 %2996 }
0x1125   : > { %3686 = vmatmul.msk.f32.vlgmr.msra.gmra.mxu1 %vm5524_vm7, %v5180_v59  ;;  %v2711_v60 = vmul.f32 0.17677669, %v2709_v57  ;;  %vm5531_vm7 = vmmov %vm5528_vm0 }
0x1127   : > { %v2712_v61 = vsel %vm5528_vm0, %v2711_v60, -inf  ;;  %vm5532_vm0 = vmmov %vm5529_vm15 }
0x1128   : > { %2713 = vmax.xlane.f32.xlu1 %v2712_v61 }
0x112c   : > { %v2725_v62 = vpop.permute.xlu0 %2724 }
0x112d   : > { %2745 = vmatpush.msrb.mxu2 %v2725_v62 }
0x1134   : > { %v2911_v54 = vpop.permute.xlu0 %2910 }
0x1135   : > { %3682 = vmatpush.xpose.msk.msra.mxu2 %vm5529_vm15, %v2911_v54  ;;  %vm5533_vm15 = vmmov %vm5532_vm0 }
0x1189   : > { %v2817_v63 = vpop.f32.mrf.mxu1 }
0x118a   : > { %2827 = vperm.xlu0 %3919, %v2817_v63   ;;  %2822 = vperm.xlu1 %3918, %v2817_v63  }
0x1192   : > { %3921 = vset.pattern.permute.xlu0 %v4296_v45  ;;  %3922 = vset.pattern.permute.xlu1 %v4298_v46 }
0x1193   : > { %2839 = vperm.xlu0 %3921, %v2817_v63   ;;  %2845 = vperm.xlu1 %3922, %v2817_v63  }
0x119b   : > { %3927 = vset.pattern.permute.xlu0 %v4292_v30  ;;  %v2714_v58 = vpop.xlane.xlu1 %2713  ;;  %3923 = vset.pattern.permute.xlu1 %v4287_v0 }
0x119c   : > { %v2715_v35 = vsub.f32 %v2711_v60, %v2714_v58  ;;  %2863 = vperm.xlu0 %3927, %v2817_v63  }
0x119e   : > { %v2716_v7 = vmul.f32 1.442695, %v2715_v35 }
0x11a0   : > { %3991 = vpow2.f32 %v2716_v7 }
0x11a2   : > { %v3017_v9 = vpop.f32.mrf.mxu1 }
0x11a3   : > { %3022 = vperm.xlu1 %3923, %v3017_v9  }
0x11a4   : > { %3928 = vset.pattern.permute.xlu0 %v4291_v29 }
0x11a5   : > { %2851 = vperm.xlu0 %3928, %v2817_v63  }
0x11a6   : > { %v3992_v26 = vpop.eup %3991 }
0x11a7   : > { %v2718_v38 = vsel %vm5530_vm4, %v3992_v26, 0.0  ;;  %vm5534_vm4 = vmmov %vm5532_vm0 }
0x11a8   : > { %2719 = vadd.xlane.f32.xlu2 %v2718_v38 }
0x11ab   : > { %3925 = vset.pattern.permute.xlu1 %v4299_v47 }
0x11ac   : > { %2857 = vperm.xlu1 %3925, %v2817_v63  }
0x11ad   : > { %3051 = vperm.xlu0 %3928, %v3017_v9  }
0x11b4   : > { %3929 = vset.pattern.permute.xlu1 %v4296_v45 }
0x11b5   : > { %3039 = vperm.xlu1 %3929, %v3017_v9   ;;  %3937 = vset.pattern.permute.xlu0 %v4294_v43 }
0x11b6   : > { %2893 = vperm.xlu0 %3937, %v2817_v63  }
0x11bd   : > { %3931 = vset.pattern.permute.xlu1 %v4298_v46  ;;  %v2392_v46 = vld [vmem:[#allocation7 + $0xb0] sm:$0xff] }
0x11be   : > { %3045 = vperm.xlu1 %3931, %v3017_v9   ;;  %3942 = vset.pattern.permute.xlu0 %v4293_v42 }
0x11bf   : > { %3081 = vperm.xlu0 %3942, %v3017_v9  }
0x11c0   : > { %2833 = vperm.xlu2 %3920, %v2817_v63  }
0x11c6   : > { %3933 = vset.pattern.permute.xlu1 %v4293_v42 }
0x11c7   : > { %2881 = vperm.xlu1 %3933, %v2817_v63   ;;  %3947 = vset.pattern.permute.xlu0 %v4291_v29  ;;  %v3111_v29 = vpop.permute.xlu0 %3110 }
0x11c8   : > { %3924 = vset.pattern.permute.xlu2 %v4288_v1 }
0x11c9   : > { %3027 = vperm.xlu2 %3924, %v3017_v9  }
0x11cf   : > { %3935 = vset.pattern.permute.xlu1 %v4302_v50 }
0x11d0   : > { %2887 = vperm.xlu1 %3935, %v2817_v63  }
0x11d1   : > { %3926 = vset.pattern.permute.xlu2 %v4289_v19 }
0x11d2   : > { %3033 = vperm.xlu2 %3926, %v3017_v9  }
0x11d8   : > { %3938 = vset.pattern.permute.xlu1 %v4300_v48 }
0x11d9   : > { %3069 = vperm.xlu1 %3938, %v3017_v9  }
0x11da   : > { %3930 = vset.pattern.permute.xlu2 %v4300_v48 }
0x11db   : > { %2869 = vperm.xlu2 %3930, %v2817_v63  }
0x11e1   : > { %3940 = vset.pattern.permute.xlu1 %v4301_v49 }
0x11e2   : > { %3075 = vperm.xlu1 %3940, %v3017_v9  }
0x11e3   : > { %3932 = vset.pattern.permute.xlu2 %v4301_v49  ;;  %v2391_v49 = vld [vmem:[#allocation7 + $0xa8] sm:$0xff] }
0x11e4   : > { %2875 = vperm.xlu2 %3932, %v2817_v63  }
0x11ea   : > { %3943 = vset.pattern.permute.xlu1 %v4302_v50 }
0x11eb   : > { %3087 = vperm.xlu1 %3943, %v3017_v9  }
0x11ec   : > { %3934 = vset.pattern.permute.xlu2 %v4299_v47 }
0x11ed   : > { %3057 = vperm.xlu2 %3934, %v3017_v9  }
0x11f3   : > { %3945 = vset.pattern.permute.xlu1 %v4303_v51 }
0x11f4   : > { %3099 = vperm.xlu1 %3945, %v3017_v9  }
0x11f5   : > { %3936 = vset.pattern.permute.xlu2 %v4292_v30 }
0x11f6   : > { %3063 = vperm.xlu2 %3936, %v3017_v9  }
0x11fc   : > { %3948 = vset.pattern.permute.xlu1 %v4296_v45  ;;  %v2823_v30 = vpop.permute.xlu1 %2822  ;;  %v2828_v25 = vpop.permute.xlu0 %2827 }
0x11fd   : > { %v2825_v15 = vsel %vm1265_vm9, %v2823_v30, 0.0  ;;  %v2830_v16 = vsel %vm1272_vm8, %v2828_v25, 0.0 }
0x11fe   : > { %3939 = vset.pattern.permute.xlu2 %v4303_v51  ;;  %v2831_v20 = vadd.f32 %v2830_v16, %v2825_v15 }
0x11ff   : > { %2899 = vperm.xlu2 %3939, %v2817_v63  }
0x1205   : > { %v2840_v10 = vpop.permute.xlu0 %2839 }
0x1206   : > { %v2842_v40 = vsel %vm1286_vm11, %v2840_v10, 0.0 }
0x1207   : > { %3941 = vset.pattern.permute.xlu2 %v4295_v44 }
0x1208   : > { %2905 = vperm.xlu2 %3941, %v2817_v63  }
0x1210   : > { %3944 = vset.pattern.permute.xlu2 %v4294_v43  ;;  %v2846_v43 = vpop.permute.xlu1 %2845 }
0x1211   : > { %3093 = vperm.xlu2 %3944, %v3017_v9   ;;  %v2848_v41 = vsel %vm1293_vm12, %v2846_v43, 0.0 }
0x1218   : > { %v3023_v47 = vpop.permute.xlu1 %3022 }
0x1219   : > { %3946 = vset.pattern.permute.xlu2 %v4295_v44  ;;  %v2393_v44 = vld [vmem:[#allocation7 + $0xb8] sm:$0xff]  ;;  %v3025_v34 = vsel %vm1265_vm9, %v3023_v47, 0.0 }
0x121a   : > { %3105 = vperm.xlu2 %3946, %v3017_v9   ;;  %2765 = vmatpush.msra.mxu3 %v2393_v44 }
0x121b   : > { %v2720_v0 = vpop.xlane.xlu2 %2719 }
0x121c   : > { %3993 = vrcp.f32 %v2720_v0  ;;  %2766 = vmatpush.msra.mxu3 %v2392_v46 }
0x121e   : > { %2767 = vmatpush.msra.mxu3 %v2391_v49 }
0x1220   : > { %v2858_v50 = vpop.permute.xlu1 %2857  ;;  %2768 = vmatpush.msra.mxu3 %v2390_v24 }
0x1221   : > { %v2860_v60 = vsel %vm1307_vm14, %v2858_v50, 0.0 }
0x1222   : > { %v3994_v1 = vpop.eup %3993 }
0x1223   : > { %v2722_v19 = vmul.f32 %v3994_v1, %v3992_v26  ;;  %v2834_v42 = vpop.permute.xlu2 %2833 }
0x1224   : > { %v2836_v17 = vsel %vm1279_vm10, %v2834_v42, 0.0 }
0x1225   : > { %3678 = vmatmul.msk.f32.vlgmr.msrb.gmra.mxu2 %vm5531_vm7, %v2722_v19  ;;  %v2837_v21 = vadd.f32 %v2836_v17, %v2831_v20 }
0x1226   : > { %3687 = vmatpush.xpose.msk.msrb.mxu2 %vm5532_vm0, %v3111_v29 }
0x1227   : > { %v2843_v33 = vadd.f32 %v2842_v40, %v2837_v21 }
0x1228   : > { %v3040_v56 = vpop.permute.xlu1 %3039 }
0x1229   : > { %v2849_v52 = vadd.f32 %v2848_v41, %v2843_v33  ;;  %v3042_v6 = vsel %vm1286_vm11, %v3040_v56, 0.0  ;;  %vm5538_vm11 = vmmov %vm5532_vm0 }
0x122b   : > { %v3028_v48 = vpop.permute.xlu2 %3027 }
0x122c   : > { %v3030_v28 = vsel %vm1272_vm8, %v3028_v48, 0.0  ;;  %vm5535_vm8 = vcmp.eq.s32.totalorder %v4731_v5, 7 }
0x122d   : > { %3683 = vmatmul.msk.f32.vlgmr.msra.gmra.mxu2 %vm5533_vm15, %v5156_v8  ;;  %v2864_v8 = vpop.permute.xlu0 %2863  ;;  %v3031_v37 = vadd.f32 %v3030_v28, %v3025_v34  ;;  %vm5536_vm9 = vmmov %vm5535_vm8 }
0x122e   : > { %v2866_v63 = vsel %vm5535_vm8, %v2864_v8, 0.0  ;;  %vm5548_vm15 = vmmov %vm5532_vm0 }
0x1230   : > { %v3046_v39 = vpop.permute.xlu1 %3045 }
0x1231   : > { %v3048_v61 = vsel %vm1293_vm12, %v3046_v39, 0.0 }
0x1233   : > { %v3034_v51 = vpop.permute.xlu2 %3033 }
0x1234   : > { %v3036_v36 = vsel %vm1279_vm10, %v3034_v51, 0.0  ;;  %vm5537_vm10 = vcmp.eq.s32.totalorder %v4731_v5, 11 }
0x1235   : > { %3688 = vmatmul.msk.f32.vlgmr.msrb.gmra.mxu2 %vm5534_vm4, %v5180_v59  ;;  %v2852_v23 = vpop.permute.xlu0 %2851  ;;  %v3037_v53 = vadd.f32 %v3036_v36, %v3031_v37  ;;  %vm5539_vm12 = vmmov %vm5537_vm10 }
0x1236   : > { %v2854_v2 = vsel %vm1300_vm13, %v2852_v23, 0.0 }
0x1237   : > { %v3043_v55 = vadd.f32 %v3042_v6, %v3037_v53  ;;  %v2855_v12 = vadd.f32 %v2854_v2, %v2849_v52 }
0x1239   : > { %v2882_v13 = vpop.permute.xlu1 %2881  ;;  %v2861_v62 = vadd.f32 %v2860_v60, %v2855_v12  ;;  %v3049_v54 = vadd.f32 %v3048_v61, %v3043_v55 }
0x123a   : > { %v2884_v46 = vsel %vm1335_vm3, %v2882_v13, 0.0 }
0x123b   : > { %v2870_v27 = vpop.permute.xlu2 %2869  ;;  %v2867_v9 = vadd.f32 %v2866_v63, %v2861_v62 }
0x123c   : > { %v2872_v35 = vsel %vm1321_vm1, %v2870_v27, 0.0 }
0x123d   : > { %v3052_v4 = vpop.permute.xlu0 %3051  ;;  %v2873_v19 = vadd.f32 %v2872_v35, %v2867_v9 }
0x123e   : > { %v3054_v58 = vsel %vm1300_vm13, %v3052_v4, 0.0  ;;  %vm5540_vm13 = vcmp.eq.s32.totalorder %v4731_v5, 14 }
0x123f   : > { %v3055_v26 = vadd.f32 %v3054_v58, %v3049_v54 }
0x1242   : > { %v2888_v31 = vpop.permute.xlu1 %2887 }
0x1243   : > { %v2876_v11 = vpop.permute.xlu2 %2875  ;;  %v2890_v51 = vsel %vm5537_vm10, %v2888_v31, 0.0 }
0x1244   : > { %v2878_v0 = vsel %vm1328_vm2, %v2876_v11, 0.0 }
0x1245   : > { %v2894_v38 = vpop.permute.xlu0 %2893  ;;  %v2879_v43 = vadd.f32 %v2878_v0, %v2873_v19  ;;  %v2395_v0 = vld [vmem:[#allocation7 + $0xc8] sm:$0xff] }
0x1246   : > { %v2896_v8 = vsel %vm1349_vm5, %v2894_v38, 0.0  ;;  %v2396_v38 = vld [vmem:[#allocation7 + $0xd0] sm:$0xff] }
0x1247   : > { %v2885_v48 = vadd.f32 %v2884_v46, %v2879_v43  ;;  %v2401_v46 = vld [vmem:[#allocation7 + $0xf8] sm:$0xff] }
0x1249   : > { %v2891_v27 = vadd.f32 %v2890_v51, %v2885_v48  ;;  %v2399_v48 = vld [vmem:[#allocation7 + $0xe8] sm:$0xff] }
0x124b   : > { %v3058_v14 = vpop.permute.xlu2 %3057  ;;  %v3070_v57 = vpop.permute.xlu1 %3069  ;;  %v2897_v15 = vadd.f32 %v2896_v8, %v2891_v27 }
0x124c   : > { %v3060_v7 = vsel %vm1307_vm14, %v3058_v14, 0.0  ;;  %v3072_v47 = vsel %vm1321_vm1, %v3070_v57, 0.0  ;;  %vm5541_vm14 = vmmov %vm5540_vm13  ;;  %v5289_v57 = vld [vmem:[%s5499_s29] ss:$0 sm:$0xff] }
0x124d   : > { %v3061_v29 = vadd.f32 %v3060_v7, %v3055_v26  ;;  %v3082_v50 = vpop.permute.xlu0 %3081  ;;  %vm5542_vm1 = vmmov %vm5531_vm7  ;;  %v2397_v26 = vld [vmem:[#allocation7 + $0xd8] sm:$0xff] }
0x124e   : > { %v3084_v13 = vsel %vm1335_vm3, %v3082_v50, 0.0  ;;  %vm5544_vm3 = vmmov %vm5542_vm1  ;;  %2987 = vmatpush.msrb.mxu0 %v2397_v26  ;;  %v3331_v26 = vld [vmem:[#allocation10 + $0x178] sm:$0xff] }
0x124f   : > { %vm5547_vm7 = vmmov %vm5542_vm1 }
0x1250   : > { %2988 = vmatpush.msrb.mxu0 %v2396_v38  ;;  %v3330_v38 = vld [vmem:[#allocation10 + $0x170] sm:$0xff] }
0x1252   : > { %2989 = vmatpush.msrb.mxu0 %v2395_v0  ;;  %v3347_v0 = vld [vmem:[#allocation10 + $0x1f8] sm:$0xff] }
0x1253   : > { %v3064_v32 = vpop.permute.xlu2 %3063 }
0x1254   : > { %v3066_v1 = vsel %vm5536_vm9, %v3064_v32, 0.0  ;;  %v3076_v30 = vpop.permute.xlu1 %3075 }
0x1255   : > { %v3067_v44 = vadd.f32 %v3066_v1, %v3061_v29  ;;  %v3078_v25 = vsel %vm1328_vm2, %v3076_v30, 0.0  ;;  %vm5543_vm2 = vmmov %vm5542_vm1  ;;  %v2394_v1 = vld [vmem:[#allocation7 + $0xc0] sm:$0xff] }
0x1256   : > { %2990 = vmatpush.msrb.mxu0 %v2394_v1  ;;  %v3329_v1 = vld [vmem:[#allocation10 + $0x168] sm:$0xff] }
0x1257   : > { %v3073_v49 = vadd.f32 %v3072_v47, %v3067_v44  ;;  %v2400_v47 = vld [vmem:[#allocation7 + $0xf0] sm:$0xff] }
0x1258   : > { %3187 = vmatpush.msra.mxu0 %v2401_v46  ;;  %v3327_v46 = vld [vmem:[#allocation10 + $0x158] sm:$0xff] }
0x1259   : > { %v3079_v56 = vadd.f32 %v3078_v25, %v3073_v49  ;;  %v2398_v49 = vld [vmem:[#allocation7 + $0xe0] sm:$0xff] }
0x125a   : > { %3188 = vmatpush.msra.mxu0 %v2400_v47  ;;  %v3343_v47 = vld [vmem:[#allocation10 + $0x1d8] sm:$0xff] }
0x125b   : > { %v2900_v59 = vpop.permute.xlu2 %2899  ;;  %v3085_v16 = vadd.f32 %v3084_v13, %v3079_v56  ;;  %v2793_v56 = vpop.f32.mrf.mxu0  ;;  %v3959_v13 = vld [vmem:[%s5433_s17 + $0x1] ss:$0 sm:$0xff] }
0x125c   : > { %v2902_v14 = vsel %vm1356_vm6, %v2900_v59, 0.0  ;;  %3189 = vmatpush.msra.mxu0 %v2399_v48  ;;  %v3326_v48 = vld [vmem:[#allocation10 + $0x150] sm:$0xff] }
0x125d   : > { %v3088_v10 = vpop.permute.xlu1 %3087  ;;  %v2903_v21 = vadd.f32 %v2902_v14, %v2897_v15 }
0x125e   : > { %v3090_v17 = vsel %vm5539_vm12, %v3088_v10, 0.0  ;;  %3190 = vmatpush.msra.mxu0 %v2398_v49  ;;  %v3342_v49 = vld [vmem:[#allocation10 + $0x1d0] sm:$0xff] }
0x125f   : > { %v3091_v24 = vadd.f32 %v3090_v17, %v3085_v16  ;;  %v3256_v16 = vld [vmem:[#allocation8 + $0x1f0] sm:$0xff]  ;;  %v3257_v17 = vld [vmem:[#allocation8 + $0x1f8] sm:$0xff] }
0x1260   : > { %3265 = vmatpush.msrb.mxu1 %v3256_v16  ;;  %3285 = vmatpush.msra.mxu2 %v3257_v17  ;;  %v3320_v17 = vld [vmem:[#allocation10 + $0x120] sm:$0xff] }
0x1263   : > { %v2906_v42 = vpop.permute.xlu2 %2905 }
0x1264   : > { %v2908_v20 = vsel %vm5540_vm13, %v2906_v42, 0.0  ;;  %vm3481_vm13 = vcmask 80896  }
0x1265   : > { %v2909_v31 = vadd.f32 %v2908_v20, %v2903_v21  ;;  %v3254_v20 = vld [vmem:[#allocation8 + $0x1e0] sm:$0xff]  ;;  %v3255_v21 = vld [vmem:[#allocation8 + $0x1e8] sm:$0xff] }
0x1266   : > { %v3100_v40 = vpop.permute.xlu1 %3099  ;;  %3266 = vmatpush.msrb.mxu1 %v3254_v20  ;;  %3286 = vmatpush.msra.mxu2 %v3255_v21  ;;  %v3319_v21 = vld [vmem:[#allocation10 + $0x118] sm:$0xff] }
0x1267   : > { %v3102_v37 = vsel %vm1356_vm6, %v3100_v40, 0.0  ;;  %vm5546_vm6 = vmmov %vm5542_vm1  ;;  %v3253_v40 = vld [vmem:[#allocation8 + $0x1d8] sm:$0xff] }
0x1268   : > { %3287 = vmatpush.msra.mxu2 %v3253_v40 }
0x126b   : > { %v3094_v39 = vpop.permute.xlu2 %3093 }
0x126c   : > { %v3096_v23 = vsel %vm1349_vm5, %v3094_v39, 0.0  ;;  %vm5545_vm5 = vmmov %vm5542_vm1 }
0x126d   : > { %v3097_v28 = vadd.f32 %v3096_v23, %v3091_v24 }
0x126f   : > { %v3103_v52 = vadd.f32 %v3102_v37, %v3097_v28  ;;  %v3250_v28 = vld [vmem:[#allocation8 + $0x1c0] sm:$0xff] }
0x1270   : > { %v3246_v37 = vld [vmem:[#allocation8 + $0x1a0] sm:$0xff] }
0x1274   : > { %v3106_v33 = vpop.permute.xlu2 %3105 }
0x1275   : > { %v3108_v41 = vsel %vm5541_vm14, %v3106_v33, 0.0  ;;  %v3251_v33 = vld [vmem:[#allocation8 + $0x1c8] sm:$0xff] }
0x1276   : > { %v3109_v2 = vadd.f32 %v3108_v41, %v3103_v52  ;;  %3288 = vmatpush.msra.mxu2 %v3251_v33  ;;  %v3247_v41 = vld [vmem:[#allocation8 + $0x1a8] sm:$0xff]  ;;  %v3244_v52 = vld [vmem:[#allocation8 + $0x190] sm:$0xff] }
0x12a8   : > { %v2747_v11 = vpop.f32.mrf.mxu2 }
0x12a9   : > { %3679 = vmatmul.msk.f32.vlgmr.msra.gmra.mxu3 %vm5538_vm11, %v2747_v11 }
0x12b0   : > { %v2931_v32 = vpop.f32.mrf.mxu2 }
0x12b1   : > { %v2932_v34 = vadd.f32 %v2931_v32, %v2909_v31  ;;  %v3252_v32 = vld [vmem:[#allocation8 + $0x1d0] sm:$0xff] }
0x12b2   : > { %3267 = vmatpush.msrb.mxu1 %v3252_v32  ;;  %v4013_v32 = vld [vmem:[%s5428_s12] ss:$0 sm:$0xff] }
0x12b3   : > { %v2934_v36 = vmul.f32 0.17677669, %v2932_v34  ;;  %v3248_v34 = vld [vmem:[#allocation8 + $0x1b0] sm:$0xff] }
0x12b4   : > { %3268 = vmatpush.msrb.mxu1 %v3250_v28  ;;  %v4014_v28 = vld [vmem:[%s5429_s13] ss:$0 sm:$0xff] }
0x12b5   : > { %v2935_v53 = vsel %vm5542_vm1, %v2934_v36, -inf }
0x12b6   : > { %2936 = vmax.xlane.f32.xlu0 %v2935_v53  ;;  %3269 = vmatpush.msrb.mxu1 %v3248_v34  ;;  %v3245_v53 = vld [vmem:[#allocation8 + $0x198] sm:$0xff]  ;;  %v3318_v34 = vld [vmem:[#allocation10 + $0x110] sm:$0xff] }
0x12b8   : > { %v3131_v4 = vpop.f32.mrf.mxu2  ;;  %3270 = vmatpush.msrb.mxu1 %v3246_v37  ;;  %v3317_v37 = vld [vmem:[#allocation10 + $0x108] sm:$0xff] }
0x12b9   : > { %v3132_v6 = vadd.f32 %v3131_v4, %v3109_v2  ;;  %v3243_v2 = vld [vmem:[#allocation8 + $0x188] sm:$0xff]  ;;  %v3240_v4 = vld [vmem:[#allocation8 + $0x170] sm:$0xff] }
0x12ba   : > { %3271 = vmatpush.msrb.mxu1 %v3244_v52  ;;  %v3316_v52 = vld [vmem:[#allocation10 + $0x100] sm:$0xff] }
0x12bb   : > { %v3134_v55 = vmul.f32 0.17677669, %v3132_v6  ;;  %v3241_v6 = vld [vmem:[#allocation8 + $0x178] sm:$0xff] }
0x12bd   : > { %v3135_v12 = vsel %vm5543_vm2, %v3134_v55, -inf }
0x12be   : > { %3136 = vmax.xlane.f32.xlu1 %v3135_v12  ;;  %v3239_v12 = vld [vmem:[#allocation8 + $0x168] sm:$0xff] }
0x12d7   : > { %2946 = vrot.lane.b32.xlu1 %v5046_v3, %s4304_s9  ;;  %s5550_s9 = sld [smem:[#allocation40_spill]] }
0x12df   : > { %3436 = vperm.xlu1 %3948, %v5289_v57  }
0x1329   : > { %v2937_v5 = vpop.xlane.xlu0 %2936 }
0x132a   : > { %v2938_v59 = vsub.f32 %v2934_v36, %v2937_v5  ;;  %v3249_v36 = vld [vmem:[#allocation8 + $0x1b8] sm:$0xff] }
0x132b   : > { %3289 = vmatpush.msra.mxu2 %v3249_v36  ;;  %v3237_v5 = vld [vmem:[#allocation8 + $0x158] sm:$0xff]  ;;  %v3337_v36 = vld [vmem:[#allocation10 + $0x1a8] sm:$0xff] }
0x132c   : > { %v2939_v60 = vmul.f32 1.442695, %v2938_v59  ;;  %v2770_v50 = vpop.f32.mrf.mxu3  ;;  %v3234_v59 = vld [vmem:[#allocation8 + $0x140] sm:$0xff] }
0x132d   : > { %v2794_v10 = vadd.f32 %v2793_v56, %v2770_v50  ;;  %3290 = vmatpush.msra.mxu2 %v3247_v41  ;;  %v3325_v50 = vld [vmem:[#allocation10 + $0x148] sm:$0xff]  ;;  %v3336_v41 = vld [vmem:[#allocation10 + $0x1a0] sm:$0xff] }
0x132e   : > { %3995 = vpow2.f32 %v2939_v60  ;;  %v3235_v60 = vld [vmem:[#allocation8 + $0x148] sm:$0xff] }
0x132f   : > { %3291 = vmatpush.msra.mxu2 %v3245_v53  ;;  %v3334_v53 = vld [vmem:[#allocation10 + $0x190] sm:$0xff] }
0x1331   : > { %v3137_v61 = vpop.xlane.xlu1 %3136  ;;  %3292 = vmatpush.msra.mxu2 %v3243_v2  ;;  %v3332_v2 = vld [vmem:[#allocation10 + $0x180] sm:$0xff] }
0x1332   : > { %v3138_v62 = vsub.f32 %v3134_v55, %v3137_v61  ;;  %v3238_v55 = vld [vmem:[#allocation8 + $0x160] sm:$0xff]  ;;  %v3232_v61 = vld [vmem:[#allocation8 + $0x130] sm:$0xff] }
0x1333   : > { %3293 = vmatpush.msra.mxu2 %v3241_v6  ;;  %v3408_v6 = vld [vmem:[#allocation11 + $0x70] sm:$0xff] }
0x1334   : > { %v3996_v54 = vpop.eup %3995  ;;  %v3139_v63 = vmul.f32 1.442695, %v3138_v62  ;;  %v3233_v62 = vld [vmem:[#allocation8 + $0x138] sm:$0xff] }
0x1335   : > { %v2941_v58 = vsel %vm5544_vm3, %v3996_v54, 0.0  ;;  %3294 = vmatpush.msra.mxu2 %v3239_v12  ;;  %v3406_v12 = vld [vmem:[#allocation11 + $0x60] sm:$0xff] }
0x1336   : > { %3997 = vpow2.f32 %v3139_v63  ;;  %2942 = vadd.xlane.f32.xlu2 %v2941_v58  ;;  %v3231_v63 = vld [vmem:[#allocation8 + $0x128] sm:$0xff]  ;;  %v3228_v58 = vld [vmem:[#allocation8 + $0x110] sm:$0xff] }
0x1337   : > { %3295 = vmatpush.msra.mxu2 %v3237_v5  ;;  %v3404_v5 = vld [vmem:[#allocation11 + $0x50] sm:$0xff] }
0x1339   : > { %3296 = vmatpush.msra.mxu2 %v3235_v60  ;;  %v3402_v60 = vld [vmem:[#allocation11 + $0x40] sm:$0xff] }
0x133b   : > { %3297 = vmatpush.msra.mxu2 %v3233_v62  ;;  %v3401_v62 = vld [vmem:[#allocation11 + $0x38] sm:$0xff] }
0x133c   : > { %v3998_v35 = vpop.eup %3997 }
0x133d   : > { %v3141_v7 = vsel %vm5545_vm5, %v3998_v35, 0.0  ;;  %3298 = vmatpush.msra.mxu2 %v3231_v63 }
0x133e   : > { %3142 = vadd.xlane.f32.xlu0 %v3141_v7  ;;  %v3226_v7 = vld [vmem:[#allocation8 + $0x100] sm:$0xff] }
0x1349   : > { %v2947_v9 = vpop.permute.xlu1 %2946 }
0x134a   : > { %2967 = vmatpush.msrb.mxu3 %v2947_v9  ;;  %v3227_v9 = vld [vmem:[#allocation8 + $0x108] sm:$0xff] }
0x134e   : > { %3146 = vrot.lane.b32.xlu2 %v5046_v3, %s4305_s27  ;;  %s893_s27 = sand.u32 1, %s5549_s5  }
0x134f   : > { %s3646_s7 = sshll.u32 %s893_s27, 3  ;;  %s3484_s5 = scalar_lea.sflag [#allocation4], %s893_s27 }
0x1350   : > { %s895_s4 = scalar_lea.vmem [#allocation13], %s3646_s7  ;;  %s4215_s7 = scalar_lea.hbm %s5551_s23, 16 }
0x1351   : > { %s3496_s30 = sshll.u32 %s895_s4, 4  ;;  %s3497_s30 = int_to_ptr.vmem [resolvable:$true] %s3496_s30 }
0x13a9   : > { %v2943_v19 = vpop.xlane.xlu2 %2942 }
0x13aa   : > { %3999 = vrcp.f32 %v2943_v19  ;;  %v3346_v19 = vld [vmem:[#allocation10 + $0x1f0] sm:$0xff] }
0x13b0   : > { %v4000_v29 = vpop.eup %3999 }
0x13b1   : > { %v2945_v30 = vmul.f32 %v4000_v29, %v3996_v54  ;;  %v3147_v42 = vpop.permute.xlu2 %3146  ;;  %v3143_v43 = vpop.xlane.xlu0 %3142  ;;  %v3230_v54 = vld [vmem:[#allocation8 + $0x120] sm:$0xff] }
0x13b2   : > { %4001 = vrcp.f32 %v3143_v43  ;;  %3167 = vmatpush.msra.mxu3 %v3147_v42  ;;  %v3328_v43 = vld [vmem:[#allocation10 + $0x160] sm:$0xff] }
0x13b3   : > { %3684 = vmatmul.msk.f32.vlgmr.msrb.gmra.mxu3 %vm5546_vm6, %v2945_v30  ;;  %v3345_v30 = vld [vmem:[#allocation10 + $0x1e8] sm:$0xff] }
0x13b4   : > { %3353 = vmatpush.msrb.mxu3 %v3331_v26 }
0x13b6   : > { %3354 = vmatpush.msrb.mxu3 %v3330_v38 }
0x13b8   : > { %v4002_v44 = vpop.eup %4001  ;;  %3355 = vmatpush.msrb.mxu3 %v3329_v1 }
0x13b9   : > { %v3145_v3 = vmul.f32 %v4002_v44, %v3998_v35  ;;  %v3229_v35 = vld [vmem:[#allocation8 + $0x118] sm:$0xff]  ;;  %v3344_v44 = vld [vmem:[#allocation10 + $0x1e0] sm:$0xff] }
0x13ba   : > { %3299 = vmatpush.msra.mxu2 %v3229_v35  ;;  %3356 = vmatpush.msrb.mxu3 %v3328_v43  ;;  %v3397_v43 = vld [vmem:[#allocation11 + $0x18] sm:$0xff] }
0x13bb   : > { %3689 = vmatmul.msk.f32.vlgmr.msra.gmra.mxu3 %vm5547_vm7, %v3145_v3 }
0x13bc   : > { %3300 = vmatpush.msra.mxu2 %v3227_v9  ;;  %3357 = vmatpush.msrb.mxu3 %v3327_v46  ;;  %v3398_v9 = vld [vmem:[#allocation11 + $0x20] sm:$0xff] }
0x13bd   : > { %v3394_v46 = vld [vmem:[#allocation11] sm:$0xff] }
0x13be   : > { %3358 = vmatpush.msrb.mxu3 %v3326_v48  ;;  %v3455_v48 = vld [vmem:[%s5440_s24 + $0x70] sm:$0xff] }
0x13c0   : > { %3359 = vmatpush.msrb.mxu3 %v3325_v50  ;;  %v3453_v50 = vld [vmem:[%s5440_s24 + $0x60] sm:$0xff] }
0x1436   : > { %v2969_v51 = vpop.f32.mrf.mxu3 }
0x1437   : > { %3685 = vmatmul.msk.f32.vlgmr.msrb.gmra.mxu0 %vm5532_vm0, %v2969_v51  ;;  %v3341_v51 = vld [vmem:[#allocation10 + $0x1c8] sm:$0xff] }
0x1438   : > { %3373 = vmatpush.msrb.mxu0 %v3347_v0 }
0x143a   : > { %3374 = vmatpush.msrb.mxu0 %v3346_v19 }
0x143c   : > { %3375 = vmatpush.msrb.mxu0 %v3345_v30 }
0x143e   : > { %v3169_v25 = vpop.f32.mrf.mxu3  ;;  %3376 = vmatpush.msrb.mxu0 %v3344_v44  ;;  %v3396_v44 = vld [vmem:[#allocation11 + $0x10] sm:$0xff] }
0x143f   : > { %3690 = vmatmul.msk.f32.vlgmr.msra.gmra.mxu0 %vm5548_vm15, %v3169_v25  ;;  %v3324_v25 = vld [vmem:[#allocation10 + $0x140] sm:$0xff] }
0x1440   : > { %3377 = vmatpush.msrb.mxu0 %v3343_v47  ;;  %3360 = vmatpush.msrb.mxu3 %v3324_v25  ;;  %v3456_v47 = vld [vmem:[%s5440_s24 + $0x78] sm:$0xff]  ;;  %v3451_v25 = vld [vmem:[%s5440_s24 + $0x50] sm:$0xff] }
0x1441   : > { %3461 = vmatpush.msrb.mxu2 %v3456_v47 }
0x1442   : > { %3378 = vmatpush.msrb.mxu0 %v3342_v49  ;;  %v3454_v49 = vld [vmem:[%s5440_s24 + $0x68] sm:$0xff] }
0x1443   : > { %3462 = vmatpush.msrb.mxu2 %v3455_v48 }
0x1444   : > { %3379 = vmatpush.msrb.mxu0 %v3341_v51  ;;  %v3452_v51 = vld [vmem:[%s5440_s24 + $0x58] sm:$0xff] }
0x1445   : > { %3463 = vmatpush.msrb.mxu2 %v3454_v49 }
0x1447   : > { %3464 = vmatpush.msrb.mxu2 %v3453_v50 }
0x1449   : > { %3465 = vmatpush.msrb.mxu2 %v3452_v51 }
0x144b   : > { %3466 = vmatpush.msrb.mxu2 %v3451_v25 }
0x14b4   : > { %v2992_v27 = vpop.f32.mrf.mxu0 }
0x14b5   : > { %v2995_v39 = vadd.f32 %v2992_v27, %v2794_v10  ;;  %v3323_v27 = vld [vmem:[#allocation10 + $0x138] sm:$0xff] }
0x14b6   : > { %3361 = vmatpush.msrb.mxu3 %v3323_v27  ;;  %v3448_v27 = vld [vmem:[%s5440_s24 + $0x38] sm:$0xff] }
0x14bc   : > { %v3192_v11 = vpop.f32.mrf.mxu0 }
0x14bd   : > { %v3195_v8 = vadd.f32 %v3192_v11, %v2995_v39  ;;  %v3339_v39 = vld [vmem:[#allocation10 + $0x1b8] sm:$0xff]  ;;  %v3322_v11 = vld [vmem:[#allocation10 + $0x130] sm:$0xff] }
0x14be   : > { %3362 = vmatpush.msrb.mxu3 %v3322_v11  ;;  %v3445_v11 = vld [vmem:[%s5440_s24 + $0x20] sm:$0xff] }
0x14bf   : > { %v3196_v14 = vadd.f32 %v3195_v8, %v5024_v18 }
0x14c1   : > { %v5304_v15 = vadd.f32 %v3959_v13, %v3196_v14  ;;  %v3338_v13 = vld [vmem:[#allocation10 + $0x1b0] sm:$0xff]  ;;  %v3321_v14 = vld [vmem:[#allocation10 + $0x128] sm:$0xff] }
0x14c2   : > { %3363 = vmatpush.msrb.mxu3 %v3321_v14 }
0x14c3   : > { %3203 = vadd.xlane.f32.xlu0 %v5304_v15 }
0x14c4   : > { %3364 = vmatpush.msrb.mxu3 %v3320_v17 }
0x14c6   : > { %3365 = vmatpush.msrb.mxu3 %v3319_v21 }
0x14c8   : > { %3366 = vmatpush.msrb.mxu3 %v3318_v34 }
0x14ca   : > { %3367 = vmatpush.msrb.mxu3 %v3317_v37 }
0x14cc   : > { %3368 = vmatpush.msrb.mxu3 %v3316_v52 }
0x1536   : > { %v3204_v23 = vpop.xlane.xlu0 %3203 }
0x1537   : > { %v3205_v24 = vmul.f32 %v3204_v23, %v4645_v22 }
0x1539   : > { %v5309_v31 = vsub.f32 %v5304_v15, %v3205_v24 }
0x153b   : > { %v3207_v18 = vmul.f32 %v5309_v31, %v5309_v31 }
0x153d   : > { %3208 = vadd.xlane.f32.xlu0 %v3207_v18 }
0x1551   : > { %3308 = vperm.xlu0 %3947, %v5289_v57   ;;  %v3236_v57 = vld [vmem:[#allocation8 + $0x150] sm:$0xff] }
0x1559   : > { %3949 = vset.pattern.permute.xlu0 %v4296_v45  ;;  %v3242_v45 = vld [vmem:[#allocation8 + $0x180] sm:$0xff] }
0x155a   : > { %3272 = vmatpush.msrb.mxu1 %v3242_v45  ;;  %v3333_v45 = vld [vmem:[#allocation10 + $0x188] sm:$0xff] }
0x155c   : > { %3273 = vmatpush.msrb.mxu1 %v3240_v4  ;;  %v3409_v4 = vld [vmem:[#allocation11 + $0x78] sm:$0xff] }
0x155e   : > { %3274 = vmatpush.msrb.mxu1 %v3238_v55  ;;  %v3407_v55 = vld [vmem:[#allocation11 + $0x68] sm:$0xff] }
0x1560   : > { %3275 = vmatpush.msrb.mxu1 %v3236_v57  ;;  %v3405_v57 = vld [vmem:[#allocation11 + $0x58] sm:$0xff] }
0x1562   : > { %3276 = vmatpush.msrb.mxu1 %v3234_v59  ;;  %v3403_v59 = vld [vmem:[#allocation11 + $0x48] sm:$0xff] }
0x1564   : > { %3277 = vmatpush.msrb.mxu1 %v3232_v61  ;;  %v3692_v61 = vld [vmem:[%s5435_s19 + $0x2] sm:$0x3] }
0x1565   : > { %v3261_v63 = vperm.slane %v3692_v61, 0  ;;  %v3262_v0 = vperm.slane %v3692_v61, 1 }
0x1566   : > { %3278 = vmatpush.msrb.mxu1 %v3230_v54  ;;  %v3400_v54 = vld [vmem:[#allocation11 + $0x30] sm:$0xff] }
0x1568   : > { %3279 = vmatpush.msrb.mxu1 %v3228_v58  ;;  %v3399_v58 = vld [vmem:[#allocation11 + $0x28] sm:$0xff] }
0x156a   : > { %3280 = vmatpush.msrb.mxu1 %v3226_v7 }
0x156c   : > { %3414 = vmatpush.msra.mxu1 %v3409_v4 }
0x156e   : > { %3415 = vmatpush.msra.mxu1 %v3408_v6 }
0x1570   : > { %3416 = vmatpush.msra.mxu1 %v3407_v55 }
0x1572   : > { %3417 = vmatpush.msra.mxu1 %v3406_v12 }
0x1574   : > { %3418 = vmatpush.msra.mxu1 %v3405_v57 }
0x1576   : > { %3419 = vmatpush.msra.mxu1 %v3404_v5 }
0x1578   : > { %3420 = vmatpush.msra.mxu1 %v3403_v59 }
0x157a   : > { %3421 = vmatpush.msra.mxu1 %v3402_v60 }
0x157c   : > { %3422 = vmatpush.msra.mxu1 %v3401_v62 }
0x157e   : > { %3423 = vmatpush.msra.mxu1 %v3400_v54 }
0x1580   : > { %3424 = vmatpush.msra.mxu1 %v3399_v58 }
0x1582   : > { %3425 = vmatpush.msra.mxu1 %v3398_v9 }
0x1584   : > { %3426 = vmatpush.msra.mxu1 %v3397_v43 }
0x1586   : > { %3427 = vmatpush.msra.mxu1 %v3396_v44 }
0x15b0   : > { %v3209_v29 = vpop.xlane.xlu0 %3208 }
0x15b1   : > { %v3210_v42 = vmul.f32 %v3209_v29, %v4645_v22  ;;  %v3340_v22 = vld [vmem:[#allocation10 + $0x1c0] sm:$0xff] }
0x15b2   : > { %3380 = vmatpush.msrb.mxu0 %v3340_v22  ;;  %v3450_v22 = vld [vmem:[%s5440_s24 + $0x48] sm:$0xff] }
0x15b3   : > { %v3211_v3 = vadd.f32 1e-05, %v3210_v42  ;;  %3467 = vmatpush.msrb.mxu2 %v3450_v22 }
0x15b4   : > { %3381 = vmatpush.msrb.mxu0 %v3339_v39  ;;  %v3446_v39 = vld [vmem:[%s5440_s24 + $0x28] sm:$0xff] }
0x15b5   : > { %4003 = vrsqrt.f32 %v3211_v3  ;;  %vm3218_vm8 = vweird.f32 %v3211_v3 }
0x15b6   : > { %3382 = vmatpush.msrb.mxu0 %v3338_v13  ;;  %v3444_v13 = vld [vmem:[%s5440_s24 + $0x18] sm:$0xff] }
0x15b8   : > { %3383 = vmatpush.msrb.mxu0 %v3337_v36  ;;  %v3962_v36 = vld [vmem:[%s5552_s18] ss:$0 sm:$0xff] }
0x15ba   : > { %3384 = vmatpush.msrb.mxu0 %v3336_v41 }
0x15bb   : > { %v4004_v56 = vpop.eup %4003 }
0x15bc   : > { %v3213_v10 = vmul.f32 %v4004_v56, %v3211_v3  ;;  %vm3219_vm4 = vweird.f32 %v4004_v56  ;;  %v3395_v3 = vld [vmem:[#allocation11 + $0x8] sm:$0xff] }
0x15bd   : > { %vm3220_vm9 = vmor %vm3218_vm8, %vm3219_vm4  ;;  %3428 = vmatpush.msra.mxu1 %v3395_v3 }
0x15be   : > { %v3214_v8 = vmul.f32 %v4004_v56, %v3213_v10  ;;  %v3447_v10 = vld [vmem:[%s5440_s24 + $0x30] sm:$0xff] }
0x15bf   : > { %3429 = vmatpush.msra.mxu1 %v3394_v46 }
0x15c0   : > { %v3215_v16 = vmul.f32 0.5, %v3214_v8  ;;  %v3960_v8 = vld [vmem:[%s5437_s21 + $0x1] ss:$0 sm:$0xff] }
0x15c2   : > { %v3216_v20 = vsub.f32 1.5, %v3215_v16 }
0x15c3   : > { %v3309_v7 = vpop.permute.xlu0 %3308 }
0x15c4   : > { %v3217_v23 = vmul.f32 %v4004_v56, %v3216_v20 }
0x15c6   : > { %v3221_v24 = vsel %vm3220_vm9, %v4004_v56, %v3217_v23  ;;  %v3449_v56 = vld [vmem:[%s5440_s24 + $0x40] sm:$0xff]  ;;  %v3443_v23 = vld [vmem:[%s5440_s24 + $0x10] sm:$0xff] }
0x15c7   : > { %v3222_v18 = vmul.f32 %v3221_v24, %v5309_v31  ;;  %v3335_v31 = vld [vmem:[#allocation10 + $0x198] sm:$0xff]  ;;  %3468 = vmatpush.msrb.mxu2 %v3449_v56  ;;  %v3442_v24 = vld [vmem:[%s5440_s24 + $0x8] sm:$0xff] }
0x15c8   : > { %3385 = vmatpush.msrb.mxu0 %v3335_v31 }
0x15c9   : > { %v3223_v40 = vmul.f32 %v4013_v32, %v3222_v18  ;;  %3469 = vmatpush.msrb.mxu2 %v3448_v27  ;;  %v3441_v18 = vld [vmem:[%s5440_s24] sm:$0xff] }
0x15ca   : > { %3386 = vmatpush.msrb.mxu0 %v3334_v53 }
0x15cb   : > { %v3224_v33 = vadd.f32 %v4014_v28, %v3223_v40  ;;  %3470 = vmatpush.msrb.mxu2 %v3447_v10  ;;  %v3437_v40 = vpop.permute.xlu1 %3436 }
0x15cc   : > { %3387 = vmatpush.msrb.mxu0 %v3333_v45 }
0x15cd   : > { %3281 = vmatmul.f32.vlgmr.msrb.gmra.mxu1 %v3224_v33  ;;  %3301 = vmatmul.f32.vlgmr.msra.gmra.mxu2 %v3224_v33 }
0x15ce   : > { %3388 = vmatpush.msrb.mxu0 %v3332_v2  ;;  %3471 = vmatpush.msrb.mxu2 %v3446_v39 }
0x15d0   : > { %3472 = vmatpush.msrb.mxu2 %v3445_v11 }
0x15d2   : > { %3473 = vmatpush.msrb.mxu2 %v3444_v13 }
0x15d4   : > { %3474 = vmatpush.msrb.mxu2 %v3443_v23 }
0x15d6   : > { %3475 = vmatpush.msrb.mxu2 %v3442_v24 }
0x15d8   : > { %3476 = vmatpush.msrb.mxu2 %v3441_v18 }
0x164a   : > { %v3282_v35 = vpop.f32.mrf.mxu1 }
0x164b   : > { %v3283_v26 = vadd.f32 %v3282_v35, %v3261_v63 }
0x164d   : > { %vm3305_vm10 = vcmp.ge.f32.partialorder %v3283_v26, 0.0  ;;  %v3311_v38 = vmul.f32 %v3309_v7, %v3283_v26 }
0x164f   : > { %v3313_v1 = vsel %vm3305_vm10, %v3283_v26, %v3311_v38 }
0x1650   : > { %v3302_v19 = vpop.f32.mrf.mxu2  ;;  %3369 = vmatmul.f32.vlgmr.msrb.gmra.mxu3 %v3313_v1 }
0x1651   : > { %v3303_v29 = vadd.f32 %v3302_v19, %v3262_v0 }
0x1653   : > { %vm3306_vm11 = vcmp.ge.f32.partialorder %v3303_v29, 0.0  ;;  %v3312_v30 = vmul.f32 %v3309_v7, %v3303_v29 }
0x1655   : > { %v3314_v42 = vsel %vm3306_vm11, %v3303_v29, %v3312_v30 }
0x1656   : > { %3389 = vmatmul.f32.vlgmr.msrb.gmra.mxu0 %v3314_v42 }
0x16d3   : > { %v3370_v14 = vpop.f32.mrf.mxu3  ;;  %v3390_v17 = vpop.f32.mrf.mxu0 }
0x16d4   : > { %v3371_v16 = vadd.f32 %v3960_v8, %v3370_v14 }
0x16d6   : > { %v3391_v20 = vadd.f32 %v3390_v17, %v3371_v16 }
0x16d8   : > { %v3393_v21 = vadd.f32 %v3391_v20, %v5304_v15  ;;  %v3961_v15 = vld [vmem:[%s5550_s9] ss:$0 sm:$0xff]  ;;  %s3498_s9 = sshll.u32 %s3494_s3, 4  ;;  %s3499_s9 = int_to_ptr.hbm [resolvable:$true] %s3498_s9 }
0x16d9   : > { %s4209_s8 = sshra.s32 %s3499_s9, 4  ;;  %s4210_s8 = int_to_ptr.hbm [resolvable:$true] %s4209_s8 }
0x16da   : > { %3430 = vmatmul.f32.vlgmr.msra.gmra.mxu1 %v3393_v21  ;;  %s4211_s2 = scalar_lea.hbm %s4210_s8, 8  ;;  %p4216_p3 = scmp.lt.s32.totalorder %s4210_s8, %s5551_s23 }
0x16db   : > { %p4212_p0 = scmp.ne.s32.totalorder %s4210_s8, %s4211_s2  ;;  %p4217_p4 = scmp.lt.s32.totalorder %s4215_s7, %s4211_s2 }
0x16dd   : > { %p4213_p1 = pnand %p4212_p0, %p4479_p5  ;;  %p4218_p7 = por %p4217_p4, %p4216_p3 }
0x16df   : > { %p4214_p2 = pneg %p4213_p1 }
0x16e1   : > { %p4219_p8 = pnand %p4218_p7, %p4214_p2 }
0x1757   : > { %v3431_v32 = vpop.f32.mrf.mxu1 }
0x1758   : > { %v3432_v28 = vadd.f32 %v3961_v15, %v3431_v32 }
0x175a   : > { %vm3434_vm12 = vcmp.ge.f32.partialorder %v3432_v28, 0.0  ;;  %v3439_v33 = vmul.f32 %v3437_v40, %v3432_v28 }
0x175c   : > { %v3440_v34 = vsel %vm3434_vm12, %v3432_v28, %v3439_v33 }
0x175d   : > { %3477 = vmatmul.f32.vlgmr.msrb.gmra.mxu2 %v3440_v34 }
0x17e0   : > { %v3478_v37 = vpop.f32.mrf.mxu2 }
0x17e1   : > { %v3479_v41 = vadd.f32 %v3962_v36, %v3478_v37 }
0x17e3   : > { %3482 = vst.msk [vmem:[%s895_s4] sm:$0xff] %vm3481_vm13, %v3479_v41 }
0x17e4   : > { %4222 = shalt.err (!%p4219_p8)
}
0x17e5   : > { %3722 = dma.vmem_to_hbm [thread:$0]  (%p4479_p5), %s3497_s30, 128, %s3499_s9, %s3484_s5  }
0x17e6 PF: > { %s5554_s27 = sld [smem:[#allocation22_spill]] }
0x17e7   : > { %s5555_s6 = sld [smem:[#allocation19_spill]] }
0x17ec   : > { %p3759_p9 = scmp.ge.s32.totalorder %s5554_s27, 2 }
0x17ed   : > { %s3510_s18 = sand.u32 1, %s5555_s6  }
0x17ee   : > { %p3744_p10 = pnand %p3759_p9, %p4483_p6  ;;  %s3511_s4 = scalar_lea.sflag [#allocation4], %s3510_s18 }
0x17f0   : > { %p3745_p11 = pneg %p3744_p10 }
0x17f2   : > { %4256 = dma.done.wait (%p3745_p11), %s3511_s4, 128  }
0x17f3   : > { %4258 = vsyncadd (%p3745_p11), %s3511_s4, 4294967168  ;;  %s5557_s28 = sld [smem:[#allocation23_spill]] }
0x17f4   : > { %s5558_s27 = sld [smem:[#allocation20_spill]] }
0x17f5   : > { %s5559_s3 = sld [smem:[#allocation21_spill]] }
0x17f6   : > { %s5560_s7 = sld [smem:[#allocation24_spill]] }
0x17f9   : > { %p40_p12 = scmp.ge.s32.totalorder %s5557_s28, 4  }
0x17fb   :  { %42 = sbr.rel (!%p40_p12) target bundleno = 24 (0x18), region = 195 }
0x1800   :  { %3517 = vsyncpa [#allocation3], 1 }
0x1801   :  { %3519 = vsyncpa [#allocation3 + $0x1], 1 }
0x1802   :  { %3520 = vsyncpa [#allocation6], 1 }
0x1803   :  { %3521 = vsyncpa [#allocation9], 1 }
0x1804   :  { %3522 = vsyncpa [#allocation12], 1 }
0x1805   :  { %3523 = vsyncpa [#allocation4], 1 }
0x1806   :  { %3525 = vsyncpa [#allocation4 + $0x1], 1 }

</bundles_post_ra>
